<compile_context>
chip_gen: v7x
topology: tpu7x:2x2x1
jax: 0.10.0
libtpu: 0.0.40
codegen_flags: <defaults>
</compile_context>

<pallas_src>
import jax
import jax.numpy as jnp
from jax import lax
from jax.experimental import pallas as pl
from jax.experimental.pallas import tpu as pltpu

EXPANSION = 4
BN_EPS = 1e-5

# --- single-buffer the grid-invariant weight blocks when supported ----------
try:
    _WEIGHT_PIPELINE = dict(pipeline_mode=pl.Buffered(buffer_count=1))
    pl.BlockSpec((8, 128), lambda i, j: (0, 0), **_WEIGHT_PIPELINE)   # probe
    _WEIGHT_BUFS = 1
except Exception:                      # older jax: fall back to default (2x)
    _WEIGHT_PIPELINE = {}
    _WEIGHT_BUFS = 2


def _bottleneck_kernel(x_ref, top_ref, bot_ref,
                       w1_ref, s1_ref, b1_ref,
                       w2_ref, s2_ref, b2_ref,
                       w3_ref, s3_ref, b3_ref,
                       out_ref, h1_ref, acc_ref):
    # x_ref   : (1, TH, W, Cin) bf16 row strip (NHWC)
    # top_ref : (1, 1, W, Cin)  bf16 image row max(t*TH-1, 0)
    # bot_ref : (1, 1, W, Cin)  bf16 image row min(t*TH+TH, H-1)
    # w1_ref  : (Cin, Pp)       bf16
    # w2_ref  : (3, 3*Pp, Pp)   bf16, [dy][dx*Pp + cin, cout]
    # w3_ref  : (Pp, Cout)      bf16
    # s*/b*   : (1, C)          f32 folded BatchNorm scale / bias
    # h1_ref  : (L, Pp)  f32 scratch, L = (TH+2)*W (conv2 input incl. halos)
    # acc_ref : (HW, Pp) f32 scratch, HW = TH*W   (conv2 accumulator)
    f32, bf16 = jnp.float32, jnp.bfloat16
    _, TH, W, Cin = x_ref.shape
    Pp = w1_ref.shape[1]
    Cout = w3_ref.shape[1]
    HW = TH * W
    L = (TH + 2) * W

    t = pl.program_id(1)
    nt = pl.num_programs(1)
    w1 = w1_ref[...]
    s1 = s1_ref[...]
    b1 = b1_ref[...]

    # ---- conv1 (1x1) + bn1 + relu (center rows straight into h1 scratch) ----
    xc = x_ref[...].reshape(HW, Cin)                               # bf16
    h1_ref[pl.ds(W, HW), :] = jnp.maximum(
        jnp.dot(xc, w1, preferred_element_type=f32) * s1 + b1, 0.0)

    # Halo rows: conv1 them too, but zero them at the image border so that
    # conv2's zero padding happens in h1-space (matches PyTorch / reference).
    hr = jnp.concatenate([top_ref[...].reshape(W, Cin),
                          bot_ref[...].reshape(W, Cin)], axis=0)   # (2W, Cin)
    hh = jnp.maximum(jnp.dot(hr, w1, preferred_element_type=f32) * s1 + b1, 0.0)
    keep_top = (t > 0).astype(f32)            # 0.0 on the first strip
    keep_bot = (t < nt - 1).astype(f32)       # 0.0 on the last strip
    h1_ref[pl.ds(0, W), :] = hh[:W] * keep_top
    h1_ref[pl.ds(W + HW, W), :] = hh[W:] * keep_bot

    # ---- conv2 (3x3, pad=1) --------------------------------------------------
    # Column taps: +-1 shifts along the flat (row*W + col) axis via pltpu.roll
    # (XLU slot, free while the MXU runs); the W-border mask and the bf16 cast
    # are fused into a single pass per tap.
    h1 = h1_ref[...]                                               # (L, Pp) f32
    col = lax.broadcasted_iota(jnp.int32, (L, 1), 0) % W
    left = jnp.where(col == 0, 0.0,
                     pltpu.roll(h1, shift=1, axis=0)).astype(bf16)       # [j]=h1[j-1]
    right = jnp.where(col == W - 1, 0.0,
                      pltpu.roll(h1, shift=L - 1, axis=0)).astype(bf16)  # [j]=h1[j+1]
    taps = jnp.concatenate([left, h1.astype(bf16), right], axis=-1)      # (L, 3*Pp)

    # Three deep matmuls (K = 3*Pp), one per dy, accumulated in VMEM scratch.
    # NOTE: dy*W should be a multiple of 16 (bf16 sublane packing) so these row
    # windows don't need a relayout; pose_resnet widths (16/24/48/64/...) are ok.
    acc_ref[...] = jnp.dot(taps[0:HW], w2_ref[0], preferred_element_type=f32)
    for dy in range(1, 3):
        acc_ref[...] += jnp.dot(taps[dy * W:dy * W + HW], w2_ref[dy],
                                preferred_element_type=f32)
    h2 = jnp.maximum(acc_ref[...] * s2_ref[...] + b2_ref[...], 0.0)      # (HW, Pp)

    # ---- conv3 (1x1) + bn3 + residual + relu ---------------------------------
    h3 = jnp.dot(h2.astype(bf16), w3_ref[...], preferred_element_type=f32)
    h3 = h3 * s3_ref[...] + b3_ref[...]
    y = jnp.maximum(h3 + xc.astype(f32), 0.0)
    out_ref[0] = y.reshape(TH, W, Cout).astype(out_ref.dtype)


def _round_up(v, m):
    return (v + m - 1) // m * m


def _vmem_capacity_bytes():
    """Physical VMEM of the local chip; conservative 64 MiB fallback."""
    try:
        cap = getattr(pltpu.get_tpu_info(), "vmem_capacity_bytes", None)
        if cap:
            return int(cap)
    except Exception:
        pass
    return 64 * 2**20


def _vmem_estimate(th, W, Cin, Pp, Cout, weight_bufs=_WEIGHT_BUFS):
    L = (th + 2) * W
    hw = th * W
    io = 2 * (hw * Cin + 2 * W * Cin + hw * Cout) * 2          # dbl-buffered bf16 blocks
    wts = weight_bufs * ((Cin * Pp + 9 * Pp * Pp + Pp * Cout) * 2
                         + (4 * Pp + 2 * Cout) * 4)
    scratch = (L * Pp + hw * Pp) * 4                           # h1 + conv2 accumulator
    tmp = (3 * L * Pp) * 2 + (2 * L * Pp + hw * Pp + 2 * hw * Cout) * 4
    return io + wts + scratch + tmp


def _pick_tile_rows(H, W, Cin, Pp, Cout, budget, force_split):
    max_th = H
    if force_split and H > 1:
        max_th = H // 2          # >=2 strips so both v7x TensorCores get work
    for th in range(max_th, 0, -1):
        if H % th == 0 and _vmem_estimate(th, W, Cin, Pp, Cout) <= budget:
            return th
    return 1


def _pack_params(p, Pp):
    """Pack weights / folded-BN vectors.  Padded channels MUST stay exactly
    zero (weights, scales and biases) so they contribute nothing through the
    relu / conv3 / residual path."""
    bf16, f32 = jnp.bfloat16, jnp.float32
    planes = p["w1"].shape[0]
    Cout = p["w3"].shape[0]
    padP = Pp - planes

    w1 = jnp.pad(jnp.transpose(p["w1"][:, :, 0, 0]), ((0, 0), (0, padP))).astype(bf16)
    w2 = jnp.transpose(p["w2"], (2, 3, 1, 0))                  # (kh, kw, cin, cout)
    w2 = jnp.pad(w2, ((0, 0), (0, 0), (0, padP), (0, padP)))
    w2 = w2.reshape(3, 3 * Pp, Pp).astype(bf16)
    w3 = jnp.pad(jnp.transpose(p["w3"][:, :, 0, 0]), ((0, padP), (0, 0))).astype(bf16)

    def vec(a, n):                         # zero-padded BN scale/bias rows
        return jnp.pad(a.astype(f32), (0, n - a.shape[0])).reshape(1, n)

    return (w1, vec(p["s1"], Pp), vec(p["b1"], Pp),
            w2, vec(p["s2"], Pp), vec(p["b2"], Pp),
            w3, vec(p["s3"], Cout), vec(p["b3"], Cout))


def bottleneck_forward_nhwc(x_nhwc, p):
    """Pallas Bottleneck forward, NHWC in / NHWC out (stride=1, no downsample).

    Prefer passing bf16 activations (a full NHWC/bf16 model avoids the extra
    cast pass here entirely)."""
    N, H, W, Cin = x_nhwc.shape
    planes = p["w1"].shape[0]
    Cout = p["w3"].shape[0]
    assert Cout == Cin, "identity residual requires inplanes == planes * expansion"

    Pp = _round_up(max(planes, 128), 128)       # lane-dense bottleneck width

    cap = _vmem_capacity_bytes()
    budget = int(0.30 * cap)                    # ~38 MiB on 128 MiB chips, ~19 MiB on v7x
    TH = _pick_tile_rows(H, W, Cin, Pp, Cout, budget=budget, force_split=(N == 1))
    T = H // TH
    HW, L = TH * W, (TH + 2) * W

    x = x_nhwc if x_nhwc.dtype == jnp.bfloat16 else x_nhwc.astype(jnp.bfloat16)
    packed = _pack_params(p, Pp)

    def _const(shape):                          # grid-invariant (weight) block
        nd = len(shape)
        return pl.BlockSpec(shape, lambda n, t, _nd=nd: (0,) * _nd,
                            **_WEIGHT_PIPELINE)

    est = _vmem_estimate(TH, W, Cin, Pp, Cout)
    vmem_limit = int(min(max(2 * est, 32 * 2**20), int(0.75 * cap)))

    out = pl.pallas_call(
        _bottleneck_kernel,
        out_shape=jax.ShapeDtypeStruct((N, H, W, Cout), jnp.bfloat16),
        grid_spec=pltpu.PrefetchScalarGridSpec(
            num_scalar_prefetch=0,
            grid=(N, T),
            in_specs=[
                pl.BlockSpec((1, TH, W, Cin), lambda n, t: (n, t, 0, 0)),
                # One-row 3x3 halos read straight from x; the row index is
                # clamped at the image border and those rows are zeroed
                # in h1-space inside the kernel.
                pl.BlockSpec((1, 1, W, Cin),
                             lambda n, t: (n, jnp.maximum(t * TH - 1, 0), 0, 0)),
                pl.BlockSpec((1, 1, W, Cin),
                             lambda n, t: (n, jnp.minimum(t * TH + TH, H - 1), 0, 0)),
                _const((Cin, Pp)), _const((1, Pp)), _const((1, Pp)),
                _const((3, 3 * Pp, Pp)), _const((1, Pp)), _const((1, Pp)),
                _const((Pp, Cout)), _const((1, Cout)), _const((1, Cout)),
            ],
            out_specs=pl.BlockSpec((1, TH, W, Cout), lambda n, t: (n, t, 0, 0)),
            scratch_shapes=[pltpu.VMEM((L, Pp), jnp.float32),
                            pltpu.VMEM((HW, Pp), jnp.float32)],
        ),
        compiler_params=pltpu.CompilerParams(
            dimension_semantics=("parallel", "parallel"),
            vmem_limit_bytes=vmem_limit),
    )(x, x, x, *packed)
    return out


@jax.jit
def bottleneck_forward(x_nchw, p):
    """NCHW drop-in for Bottleneck.forward.  In a full NHWC/bf16 model, call
    bottleneck_forward_nhwc directly so the layout transpose / cast vanish."""
    x_nhwc = jnp.transpose(x_nchw, (0, 2, 3, 1)).astype(jnp.bfloat16)
    out = bottleneck_forward_nhwc(x_nhwc, p)
    return jnp.transpose(out, (0, 3, 1, 2)).astype(x_nchw.dtype)


def init_params(key, inplanes, planes):
    """Deterministic synthetic parameters matching Bottleneck.__init__ shapes."""
    ks = jax.random.split(key, 15)
    outc = planes * EXPANSION
    w1 = 0.1 * jax.random.normal(ks[0], (planes, inplanes, 1, 1), jnp.float32)
    w2 = 0.1 * jax.random.normal(ks[1], (planes, planes, 3, 3), jnp.float32)
    w3 = 0.1 * jax.random.normal(ks[2], (outc, planes, 1, 1), jnp.float32)

    def bn(kg, kb, km, kv, c):
        gamma = 1.0 + 0.1 * jax.random.normal(kg, (c,), jnp.float32)
        beta = 0.1 * jax.random.normal(kb, (c,), jnp.float32)
        mean = 0.1 * jax.random.normal(km, (c,), jnp.float32)
        var = jnp.abs(1.0 + 0.1 * jax.random.normal(kv, (c,), jnp.float32))
        scale = gamma * lax.rsqrt(var + BN_EPS)       # eval-mode BN folded
        bias = beta - mean * scale
        return scale, bias

    s1, b1 = bn(ks[3], ks[4], ks[5], ks[6], planes)
    s2, b2 = bn(ks[7], ks[8], ks[9], ks[10], planes)
    s3, b3 = bn(ks[11], ks[12], ks[13], ks[14], outc)
    return dict(w1=w1, w2=w2, w3=w3, s1=s1, b1=b1, s2=s2, b2=b2, s3=s3, b3=b3)


def reference_forward(x_nchw, p):
    """Plain-JAX reference with matching bf16-operand / f32-accumulate precision."""
    bf16, f32 = jnp.bfloat16, jnp.float32

    def conv(x, w, pad=0):
        return lax.conv_general_dilated(
            x.astype(bf16), w.astype(bf16), window_strides=(1, 1),
            padding=((pad, pad), (pad, pad)),
            dimension_numbers=("NCHW", "OIHW", "NCHW"),
            preferred_element_type=f32)

    def bn(x, s, b):
        return x * s[None, :, None, None] + b[None, :, None, None]

    h = jax.nn.relu(bn(conv(x_nchw, p["w1"]), p["s1"], p["b1"]))
    h = jax.nn.relu(bn(conv(h, p["w2"], pad=1), p["s2"], p["b2"]))
    h = bn(conv(h, p["w3"]), p["s3"], p["b3"])
    res = x_nchw.astype(bf16).astype(f32)
    return jax.nn.relu(h + res).astype(bf16).astype(jnp.float32)


if __name__ == "__main__":
    # Small but lane-dense shapes: inplanes = planes * expansion (identity
    # residual valid) and Cin/Cout multiples of 128 so stores/matmuls are dense.
    inplanes, planes = 128, 32
    N, H, W = 2, 16, 16

    key = jax.random.PRNGKey(0)
    kx, kp = jax.random.split(key)
    x = jax.random.normal(kx, (N, inplanes, H, W), jnp.float32)
    params = init_params(kp, inplanes, planes)

    out = jax.block_until_ready(bottleneck_forward(x, params))
    ref = jax.block_until_ready(reference_forward(x, params))

    assert out.shape == (N, planes * EXPANSION, H, W), out.shape
    err = float(jnp.max(jnp.abs(out.astype(jnp.float32) - ref)))
    tol = 2e-2 * float(jnp.max(jnp.abs(ref))) + 2e-2
    assert err < tol, f"max abs error {err} (tol {tol})"
    print("KERNEL_OK")
</pallas_src>

<mosaic_0001>
module attributes {stable_mosaic.version = 11 : i64} {
  func.func @_bottleneck_kernel(%arg0: i32, %arg1: i32, %arg2: memref<1x16x16x128xbf16, #tpu.memory_space<vmem>>, %arg3: memref<1x1x16x128xbf16, #tpu.memory_space<vmem>>, %arg4: memref<1x1x16x128xbf16, #tpu.memory_space<vmem>>, %arg5: memref<128x128xbf16, #tpu.memory_space<vmem>>, %arg6: memref<1x128xf32, #tpu.memory_space<vmem>>, %arg7: memref<1x128xf32, #tpu.memory_space<vmem>>, %arg8: memref<3x384x128xbf16, #tpu.memory_space<vmem>>, %arg9: memref<1x128xf32, #tpu.memory_space<vmem>>, %arg10: memref<1x128xf32, #tpu.memory_space<vmem>>, %arg11: memref<128x128xbf16, #tpu.memory_space<vmem>>, %arg12: memref<1x128xf32, #tpu.memory_space<vmem>>, %arg13: memref<1x128xf32, #tpu.memory_space<vmem>>, %arg14: memref<1x16x16x128xbf16, #tpu.memory_space<vmem>>, %arg15: memref<288x128xf32, #tpu.memory_space<vmem>>, %arg16: memref<256x128xf32, #tpu.memory_space<vmem>>) attributes {dimension_semantics = [#tpu.dimension_semantics<parallel>, #tpu.dimension_semantics<parallel>], iteration_bounds = array<i64: 2, 1>, scalar_prefetch = 0 : i64, scratch_operands = 2 : i64, tpu.core_type = #tpu.core_type<tc>, window_params = [{transform_indices = @transform_0, window_bounds = array<i64: 1, 16, 16, 128>}, {transform_indices = @transform_1, window_bounds = array<i64: 1, 1, 16, 128>}, {transform_indices = @transform_2, window_bounds = array<i64: 1, 1, 16, 128>}, {pipeline_mode = #tpu.pipeline_mode<synchronous>, transform_indices = @transform_3, window_bounds = array<i64: 128, 128>}, {pipeline_mode = #tpu.pipeline_mode<synchronous>, transform_indices = @transform_4, window_bounds = array<i64: 1, 128>}, {pipeline_mode = #tpu.pipeline_mode<synchronous>, transform_indices = @transform_5, window_bounds = array<i64: 1, 128>}, {pipeline_mode = #tpu.pipeline_mode<synchronous>, transform_indices = @transform_6, window_bounds = array<i64: 3, 384, 128>}, {pipeline_mode = #tpu.pipeline_mode<synchronous>, transform_indices = @transform_7, window_bounds = array<i64: 1, 128>}, {pipeline_mode = #tpu.pipeline_mode<synchronous>, transform_indices = @transform_8, window_bounds = array<i64: 1, 128>}, {pipeline_mode = #tpu.pipeline_mode<synchronous>, transform_indices = @transform_9, window_bounds = array<i64: 128, 128>}, {pipeline_mode = #tpu.pipeline_mode<synchronous>, transform_indices = @transform_10, window_bounds = array<i64: 1, 128>}, {pipeline_mode = #tpu.pipeline_mode<synchronous>, transform_indices = @transform_11, window_bounds = array<i64: 1, 128>}, {transform_indices = @transform_12, window_bounds = array<i64: 1, 16, 16, 128>}]} {
    %c0 = arith.constant 0 : index
    %c0_0 = arith.constant 0 : index
    %0 = vector.load %arg5[%c0, %c0_0] : memref<128x128xbf16, #tpu.memory_space<vmem>>, vector<128x128xbf16>
    %c0_1 = arith.constant 0 : index
    %c0_2 = arith.constant 0 : index
    %1 = vector.load %arg6[%c0_1, %c0_2] : memref<1x128xf32, #tpu.memory_space<vmem>>, vector<1x128xf32>
    %c0_3 = arith.constant 0 : index
    %c0_4 = arith.constant 0 : index
    %2 = vector.load %arg7[%c0_3, %c0_4] : memref<1x128xf32, #tpu.memory_space<vmem>>, vector<1x128xf32>
    %c0_5 = arith.constant 0 : index
    %c0_6 = arith.constant 0 : index
    %c0_7 = arith.constant 0 : index
    %c0_8 = arith.constant 0 : index
    %3 = vector.load %arg2[%c0_5, %c0_6, %c0_7, %c0_8] : memref<1x16x16x128xbf16, #tpu.memory_space<vmem>>, vector<1x16x16x128xbf16>
    %4 = vector.shape_cast %3 : vector<1x16x16x128xbf16> to vector<256x128xbf16>
    %cst = arith.constant dense<0.000000e+00> : vector<256x128xf32>
    %5 = tpu.matmul %4, %0, %cst {dimension_numbers = #tpu.dot_dimension_numbers<[1], [0], [0], [1], [0, 0, 1, 1], [], []>} : vector<256x128xbf16>, vector<128x128xbf16>, vector<256x128xf32> -> vector<256x128xf32>
    %6 = vector.broadcast %1 : vector<1x128xf32> to vector<256x128xf32>
    %7 = arith.mulf %5, %6 : vector<256x128xf32>
    %8 = vector.broadcast %2 : vector<1x128xf32> to vector<256x128xf32>
    %9 = arith.addf %7, %8 : vector<256x128xf32>
    %cst_9 = arith.constant 0.000000e+00 : f32
    %10 = vector.broadcast %cst_9 : f32 to vector<256x128xf32>
    %11 = arith.maximumf %9, %10 : vector<256x128xf32>
    %c16 = arith.constant 16 : index
    %c0_10 = arith.constant 0 : index
    %12 = vector.load %arg15[%c16, %c0_10] : memref<288x128xf32, #tpu.memory_space<vmem>>, vector<256x128xf32>
    tpu.vector_store %arg15[%c16, %c0_10], %11 {strides = array<i32>} : memref<288x128xf32, #tpu.memory_space<vmem>>, vector<256x128xf32>,
    %c0_11 = arith.constant 0 : index
    %c0_12 = arith.constant 0 : index
    %c0_13 = arith.constant 0 : index
    %c0_14 = arith.constant 0 : index
    %13 = vector.load %arg3[%c0_11, %c0_12, %c0_13, %c0_14] : memref<1x1x16x128xbf16, #tpu.memory_space<vmem>>, vector<1x1x16x128xbf16>
    %14 = vector.shape_cast %13 : vector<1x1x16x128xbf16> to vector<16x128xbf16>
    %c0_15 = arith.constant 0 : index
    %c0_16 = arith.constant 0 : index
    %c0_17 = arith.constant 0 : index
    %c0_18 = arith.constant 0 : index
    %15 = vector.load %arg4[%c0_15, %c0_16, %c0_17, %c0_18] : memref<1x1x16x128xbf16, #tpu.memory_space<vmem>>, vector<1x1x16x128xbf16>
    %16 = vector.shape_cast %15 : vector<1x1x16x128xbf16> to vector<16x128xbf16>
    %17 = tpu.concatenate %14, %16 in 0 : vector<16x128xbf16>, vector<16x128xbf16> -> vector<32x128xbf16>
    %cst_19 = arith.constant dense<0.000000e+00> : vector<32x128xf32>
    %18 = tpu.matmul %17, %0, %cst_19 {dimension_numbers = #tpu.dot_dimension_numbers<[1], [0], [0], [1], [0, 0, 1, 1], [], []>} : vector<32x128xbf16>, vector<128x128xbf16>, vector<32x128xf32> -> vector<32x128xf32>
    %19 = vector.broadcast %1 : vector<1x128xf32> to vector<32x128xf32>
    %20 = arith.mulf %18, %19 : vector<32x128xf32>
    %21 = vector.broadcast %2 : vector<1x128xf32> to vector<32x128xf32>
    %22 = arith.addf %20, %21 : vector<32x128xf32>
    %cst_20 = arith.constant 0.000000e+00 : f32
    %23 = vector.broadcast %cst_20 : f32 to vector<32x128xf32>
    %24 = arith.maximumf %22, %23 : vector<32x128xf32>
    %c0_i32 = arith.constant 0 : i32
    %25 = arith.cmpi sgt, %arg1, %c0_i32 : i32
    %26 = arith.extui %25 : i1 to i32
    %27 = arith.sitofp %26 : i32 to f32
    %c0_i32_21 = arith.constant 0 : i32
    %28 = arith.cmpi slt, %arg1, %c0_i32_21 : i32
    %29 = arith.extui %28 : i1 to i32
    %30 = arith.sitofp %29 : i32 to f32
    %31 = vector.extract_strided_slice %24 {offsets = [0, 0], sizes = [16, 128], strides = [1, 1]} : vector<32x128xf32> to vector<16x128xf32>
    %32 = vector.broadcast %27 : f32 to vector<16x128xf32>
    %33 = arith.mulf %31, %32 : vector<16x128xf32>
    %c0_22 = arith.constant 0 : index
    %c0_23 = arith.constant 0 : index
    %34 = vector.load %arg15[%c0_22, %c0_23] : memref<288x128xf32, #tpu.memory_space<vmem>>, vector<16x128xf32>
    tpu.vector_store %arg15[%c0_22, %c0_23], %33 {strides = array<i32>} : memref<288x128xf32, #tpu.memory_space<vmem>>, vector<16x128xf32>,
    %35 = vector.extract_strided_slice %24 {offsets = [16, 0], sizes = [16, 128], strides = [1, 1]} : vector<32x128xf32> to vector<16x128xf32>
    %36 = vector.broadcast %30 : f32 to vector<16x128xf32>
    %37 = arith.mulf %35, %36 : vector<16x128xf32>
    %c272 = arith.constant 272 : index
    %c0_24 = arith.constant 0 : index
    %38 = vector.load %arg15[%c272, %c0_24] : memref<288x128xf32, #tpu.memory_space<vmem>>, vector<16x128xf32>
    tpu.vector_store %arg15[%c272, %c0_24], %37 {strides = array<i32>} : memref<288x128xf32, #tpu.memory_space<vmem>>, vector<16x128xf32>,
    %c0_25 = arith.constant 0 : index
    %c0_26 = arith.constant 0 : index
    %39 = vector.load %arg15[%c0_25, %c0_26] : memref<288x128xf32, #tpu.memory_space<vmem>>, vector<288x128xf32>
    %40 = tpu.iota {dimensions = array<i32: 0>} : vector<288x1xi32>
    %c16_i32 = arith.constant 16 : i32
    %c0_i32_27 = arith.constant 0 : i32
    %41 = arith.cmpi eq, %c16_i32, %c0_i32_27 : i32
    %c1_i32 = arith.constant 1 : i32
    %42 = arith.select %41, %c1_i32, %c16_i32 : i32
    %43 = vector.broadcast %42 : i32 to vector<288x1xi32>
    %44 = arith.remsi %40, %43 : vector<288x1xi32>
    %c0_i32_28 = arith.constant 0 : i32
    %45 = vector.broadcast %c0_i32_28 : i32 to vector<288x1xi32>
    %46 = arith.cmpi ne, %44, %45 : vector<288x1xi32>
    %c0_i32_29 = arith.constant 0 : i32
    %47 = vector.broadcast %c0_i32_29 : i32 to vector<288x1xi32>
    %48 = arith.cmpi slt, %44, %47 : vector<288x1xi32>
    %c0_i32_30 = arith.constant 0 : i32
    %49 = arith.cmpi slt, %42, %c0_i32_30 : i32
    %50 = vector.broadcast %49 : i1 to vector<288x1xi1>
    %51 = vector.broadcast %50 : vector<288x1xi1> to vector<288x1xi1>
    %52 = arith.xori %48, %51 : vector<288x1xi1>
    %53 = arith.andi %52, %46 : vector<288x1xi1>
    %54 = vector.broadcast %42 : i32 to vector<288x1xi32>
    %55 = arith.addi %44, %54 : vector<288x1xi32>
    %56 = arith.select %53, %55, %44 : vector<288x1xi1>, vector<288x1xi32>
    %c0_i32_31 = arith.constant 0 : i32
    %57 = vector.broadcast %c0_i32_31 : i32 to vector<288x1xi32>
    %58 = arith.cmpi eq, %56, %57 : vector<288x1xi32>
    %c1_i32_32 = arith.constant 1 : i32
    %59 = tpu.dynamic_rotate %39 by %c1_i32_32 dim 0 : vector<288x128xf32>, i32 -> vector<288x128xf32>
    %cst_33 = arith.constant 0.000000e+00 : f32
    %60 = vector.shape_cast %58 : vector<288x1xi1> to vector<288x1xi1>
    %61 = vector.broadcast %60 : vector<288x1xi1> to vector<288x128xi1>
    %62 = vector.broadcast %cst_33 : f32 to vector<288x128xf32>
    %63 = arith.select %61, %62, %59 : vector<288x128xi1>, vector<288x128xf32>
    %64 = arith.truncf %63 : vector<288x128xf32> to vector<288x128xbf16>
    %c15_i32 = arith.constant 15 : i32
    %65 = vector.broadcast %c15_i32 : i32 to vector<288x1xi32>
    %66 = arith.cmpi eq, %56, %65 : vector<288x1xi32>
    %c287_i32 = arith.constant 287 : i32
    %67 = tpu.dynamic_rotate %39 by %c287_i32 dim 0 : vector<288x128xf32>, i32 -> vector<288x128xf32>
    %cst_34 = arith.constant 0.000000e+00 : f32
    %68 = vector.shape_cast %66 : vector<288x1xi1> to vector<288x1xi1>
    %69 = vector.broadcast %68 : vector<288x1xi1> to vector<288x128xi1>
    %70 = vector.broadcast %cst_34 : f32 to vector<288x128xf32>
    %71 = arith.select %69, %70, %67 : vector<288x128xi1>, vector<288x128xf32>
    %72 = arith.truncf %71 : vector<288x128xf32> to vector<288x128xbf16>
    %73 = arith.truncf %39 : vector<288x128xf32> to vector<288x128xbf16>
    %74 = tpu.concatenate %64, %73, %72 in 1 : vector<288x128xbf16>, vector<288x128xbf16>, vector<288x128xbf16> -> vector<288x384xbf16>
    %75 = vector.extract_strided_slice %74 {offsets = [0, 0], sizes = [256, 384], strides = [1, 1]} : vector<288x384xbf16> to vector<256x384xbf16>
    %c0_35 = arith.constant 0 : index
    %c0_36 = arith.constant 0 : index
    %c0_37 = arith.constant 0 : index
    %76 = vector.load %arg8[%c0_35, %c0_36, %c0_37] : memref<3x384x128xbf16, #tpu.memory_space<vmem>>, vector<1x384x128xbf16>
    %77 = vector.shape_cast %76 : vector<1x384x128xbf16> to vector<384x128xbf16>
    %cst_38 = arith.constant dense<0.000000e+00> : vector<256x128xf32>
    %78 = tpu.matmul %75, %77, %cst_38 {dimension_numbers = #tpu.dot_dimension_numbers<[1], [0], [0], [1], [0, 0, 1, 1], [], []>} : vector<256x384xbf16>, vector<384x128xbf16>, vector<256x128xf32> -> vector<256x128xf32>
    %c0_39 = arith.constant 0 : index
    %c0_40 = arith.constant 0 : index
    %79 = vector.load %arg16[%c0_39, %c0_40] : memref<256x128xf32, #tpu.memory_space<vmem>>, vector<256x128xf32>
    tpu.vector_store %arg16[%c0_39, %c0_40], %78 {strides = array<i32>} : memref<256x128xf32, #tpu.memory_space<vmem>>, vector<256x128xf32>,
    %c0_41 = arith.constant 0 : index
    %c0_42 = arith.constant 0 : index
    %80 = vector.load %arg16[%c0_41, %c0_42] : memref<256x128xf32, #tpu.memory_space<vmem>>, vector<256x128xf32>
    %81 = vector.extract_strided_slice %74 {offsets = [16, 0], sizes = [256, 384], strides = [1, 1]} : vector<288x384xbf16> to vector<256x384xbf16>
    %c1 = arith.constant 1 : index
    %c0_43 = arith.constant 0 : index
    %c0_44 = arith.constant 0 : index
    %82 = vector.load %arg8[%c1, %c0_43, %c0_44] : memref<3x384x128xbf16, #tpu.memory_space<vmem>>, vector<1x384x128xbf16>
    %83 = vector.shape_cast %82 : vector<1x384x128xbf16> to vector<384x128xbf16>
    %cst_45 = arith.constant dense<0.000000e+00> : vector<256x128xf32>
    %84 = tpu.matmul %81, %83, %cst_45 {dimension_numbers = #tpu.dot_dimension_numbers<[1], [0], [0], [1], [0, 0, 1, 1], [], []>} : vector<256x384xbf16>, vector<384x128xbf16>, vector<256x128xf32> -> vector<256x128xf32>
    %85 = arith.addf %80, %84 : vector<256x128xf32>
    %c0_46 = arith.constant 0 : index
    %c0_47 = arith.constant 0 : index
    %86 = vector.load %arg16[%c0_46, %c0_47] : memref<256x128xf32, #tpu.memory_space<vmem>>, vector<256x128xf32>
    tpu.vector_store %arg16[%c0_46, %c0_47], %85 {strides = array<i32>} : memref<256x128xf32, #tpu.memory_space<vmem>>, vector<256x128xf32>,
    %c0_48 = arith.constant 0 : index
    %c0_49 = arith.constant 0 : index
    %87 = vector.load %arg16[%c0_48, %c0_49] : memref<256x128xf32, #tpu.memory_space<vmem>>, vector<256x128xf32>
    %88 = vector.extract_strided_slice %74 {offsets = [32, 0], sizes = [256, 384], strides = [1, 1]} : vector<288x384xbf16> to vector<256x384xbf16>
    %c2 = arith.constant 2 : index
    %c0_50 = arith.constant 0 : index
    %c0_51 = arith.constant 0 : index
    %89 = vector.load %arg8[%c2, %c0_50, %c0_51] : memref<3x384x128xbf16, #tpu.memory_space<vmem>>, vector<1x384x128xbf16>
    %90 = vector.shape_cast %89 : vector<1x384x128xbf16> to vector<384x128xbf16>
    %cst_52 = arith.constant dense<0.000000e+00> : vector<256x128xf32>
    %91 = tpu.matmul %88, %90, %cst_52 {dimension_numbers = #tpu.dot_dimension_numbers<[1], [0], [0], [1], [0, 0, 1, 1], [], []>} : vector<256x384xbf16>, vector<384x128xbf16>, vector<256x128xf32> -> vector<256x128xf32>
    %92 = arith.addf %87, %91 : vector<256x128xf32>
    %c0_53 = arith.constant 0 : index
    %c0_54 = arith.constant 0 : index
    %93 = vector.load %arg16[%c0_53, %c0_54] : memref<256x128xf32, #tpu.memory_space<vmem>>, vector<256x128xf32>
    tpu.vector_store %arg16[%c0_53, %c0_54], %92 {strides = array<i32>} : memref<256x128xf32, #tpu.memory_space<vmem>>, vector<256x128xf32>,
    %c0_55 = arith.constant 0 : index
    %c0_56 = arith.constant 0 : index
    %94 = vector.load %arg16[%c0_55, %c0_56] : memref<256x128xf32, #tpu.memory_space<vmem>>, vector<256x128xf32>
    %c0_57 = arith.constant 0 : index
    %c0_58 = arith.constant 0 : index
    %95 = vector.load %arg9[%c0_57, %c0_58] : memref<1x128xf32, #tpu.memory_space<vmem>>, vector<1x128xf32>
    %96 = vector.broadcast %95 : vector<1x128xf32> to vector<256x128xf32>
    %97 = arith.mulf %94, %96 : vector<256x128xf32>
    %c0_59 = arith.constant 0 : index
    %c0_60 = arith.constant 0 : index
    %98 = vector.load %arg10[%c0_59, %c0_60] : memref<1x128xf32, #tpu.memory_space<vmem>>, vector<1x128xf32>
    %99 = vector.broadcast %98 : vector<1x128xf32> to vector<256x128xf32>
    %100 = arith.addf %97, %99 : vector<256x128xf32>
    %cst_61 = arith.constant 0.000000e+00 : f32
    %101 = vector.broadcast %cst_61 : f32 to vector<256x128xf32>
    %102 = arith.maximumf %100, %101 : vector<256x128xf32>
    %103 = arith.truncf %102 : vector<256x128xf32> to vector<256x128xbf16>
    %c0_62 = arith.constant 0 : index
    %c0_63 = arith.constant 0 : index
    %104 = vector.load %arg11[%c0_62, %c0_63] : memref<128x128xbf16, #tpu.memory_space<vmem>>, vector<128x128xbf16>
    %cst_64 = arith.constant dense<0.000000e+00> : vector<256x128xf32>
    %105 = tpu.matmul %103, %104, %cst_64 {dimension_numbers = #tpu.dot_dimension_numbers<[1], [0], [0], [1], [0, 0, 1, 1], [], []>} : vector<256x128xbf16>, vector<128x128xbf16>, vector<256x128xf32> -> vector<256x128xf32>
    %c0_65 = arith.constant 0 : index
    %c0_66 = arith.constant 0 : index
    %106 = vector.load %arg12[%c0_65, %c0_66] : memref<1x128xf32, #tpu.memory_space<vmem>>, vector<1x128xf32>
    %107 = vector.broadcast %106 : vector<1x128xf32> to vector<256x128xf32>
    %108 = arith.mulf %105, %107 : vector<256x128xf32>
    %c0_67 = arith.constant 0 : index
    %c0_68 = arith.constant 0 : index
    %109 = vector.load %arg13[%c0_67, %c0_68] : memref<1x128xf32, #tpu.memory_space<vmem>>, vector<1x128xf32>
    %110 = vector.broadcast %109 : vector<1x128xf32> to vector<256x128xf32>
    %111 = arith.addf %108, %110 : vector<256x128xf32>
    %112 = arith.extf %4 : vector<256x128xbf16> to vector<256x128xf32>
    %113 = arith.addf %111, %112 : vector<256x128xf32>
    %cst_69 = arith.constant 0.000000e+00 : f32
    %114 = vector.broadcast %cst_69 : f32 to vector<256x128xf32>
    %115 = arith.maximumf %113, %114 : vector<256x128xf32>
    %116 = vector.shape_cast %115 : vector<256x128xf32> to vector<16x16x128xf32>
    %117 = arith.truncf %116 : vector<16x16x128xf32> to vector<16x16x128xbf16>
    %c0_70 = arith.constant 0 : index
    %c0_71 = arith.constant 0 : index
    %c0_72 = arith.constant 0 : index
    %c0_73 = arith.constant 0 : index
    %118 = vector.load %arg14[%c0_70, %c0_71, %c0_72, %c0_73] : memref<1x16x16x128xbf16, #tpu.memory_space<vmem>>, vector<1x16x16x128xbf16>
    %119 = vector.shape_cast %118 : vector<1x16x16x128xbf16> to vector<16x16x128xbf16>
    %120 = vector.shape_cast %117 : vector<16x16x128xbf16> to vector<1x16x16x128xbf16>
    tpu.vector_store %arg14[%c0_70, %c0_71, %c0_72, %c0_73], %120 {strides = array<i32>} : memref<1x16x16x128xbf16, #tpu.memory_space<vmem>>, vector<1x16x16x128xbf16>,
    return
  }
  func.func @transform_0(%arg0: i32, %arg1: i32) -> (i32, i32, i32, i32) {
    %c0_i32 = arith.constant 0 : i32
    %c0_i32_0 = arith.constant 0 : i32
    %c0_i32_1 = arith.constant 0 : i32
    return %arg0, %arg1, %c0_i32, %c0_i32_0 : i32, i32, i32, i32
  }
  func.func @transform_1(%arg0: i32, %arg1: i32) -> (i32, i32, i32, i32) {
    %c16_i32 = arith.constant 16 : i32
    %0 = arith.muli %arg1, %c16_i32 : i32
    %c1_i32 = arith.constant 1 : i32
    %1 = arith.subi %0, %c1_i32 : i32
    %c0_i32 = arith.constant 0 : i32
    %2 = arith.maxsi %1, %c0_i32 : i32
    %c0_i32_0 = arith.constant 0 : i32
    %c0_i32_1 = arith.constant 0 : i32
    %c0_i32_2 = arith.constant 0 : i32
    return %arg0, %2, %c0_i32_0, %c0_i32_1 : i32, i32, i32, i32
  }
  func.func @transform_2(%arg0: i32, %arg1: i32) -> (i32, i32, i32, i32) {
    %c16_i32 = arith.constant 16 : i32
    %0 = arith.muli %arg1, %c16_i32 : i32
    %c16_i32_0 = arith.constant 16 : i32
    %1 = arith.addi %0, %c16_i32_0 : i32
    %c15_i32 = arith.constant 15 : i32
    %2 = arith.minsi %1, %c15_i32 : i32
    %c0_i32 = arith.constant 0 : i32
    %c0_i32_1 = arith.constant 0 : i32
    %c0_i32_2 = arith.constant 0 : i32
    return %arg0, %2, %c0_i32, %c0_i32_1 : i32, i32, i32, i32
  }
  func.func @transform_3(%arg0: i32, %arg1: i32) -> (i32, i32) {
    %c0_i32 = arith.constant 0 : i32
    %c0_i32_0 = arith.constant 0 : i32
    %c0_i32_1 = arith.constant 0 : i32
    return %c0_i32, %c0_i32_0 : i32, i32
  }
  func.func @transform_4(%arg0: i32, %arg1: i32) -> (i32, i32) {
    %c0_i32 = arith.constant 0 : i32
    %c0_i32_0 = arith.constant 0 : i32
    %c0_i32_1 = arith.constant 0 : i32
    return %c0_i32, %c0_i32_0 : i32, i32
  }
  func.func @transform_5(%arg0: i32, %arg1: i32) -> (i32, i32) {
    %c0_i32 = arith.constant 0 : i32
    %c0_i32_0 = arith.constant 0 : i32
    %c0_i32_1 = arith.constant 0 : i32
    return %c0_i32, %c0_i32_0 : i32, i32
  }
  func.func @transform_6(%arg0: i32, %arg1: i32) -> (i32, i32, i32) {
    %c0_i32 = arith.constant 0 : i32
    %c0_i32_0 = arith.constant 0 : i32
    %c0_i32_1 = arith.constant 0 : i32
    %c0_i32_2 = arith.constant 0 : i32
    return %c0_i32, %c0_i32_0, %c0_i32_1 : i32, i32, i32
  }
  func.func @transform_7(%arg0: i32, %arg1: i32) -> (i32, i32) {
    %c0_i32 = arith.constant 0 : i32
    %c0_i32_0 = arith.constant 0 : i32
    %c0_i32_1 = arith.constant 0 : i32
    return %c0_i32, %c0_i32_0 : i32, i32
  }
  func.func @transform_8(%arg0: i32, %arg1: i32) -> (i32, i32) {
    %c0_i32 = arith.constant 0 : i32
    %c0_i32_0 = arith.constant 0 : i32
    %c0_i32_1 = arith.constant 0 : i32
    return %c0_i32, %c0_i32_0 : i32, i32
  }
  func.func @transform_9(%arg0: i32, %arg1: i32) -> (i32, i32) {
    %c0_i32 = arith.constant 0 : i32
    %c0_i32_0 = arith.constant 0 : i32
    %c0_i32_1 = arith.constant 0 : i32
    return %c0_i32, %c0_i32_0 : i32, i32
  }
  func.func @transform_10(%arg0: i32, %arg1: i32) -> (i32, i32) {
    %c0_i32 = arith.constant 0 : i32
    %c0_i32_0 = arith.constant 0 : i32
    %c0_i32_1 = arith.constant 0 : i32
    return %c0_i32, %c0_i32_0 : i32, i32
  }
  func.func @transform_11(%arg0: i32, %arg1: i32) -> (i32, i32) {
    %c0_i32 = arith.constant 0 : i32
    %c0_i32_0 = arith.constant 0 : i32
    %c0_i32_1 = arith.constant 0 : i32
    return %c0_i32, %c0_i32_0 : i32, i32
  }
  func.func @transform_12(%arg0: i32, %arg1: i32) -> (i32, i32, i32, i32) {
    %c0_i32 = arith.constant 0 : i32
    %c0_i32_0 = arith.constant 0 : i32
    %c0_i32_1 = arith.constant 0 : i32
    return %arg0, %arg1, %c0_i32, %c0_i32_0 : i32, i32, i32, i32
  }
}

</mosaic_0001>

<bundles_post_ra>
// kernel: bottleneck_forward.1
= control target key start
LH: loop header
LB: loop body
LE: loop exit
PB: predicated region body
PF: predicated region fallthrough
CT: control target
= control target key end

     0   :  { %s6734_s21 = smov 0   ;;  %s6736_s22 = smov 0   ;;  %s9059_s0 = inlined_call_operand.vmem [shape: bf16[2,16,16,128], index: 0, kind: input, shape index: {}, may-alias: {0,1,2}]   ;;  %s9060_s1 = inlined_call_operand.vmem [shape: bf16[2,16,16,128], index: 1, kind: input, shape index: {}, may-alias: {0,1,2}]   ;;  %s9061_s2 = inlined_call_operand.vmem [shape: bf16[2,16,16,128], index: 2, kind: input, shape index: {}, may-alias: {0,1,2}]   ;;  %s9062_s3 = inlined_call_operand.vmem [shape: bf16[128,128], index: 3, kind: input, shape index: {}]   ;;  %s9063_s4 = inlined_call_operand.vmem [shape: f32[1,128], index: 4, kind: input, shape index: {}]   ;;  %s9064_s5 = inlined_call_operand.vmem [shape: f32[1,128], index: 5, kind: input, shape index: {}]   ;;  %s9065_s6 = inlined_call_operand.vmem [shape: bf16[3,384,128], index: 6, kind: input, shape index: {}]   ;;  %s9066_s7 = inlined_call_operand.vmem [shape: f32[1,128], index: 7, kind: input, shape index: {}]   ;;  %s9067_s8 = inlined_call_operand.vmem [shape: f32[1,128], index: 8, kind: input, shape index: {}]   ;;  %s9068_s9 = inlined_call_operand.vmem [shape: bf16[128,128], index: 9, kind: input, shape index: {}]   ;;  %s9069_s10 = inlined_call_operand.vmem [shape: f32[1,128], index: 10, kind: input, shape index: {}]   ;;  %s9070_s11 = inlined_call_operand.vmem [shape: f32[1,128], index: 11, kind: input, shape index: {}]   ;;  %s9071_s12 = inlined_call_operand.vmem [shape: bf16[2,16,16,128], index: 12, kind: output, shape index: {}]  }
   0x1   :  { %s6738_s23 = smov 0  }
   0x2 LB: > { %s34_s24 = sadd.s32 1, %s6662_s22  ;;  %p4791_p0 = scmp.ge.s32.totalorder %s6666_s23, 1  ;;  %s6666_s23 = sphi %s6738_s23, %s22_s23   ;;  %s6662_s22 = sphi %s6736_s22, %s9500_s22   ;;  %s6658_s21 = sphi %s6734_s21, %s9499_s21  }
   0x3   : > { %p36_p1 = scmp.ge.s32.totalorder %s34_s24, 2  ;;  %p448_p2 = scmp.lt.s32.totalorder %s6666_s23, 3 }
   0x5   : > { %s9502_s24 = smov (%p36_p1, %s34_s24), 0  ;;  %p449_p3 = pnand %p4791_p0, %p448_p2 }
   0x7   : > { %452 = sbr.rel (%p449_p3) target bundleno = 1072 (0x430), region = 68 }
   0xe   : > { %v6506_v0 = vld [vmem:[%s9062_s3] sm:$0xff]   ;;  %p527_p4 = scmp.lt.s32.totalorder %s6658_s21, 1  ;;  %v6507_v1 = vld [vmem:[%s9062_s3 + $0x8] sm:$0xff]   ;;  %v6508_v2 = vld [vmem:[%s9062_s3 + $0x10] sm:$0xff]   ;;  %v1207_v52 = vlaneseq  ;;  %vm9118_vm7 = vmmov 1  }
   0xf   : > { %6061 = vmatprep.subr.bf16.mxu0 %v6506_v0  ;;  %6109 = vmatprep.subr.bf16.mxu1 %v6506_v0  ;;  %v6509_v3 = vld [vmem:[%s9062_s3 + $0x18] sm:$0xff]   ;;  %v6510_v6 = vld [vmem:[%s9062_s3 + $0x20] sm:$0xff]   ;;  %v6511_v7 = vld [vmem:[%s9062_s3 + $0x28] sm:$0xff]  }
  0x10   : > { %s9504_s21 = smov (!%p527_p4, %s6658_s21), 1  ;;  %6062 = vmatpush3.bf16.msra.mxu0 %v6506_v0  ;;  %6110 = vmatpush3.bf16.msra.mxu1 %v6506_v0  ;;  %v6512_v8 = vld [vmem:[%s9062_s3 + $0x30] sm:$0xff]   ;;  %v6513_v9 = vld [vmem:[%s9062_s3 + $0x38] sm:$0xff]   ;;  %v6532_v12 = vld [vmem:[%s9065_s6 + $0x80] sm:$0xff]   ;;  %v6889_v53 = vshrl.u32 %v1207_v52, 7 }
  0x11   : > { %6063 = vmatprep.subr.bf16.mxu0 %v6507_v1  ;;  %6111 = vmatprep.subr.bf16.mxu1 %v6507_v1  ;;  %s6761_s13 = sshll.u32 %s9504_s21, 7  ;;  %v6536_v13 = vld [vmem:[%s9065_s6 + $0x40] sm:$0xff]   ;;  %v6533_v15 = vld [vmem:[%s9065_s6 + $0x88] sm:$0xff]   ;;  %v6534_v20 = vld [vmem:[%s9065_s6 + $0x90] sm:$0xff]  }
  0x12   : > { %s6767_s16 = scalar_lea.vmem %s9059_s0, %s6761_s13  ;;  %s549_s19 = scalar_lea.vmem %s9060_s1, %s6761_s13  ;;  %v6538_v16 = vld [vmem:[%s9065_s6] sm:$0xff]   ;;  %v6539_v17 = vld [vmem:[%s9065_s6 + $0x48] sm:$0xff]   ;;  %v6541_v22 = vld [vmem:[%s9065_s6 + $0x50] sm:$0xff]   ;;  %v6892_v54 = vadd.s32 8, %v6889_v53  ;;  %v6895_v55 = vadd.s32 24, %v6889_v53  ;;  %v6898_v56 = vadd.s32 40, %v6889_v53 }
  0x13   : > { %s5429_s20 = sadd.s32 120, %s6761_s13  ;;  %v601_v4 = vld [vmem:[%s6767_s16] sm:$0xff]   ;;  %v603_v10 = vld [vmem:[%s6767_s16 + $0x8] sm:$0xff]   ;;  %v605_v11 = vld [vmem:[%s6767_s16 + $0x10] sm:$0xff]   ;;  %v6901_v57 = vadd.s32 16, %v6889_v53  ;;  %v1248_v58 = vand.u32 15, %v6889_v53  ;;  %s8965_s30 = scalar_lea.vmem %s9071_s12, %s6761_s13 }
  0x14   : > { %6064 = vmatpush3.bf16.msra.mxu0 %v6507_v1  ;;  %6112 = vmatpush3.bf16.msra.mxu1 %v6507_v1  ;;  %s6781_s28 = scalar_lea.vmem %s9061_s2, %s5429_s20  ;;  %v6515_v5 = vld [vmem:[%s549_s19] sm:$0xff]   ;;  %v607_v18 = vld [vmem:[%s6767_s16 + $0x18] sm:$0xff]   ;;  %v6540_v21 = vld [vmem:[%s9065_s6 + $0x8] sm:$0xff]   ;;  %v1255_v59 = vand.u32 15, %v6892_v54  ;;  %v1269_v60 = vand.u32 15, %v6895_v55  ;;  %v1283_v61 = vand.u32 15, %v6898_v56 }
  0x15   : > { %6065 = vmatprep.subr.bf16.mxu0 %v6508_v2  ;;  %6113 = vmatprep.subr.bf16.mxu1 %v6508_v2  ;;  %v6517_v14 = vld [vmem:[%s6781_s28] sm:$0xff]   ;;  %v6535_v23 = vld [vmem:[%s9065_s6 + $0x98] sm:$0xff]   ;;  %v6543_v24 = vld [vmem:[%s9065_s6 + $0x10] sm:$0xff]   ;;  %v1262_v62 = vand.u32 15, %v6901_v57  ;;  %v6909_v63 = vadd.s32 56, %v6889_v53  ;;  %v6912_v0 = vadd.s32 72, %v6889_v53 }
  0x16   : > { %6077 = vmatprep.mubr.bf16.mxu0 %v601_v4  ;;  %6125 = vmatprep.mubr.bf16.mxu1 %v6515_v5  ;;  %v609_v19 = vld [vmem:[%s6767_s16 + $0x20] sm:$0xff]   ;;  %v6544_v25 = vld [vmem:[%s9065_s6 + $0x58] sm:$0xff]   ;;  %v611_v26 = vld [vmem:[%s6767_s16 + $0x28] sm:$0xff]   ;;  %v6915_v1 = vadd.s32 32, %v6889_v53  ;;  %v6924_v4 = vadd.s32 48, %v6889_v53  ;;  %v6927_v5 = vadd.s32 120, %v6889_v53 }
  0x17   : > { %v613_v27 = vld [vmem:[%s6767_s16 + $0x30] sm:$0xff]   ;;  %v6537_v28 = vld [vmem:[%s9065_s6 + $0xa0] sm:$0xff]   ;;  %v6545_v29 = vld [vmem:[%s9065_s6 + $0x18] sm:$0xff]   ;;  %vm9100_vm0 = vcmp.lt.s32.totalorder %v6889_v53, 1  ;;  %vm9101_vm1 = vcmp.lt.s32.totalorder %v6889_v53, 7  ;;  %vm7021_vm2 = vcmp.ne.s32.totalorder %v1248_v58, 0 }
  0x18   : > { %6066 = vmatpush3.bf16.msra.mxu0 %v6508_v2  ;;  %6114 = vmatpush3.bf16.msra.mxu1 %v6508_v2  ;;  %v6542_v30 = vld [vmem:[%s9065_s6 + $0xa8] sm:$0xff]   ;;  %v615_v31 = vld [vmem:[%s6767_s16 + $0x38] sm:$0xff]   ;;  %v617_v32 = vld [vmem:[%s6767_s16 + $0x40] sm:$0xff]   ;;  %v6918_v2 = vadd.s32 88, %v6889_v53  ;;  %vm7044_vm3 = vcmp.ne.s32.totalorder %v1255_v59, 15  ;;  %vm7053_vm4 = vcmp.ne.s32.totalorder %v1269_v60, 15 }
  0x19   : > { %6067 = vmatprep.subr.bf16.mxu0 %v6509_v3  ;;  %6115 = vmatprep.subr.bf16.mxu1 %v6509_v3  ;;  %v619_v33 = vld [vmem:[%s6767_s16 + $0x48] sm:$0xff]   ;;  %v621_v34 = vld [vmem:[%s6767_s16 + $0x50] sm:$0xff]   ;;  %v623_v35 = vld [vmem:[%s6767_s16 + $0x58] sm:$0xff]   ;;  %vm7063_vm5 = vcmp.ne.s32.totalorder %v1283_v61, 15  ;;  %vm7091_vm6 = vcmp.ne.s32.totalorder %v1262_v62, 0 }
  0x1a   : > { %v625_v36 = vld [vmem:[%s6767_s16 + $0x60] sm:$0xff]   ;;  %v627_v37 = vld [vmem:[%s6767_s16 + $0x68] sm:$0xff]   ;;  %v629_v38 = vld [vmem:[%s6767_s16 + $0x70] sm:$0xff]  }
  0x1b   : > { %v631_v39 = vld [vmem:[%s6767_s16 + $0x78] sm:$0xff]   ;;  %v6546_v40 = vld [vmem:[%s9065_s6 + $0x60] sm:$0xff]   ;;  %v6549_v42 = vld [vmem:[%s9065_s6 + $0x68] sm:$0xff]  }
  0x1c   : > { %6068 = vmatpush3.bf16.msra.mxu0 %v6509_v3  ;;  %6116 = vmatpush3.bf16.msra.mxu1 %v6509_v3  ;;  %v6548_v41 = vld [vmem:[%s9065_s6 + $0x20] sm:$0xff]   ;;  %v6550_v43 = vld [vmem:[%s9065_s6 + $0x28] sm:$0xff]   ;;  %v6547_v44 = vld [vmem:[%s9065_s6 + $0xb0] sm:$0xff]   ;;  %v6921_v3 = vadd.s32 104, %v6889_v53 }
  0x1d   : > { %6069 = vmatprep.subr.bf16.mxu0 %v6510_v6  ;;  %6117 = vmatprep.subr.bf16.mxu1 %v6510_v6  ;;  %v6551_v45 = vld [vmem:[%s9065_s6 + $0x70] sm:$0xff]   ;;  %v6554_v47 = vld [vmem:[%s9065_s6 + $0x78] sm:$0xff]   ;;  %v6556_v50 = vld [vmem:[%s9065_s6 + $0x100] sm:$0xff]  }
  0x1e   : > { %v6553_v46 = vld [vmem:[%s9065_s6 + $0x30] sm:$0xff]   ;;  %v6552_v48 = vld [vmem:[%s9065_s6 + $0xb8] sm:$0xff]   ;;  %v6572_v51 = vld [vmem:[%s9065_s6 + $0x1c0] sm:$0xff]  }
  0x1f   : > { %v6555_v49 = vld [vmem:[%s9065_s6 + $0x38] sm:$0xff]   ;;  %vm7116_vm8 = vmpackc.low %vm9118_vm7, %vm7021_vm2 }
  0x20   : > { %6070 = vmatpush3.bf16.msra.mxu0 %v6510_v6  ;;  %6118 = vmatpush3.bf16.msra.mxu1 %v6510_v6  ;;  %v6930_v6 = vadd.s32 136, %v6889_v53  ;;  %vm7163_vm11 = vmpackc.low %vm7044_vm3, %vm9118_vm7 }
  0x21   : > { %6071 = vmatprep.subr.bf16.mxu0 %v6511_v7  ;;  %6119 = vmatprep.subr.bf16.mxu1 %v6511_v7  ;;  %vm7172_vm12 = vmpackc.low %vm7053_vm4, %vm9118_vm7 }
  0x22   : > { %vm7199_vm13 = vmpackc.low %vm7063_vm5, %vm9118_vm7 }
  0x23   : > { %vm7254_vm15 = vmpackc.low %vm9118_vm7, %vm7091_vm6 }
  0x24   : > { %6072 = vmatpush3.bf16.msra.mxu0 %v6511_v7  ;;  %6120 = vmatpush3.bf16.msra.mxu1 %v6511_v7  ;;  %v6933_v7 = vadd.s32 64, %v6889_v53 }
  0x25   : > { %6073 = vmatprep.subr.bf16.mxu0 %v6512_v8  ;;  %6121 = vmatprep.subr.bf16.mxu1 %v6512_v8 }
  0x28   : > { %6074 = vmatpush3.bf16.msra.mxu0 %v6512_v8  ;;  %6122 = vmatpush3.bf16.msra.mxu1 %v6512_v8  ;;  %v6936_v8 = vadd.s32 152, %v6889_v53 }
  0x29   : > { %6075 = vmatprep.subr.bf16.mxu0 %v6513_v9  ;;  %6123 = vmatprep.subr.bf16.mxu1 %v6513_v9 }
  0x2c   : > { %6076 = vmatpush3.bf16.msra.mxu0 %v6513_v9  ;;  %6124 = vmatpush3.bf16.msra.mxu1 %v6513_v9  ;;  %v6939_v9 = vadd.s32 168, %v6889_v53 }
  0x2d   : > { %6129 = vmatprep.subr.bf16.mxu0 %v6532_v12  ;;  %5629 = vmatprep.subr.bf16.mxu1 %v6536_v13  ;;  %v6951_v13 = vadd.s32 96, %v6889_v53 }
  0x2f   : > { %6078 = vmatmul.mubr.bf16.vlgmr.msra.gmra.mrb[0].mxu0 %v603_v10  ;;  %6126 = vmatmul.mubr.bf16.vlgmr.msra.gmra.mrb[0].mxu1 %v6517_v14  ;;  %v6942_v10 = vadd.s32 80, %v6889_v53  ;;  %v6954_v14 = vadd.s32 216, %v6889_v53 }
  0x30   : > { %6081 = vmatprep.mubr.bf16.mxu0 %v605_v11  ;;  %6130 = vmatpush3.bf16.msra.mxu0 %v6532_v12  ;;  %v6945_v11 = vadd.s32 184, %v6889_v53  ;;  %v6948_v12 = vadd.s32 200, %v6889_v53 }
  0x31   : > { %6131 = vmatprep.subr.bf16.mxu0 %v6533_v15  ;;  %5630 = vmatpush3.bf16.msra.mxu1 %v6538_v16  ;;  %v1311_v16 = vand.u32 15, %v6912_v0 }
  0x32   : > { %5631 = vmatprep.subr.bf16.mxu1 %v6539_v17  ;;  %v1276_v17 = vand.u32 15, %v6915_v1 }
  0x33   : > { %vm7146_vm10 = vcmp.ne.s32.totalorder %v1311_v16, 15 }
  0x34   : > { %6132 = vmatpush3.bf16.msra.mxu0 %v6533_v15  ;;  %v1297_v15 = vand.u32 15, %v6909_v63  ;;  %vm7208_vm14 = vcmp.ne.s32.totalorder %v1276_v17, 0  ;;  %v6576_v17 = vld [vmem:[%s9065_s6 + $0x188] sm:$0xff]   ;;  %vm7340_vm5 = vmpackc.low %vm7146_vm10, %vm9118_vm7 }
  0x35   : > { %6133 = vmatprep.subr.bf16.mxu0 %v6534_v20  ;;  %5632 = vmatpush3.bf16.msra.mxu1 %v6540_v21 }
  0x36   : > { %5633 = vmatprep.subr.bf16.mxu1 %v6541_v22  ;;  %vm7126_vm9 = vcmp.ne.s32.totalorder %v1297_v15, 15 }
  0x37   : > { %6082 = vmatmul.mubr.bf16.gmra.mrb[4].mxu0 %v607_v18  ;;  %vm7314_vm4 = vmpackc.low %vm7126_vm9, %vm9118_vm7 }
  0x38   : > { %6085 = vmatprep.mubr.bf16.mxu0 %v609_v19  ;;  %6134 = vmatpush3.bf16.msra.mxu0 %v6534_v20  ;;  %v6963_v19 = vld [vmem:[%s9063_s4] ss:$0 sm:$0xff] }
  0x39   : > { %6135 = vmatprep.subr.bf16.mxu0 %v6535_v23  ;;  %5634 = vmatpush3.bf16.msra.mxu1 %v6543_v24  ;;  %v6972_v24 = vld [vmem:[%s9064_s5] ss:$0 sm:$0xff] }
  0x3a   : > { %5635 = vmatprep.subr.bf16.mxu1 %v6544_v25 }
  0x3c   : > { %6136 = vmatpush3.bf16.msra.mxu0 %v6535_v23 }
  0x3d   : > { %6137 = vmatprep.subr.bf16.mxu0 %v6537_v28  ;;  %5636 = vmatpush3.bf16.msra.mxu1 %v6545_v29 }
  0x3e   : > { %5637 = vmatprep.subr.bf16.mxu1 %v6546_v40  ;;  %v6988_v40 = vadd.s32 112, %v6889_v53 }
  0x3f   : > { %6086 = vmatmul.mubr.bf16.gmra.mrb[8].mxu0 %v611_v26 }
  0x40   : > { %6089 = vmatprep.mubr.bf16.mxu0 %v613_v27  ;;  %6138 = vmatpush3.bf16.msra.mxu0 %v6537_v28 }
  0x41   : > { %6139 = vmatprep.subr.bf16.mxu0 %v6542_v30  ;;  %5638 = vmatpush3.bf16.msra.mxu1 %v6548_v41 }
  0x42   : > { %5639 = vmatprep.subr.bf16.mxu1 %v6549_v42 }
  0x44   : > { %6140 = vmatpush3.bf16.msra.mxu0 %v6542_v30 }
  0x45   : > { %5640 = vmatpush3.bf16.msra.mxu1 %v6550_v43  ;;  %6141 = vmatprep.subr.bf16.mxu0 %v6547_v44 }
  0x46   : > { %5641 = vmatprep.subr.bf16.mxu1 %v6551_v45  ;;  %v6993_v45 = vadd.s32 248, %v6889_v53 }
  0x47   : > { %6090 = vmatmul.mubr.bf16.gmra.mrb[12].mxu0 %v615_v31 }
  0x48   : > { %6093 = vmatprep.mubr.bf16.mxu0 %v617_v32  ;;  %6142 = vmatpush3.bf16.msra.mxu0 %v6547_v44 }
  0x49   : > { %5642 = vmatpush3.bf16.msra.mxu1 %v6553_v46  ;;  %6143 = vmatprep.subr.bf16.mxu0 %v6552_v48  ;;  %v6996_v46 = vadd.s32 128, %v6889_v53 }
  0x4a   : > { %5643 = vmatprep.subr.bf16.mxu1 %v6554_v47 }
  0x4c   : > { %6144 = vmatpush3.bf16.msra.mxu0 %v6552_v48 }
  0x4d   : > { %5644 = vmatpush3.bf16.msra.mxu1 %v6555_v49  ;;  %5765 = vmatprep.subr.bf16.mxu0 %v6556_v50 }
  0x4e   : > { %5901 = vmatprep.subr.bf16.mxu1 %v6572_v51 }
  0x4f   : > { %6094 = vmatmul.mubr.bf16.gmra.mrb[16].mxu0 %v619_v33 }
  0x50   : > { %6097 = vmatprep.mubr.bf16.mxu0 %v621_v34 }
  0x57   : > { %6098 = vmatmul.mubr.bf16.gmra.mrb[20].mxu0 %v623_v35 }
  0x58   : > { %6101 = vmatprep.mubr.bf16.mxu0 %v625_v36 }
  0x5f   : > { %6102 = vmatmul.mubr.bf16.gmra.mrb[24].mxu0 %v627_v37 }
  0x60   : > { %6105 = vmatprep.mubr.bf16.mxu0 %v629_v38 }
  0x67   : > { %6106 = vmatmul.mubr.bf16.gmra.mrb[28].mxu0 %v631_v39  ;;  %v6985_v39 = vadd.s32 232, %v6889_v53 }
 0x102   : > { %v6079_v29 = vpop.f32.mrb[0].mxu0  ;;  %v6127_v30 = vpop.f32.mrb[0].mxu1 }
 0x103   : > { %v946_v35 = vmul.f32 %v6079_v29, %v6963_v19  ;;  %v1145_v36 = vmul.f32 %v6127_v30, %v6963_v19  ;;  %v811_v37 = vpop.f32.mrb[1].mxu0  ;;  %v1128_v38 = vpop.f32.mrb[1].mxu1 }
 0x104   : > { %v944_v41 = vmul.f32 %v6963_v19, %v811_v37  ;;  %v1143_v42 = vmul.f32 %v6963_v19, %v1128_v38  ;;  %v6080_v43 = vpop.f32.mrb[2].mxu0  ;;  %v6128_v44 = vpop.f32.mrb[2].mxu1 }
 0x105   : > { %v984_v47 = vadd.f32 %v6972_v24, %v946_v35  ;;  %v1149_v48 = vadd.f32 %v6972_v24, %v1145_v36  ;;  %v947_v49 = vmul.f32 %v6080_v43, %v6963_v19  ;;  %v1146_v50 = vmul.f32 %v6128_v44, %v6963_v19  ;;  %v814_v51 = vpop.f32.mrb[3].mxu0  ;;  %v1131_v52 = vpop.f32.mrb[3].mxu1 }
 0x106   : > { %v982_v29 = vadd.f32 %v6972_v24, %v944_v41  ;;  %v1147_v30 = vadd.f32 %v6972_v24, %v1143_v42  ;;  %v945_v37 = vmul.f32 %v6963_v19, %v814_v51  ;;  %v1144_v35 = vmul.f32 %v6963_v19, %v1131_v52 }
 0x107   : > { %v7008_v38 = vmax.f32 %v984_v47, 0.0  ;;  %v1153_v36 = vmax.f32 %v1149_v48, 0.0  ;;  %v985_v43 = vadd.f32 %v6972_v24, %v947_v49  ;;  %v1150_v44 = vadd.f32 %v6972_v24, %v1146_v50  ;;  %v6573_v47 = vld [vmem:[%s9065_s6 + $0x180] sm:$0xff]  }
 0x108   : > { %v7012_v34 = vmax.f32 %v982_v29, 0.0  ;;  %v1151_v33 = vmax.f32 %v1147_v30, 0.0  ;;  %v983_v32 = vadd.f32 %v6972_v24, %v945_v37  ;;  %v1148_v42 = vadd.f32 %v6972_v24, %v1144_v35  ;;  %v6557_v30 = vld [vmem:[%s9065_s6 + $0xc0] sm:$0xff]  }
 0x109   : > { %v7016_v31 = vmax.f32 %v985_v43, 0.0  ;;  %v1154_v52 = vmax.f32 %v1150_v44, 0.0  ;;  %v1951_v37 = vrot.slane %v7008_v38, 1  ;;  %v7032_v35 = vmul.f32 0.0, %v1153_v36 }
 0x10a   : > { %v7028_v51 = vmul.f32 0.0, %v1151_v33  ;;  %v6083_v29 = vpop.f32.mrb[4].mxu0  ;;  %v1949_v43 = vrot.slane %v7012_v34, 1  ;;  %v7040_v33 = vmax.f32 %v983_v32, 0.0  ;;  %v1152_v36 = vmax.f32 %v1148_v42, 0.0 }
 0x10b   : > { %v827_v41 = vpop.f32.mrb[5].mxu0  ;;  %v7038_v28 = vmul.f32 0.0, %v1154_v52  ;;  %v950_v27 = vmul.f32 %v6083_v29, %v6963_v19  ;;  %v1952_v59 = vrot.slane %v7016_v31, 1  ;;  %v9192_v18 = vrot.slane %v7012_v34, 7 }
 0x10c   : > { %v1712_v48 = vrot.slane %v7028_v51, 7  ;;  %v6084_v44 = vpop.f32.mrb[6].mxu0  ;;  %v948_v26 = vmul.f32 %v6963_v19, %v827_v41  ;;  %v9074_v54 = vrot.slane %v7028_v51, 1  ;;  %v1950_v42 = vrot.slane %v7040_v33, 1 }
 0x10d   : > { %v951_v25 = vmul.f32 %v6084_v44, %v6963_v19  ;;  %v830_v23 = vpop.f32.mrb[7].mxu0  ;;  %v9072_v52 = vrot.slane %v7038_v28, 7  ;;  %v7067_v29 = vmul.f32 0.0, %v1152_v36  ;;  %v988_v55 = vadd.f32 %v6972_v24, %v950_v27 }
 0x10e   : > { %v986_v60 = vadd.f32 %v6972_v24, %v948_v26  ;;  %v2015_v56 = vsel %vm9101_vm1, %v1950_v42, %v1951_v37  ;;  %v2016_v61 = vsel %vm9101_vm1, %v1949_v43, %v1950_v42  ;;  %v949_v36 = vmul.f32 %v6963_v19, %v830_v23 }
 0x10f   : > { %v989_v44 = vadd.f32 %v6972_v24, %v951_v25  ;;  %v1784_v22 = vsel %vm9100_vm0, %v9072_v52, %v1712_v48  ;;  %v7083_v27 = vpack.c.bf16 %v2015_v56, %v2016_v61  ;;  %v9073_v26 = vrot.slane %v7067_v29, 7 }
 0x110   : > { %v1948_v25 = vrot.slane %v7067_v29, 1  ;;  %v7087_v50 = vmax.f32 %v988_v55, 0.0  ;;  %v7095_v49 = vmax.f32 %v986_v60, 0.0  ;;  %v987_v23 = vadd.f32 %v6972_v24, %v949_v36 }
 0x111   : > { %9172 = vst [vmem:[#allocation4_spill] sm:$0xff] %v7083_v27  ;;  %v7097_v21 = vmax.f32 %v989_v44, 0.0  ;;  %v2146_v42 = vpack.c.bf16 %v7067_v29, %v7028_v51  ;;  %v9075_v61 = vrot.slane %v7040_v33, 7  ;;  %v1783_v57 = vsel %vm9100_vm0, %v1712_v48, %v9073_v26 }
 0x112   : > { %v6087_v56 = vpop.f32.mrb[8].mxu0  ;;  %v1953_v20 = vrot.slane %v7095_v49, 1  ;;  %v4854_v26 = vpack.c.bf16 %v1783_v57, %v1784_v22  ;;  %v7142_v63 = vpack.c.bf16 %v7040_v33, %v7012_v34  ;;  %v7267_v52 = vpack.c.bf16 %v7016_v31, %v7008_v38 }
 0x113   : > { %v954_v55 = vmul.f32 %v6087_v56, %v6963_v19  ;;  %v843_v60 = vpop.f32.mrb[9].mxu0  ;;  %2388 = vmatprep.mubr.bf16.mxu1 %v2146_v42  ;;  %v7120_v56 = vmax.f32 %v987_v23, 0.0  ;;  %v2017_v23 = vsel %vm9101_vm1, %v1948_v25, %v1949_v43  ;;  %v6575_v43 = vld [vmem:[%s9065_s6 + $0x1c8] sm:$0xff]   ;;  %v1781_v1 = vsel %vm9100_vm0, %v9192_v18, %v9075_v61 }
 0x114   : > { %v6088_v62 = vpop.f32.mrb[10].mxu0  ;;  %v952_v36 = vmul.f32 %v6963_v19, %v843_v60  ;;  %4855 = vmatmul.mubr.msk.bf16.vlgmr.msra.gmra.mrb[4].mxu1 %vm7116_vm8, %v4854_v26  ;;  %v9201_v57 = vand.u32 15, %v6921_v3  ;;  %vm7387_vm8 = vmpackc.low %vm9118_vm7, %vm7208_vm14  ;;  %v9243_v61 = vmov 0 }
 0x115   : > { %v992_v44 = vadd.f32 %v6972_v24, %v954_v55  ;;  %v846_v58 = vpop.f32.mrb[11].mxu0  ;;  %v2018_v55 = vsel %vm9101_vm1, %v9074_v54, %v1948_v25  ;;  %v955_v22 = vmul.f32 %v6088_v62, %v6963_v19  ;;  %2396 = vmatprep.mubr.bf16.mxu1 %v7142_v63  ;;  %v1954_v48 = vrot.slane %v7120_v56, 1  ;;  %5902 = vmatpush3.bf16.msra.mxu1 %v6573_v47  ;;  %v6560_v47 = vld [vmem:[%s9065_s6 + $0x110] sm:$0xff]  }
 0x116   : > { %v990_v62 = vadd.f32 %v6972_v24, %v952_v36  ;;  %v4918_v16 = vpack.c.bf16 %v2017_v23, %v2018_v55  ;;  %v953_v26 = vmul.f32 %v6963_v19, %v846_v58  ;;  %v2013_v36 = vsel %vm9101_vm1, %v1952_v59, %v1953_v20  ;;  %5903 = vmatprep.subr.bf16.mxu1 %v6575_v43 }
 0x117   : > { %v7155_v60 = vmax.f32 %v992_v44, 0.0  ;;  %v993_v54 = vadd.f32 %v6972_v24, %v955_v22  ;;  %v9183_v44 = vmov 0  ;;  %v2014_v58 = vsel %vm9101_vm1, %v1951_v37, %v1952_v59  ;;  %v6558_v22 = vld [vmem:[%s9065_s6 + $0x108] sm:$0xff]  }
 0x118   : > { %v9184_v44 = vsel %vm7172_vm12, 4294967295, %v9183_v44  ;;  %v7188_v23 = vmax.f32 %v990_v62, 0.0  ;;  %v9186_v55 = vmov 0  ;;  %6145 = vmatprep.mubr.msk.bf16.mxu0 %vm7163_vm11, %v4918_v16  ;;  %v991_v59 = vadd.f32 %v6972_v24, %v953_v26  ;;  %v6584_v62 = vld [vmem:[%s9065_s6 + $0x1e0] sm:$0xff]  }
 0x119   : > { %9185 = vst [vmem:[#allocation5_spill] sm:$0xff] %v9184_v44  ;;  %v9187_v55 = vsel %vm7199_vm13, 4294967295, %v9186_v55  ;;  %v7214_v37 = vmax.f32 %v993_v54, 0.0  ;;  %v7217_v41 = vpack.c.bf16 %v2013_v36, %v2014_v58  ;;  %6146 = vmatmul.mubr.msk.bf16.vlgmr.msra.gmra.mrb[32].mxu0 %vm7172_vm12, %v7083_v27  ;;  %v9193_v26 = vmov %v9192_v18  ;;  %v6578_v36 = vld [vmem:[%s9065_s6 + $0x1d0] sm:$0xff]   ;;  %5904 = vmatpush3.bf16.msra.mxu1 %v6576_v17  ;;  %v6581_v17 = vld [vmem:[%s9065_s6 + $0x1d8] sm:$0xff]  }
 0x11a   : > { %9188 = vst [vmem:[#allocation6_spill] sm:$0xff] %v9187_v55  ;;  %v6091_v32 = vpop.f32.mrb[12].mxu0  ;;  %v9194_v18 = vrot.slane %v7067_v29, 7  ;;  %5766 = vmatpush3.bf16.msra.mxu0 %v6557_v30  ;;  %v7245_v25 = vmax.f32 %v991_v59, 0.0  ;;  %v6559_v30 = vld [vmem:[%s9065_s6 + $0xc8] sm:$0xff]   ;;  %v9197_v54 = vand.u32 15, %v6918_v2  ;;  %v2012_v3 = vsel %vm9101_vm1, %v1953_v20, %v1954_v48  ;;  %5905 = vmatprep.subr.bf16.mxu1 %v6578_v36 }
 0x11b   : > { %9191 = vst [vmem:[#allocation7_spill] sm:$0xff] %v7217_v41  ;;  %v958_v0 = vmul.f32 %v6091_v32, %v6963_v19  ;;  %v859_v16 = vpop.f32.mrb[13].mxu0  ;;  %6149 = vmatprep.mubr.msk.bf16.mxu0 %vm7199_vm13, %v7217_v41  ;;  %5767 = vmatprep.subr.bf16.mxu0 %v6558_v22  ;;  %vm7287_vm3 = vcmp.ne.s32.totalorder %v9201_v57, 15  ;;  %v6579_v2 = vld [vmem:[%s9065_s6 + $0x190] sm:$0xff]   ;;  %v9208_v20 = vrot.slane %v7188_v23, 1  ;;  %v9250_v58 = vand.u32 15, %v6933_v7 }
 0x11c   : > { %v1782_v43 = vsel %vm9100_vm0, %v9194_v18, %v9193_v26  ;;  %v956_v34 = vmul.f32 %v6963_v19, %v859_v16  ;;  %v6092_v32 = vpop.f32.mrb[14].mxu0  ;;  %vm7274_vm2 = vcmp.ne.s32.totalorder %v9197_v54, 15  ;;  %v1958_v22 = vrot.slane %v7245_v25, 1  ;;  %vm7476_vm14 = vmpackc.low %vm7287_vm3, %vm9118_vm7  ;;  %v6566_v7 = vld [vmem:[%s9065_s6 + $0x128] sm:$0xff]  }
 0x11d   : > { %v996_v59 = vadd.f32 %v6972_v24, %v958_v0  ;;  %v7262_v26 = vpack.c.bf16 %v1781_v1, %v1782_v43  ;;  %v959_v18 = vmul.f32 %v6092_v32, %v6963_v19  ;;  %v862_v16 = vpop.f32.mrb[15].mxu0  ;;  %v9200_v43 = vrot.slane %v7087_v50, 1  ;;  %5906 = vmatpush3.bf16.msra.mxu1 %v6579_v2  ;;  %vm7461_vm11 = vmpackc.low %vm7274_vm2, %vm9118_vm7 }
 0x11e   : > { %v994_v0 = vadd.f32 %v6972_v24, %v956_v34  ;;  %v957_v57 = vmul.f32 %v6963_v19, %v862_v16  ;;  %5768 = vmatpush3.bf16.msra.mxu0 %v6559_v30  ;;  %v9219_v1 = vrot.slane %v7016_v31, 7  ;;  %5907 = vmatprep.subr.bf16.mxu1 %v6581_v17  ;;  %v9244_v61 = vsel %vm7476_vm14, 4294967295, %v9243_v61 }
 0x11f   : > { %v2011_v32 = vsel %vm9101_vm1, %v1954_v48, %v9200_v43  ;;  %v7294_v54 = vmax.f32 %v996_v59, 0.0  ;;  %4859 = vmatmul.mubr.msk.bf16.gmra.mrb[8].mxu1 %vm7254_vm15, %v7262_v26  ;;  %v997_v34 = vadd.f32 %v6972_v24, %v959_v18  ;;  %v9204_v18 = vmov 0  ;;  %5769 = vmatprep.subr.bf16.mxu0 %v6560_v47  ;;  %9245 = vst [vmem:[#allocation16_spill] sm:$0xff] %v9244_v61 }
 0x120   : > { %v7308_v59 = vmax.f32 %v994_v0, 0.0  ;;  %2404 = vmatprep.mubr.bf16.mxu1 %v7267_v52  ;;  %v9205_v18 = vsel %vm7314_vm4, 4294967295, %v9204_v18  ;;  %v7318_v43 = vpack.c.bf16 %v2011_v32, %v2012_v3  ;;  %v9209_v48 = vrot.slane %v7097_v21, 1 }
 0x121   : > { %9206 = vst [vmem:[#allocation8_spill] sm:$0xff] %v9205_v18  ;;  %v9211_v0 = vrot.slane %v7087_v50, 1  ;;  %v7334_v3 = vmax.f32 %v997_v34, 0.0  ;;  %v995_v30 = vadd.f32 %v6972_v24, %v957_v57  ;;  %v9220_v47 = vrot.slane %v7008_v38, 7 }
 0x122   : > { %9207 = vst [vmem:[#allocation9_spill] sm:$0xff] %v7318_v43  ;;  %v2009_v36 = vsel %vm9101_vm1, %v9209_v48, %v9208_v20  ;;  %v9210_v16 = vmov %v9209_v48  ;;  %v9212_v20 = vmov 0  ;;  %v6561_v48 = vld [vmem:[%s9065_s6 + $0xd0] sm:$0xff]   ;;  %v6095_v32 = vpop.f32.mrb[16].mxu0  ;;  %6150 = vmatmul.mubr.msk.bf16.gmra.mrb[36].mxu0 %vm7314_vm4, %v7318_v43  ;;  %vm7494_vm2 = vcmp.ne.s32.totalorder %v9250_v58, 0 }
 0x123   : > { %v2010_v42 = vsel %vm9101_vm1, %v9211_v0, %v9210_v16  ;;  %v9213_v20 = vsel %vm7340_vm5, 4294967295, %v9212_v20  ;;  %v9215_v16 = vand.u32 15, %v6924_v4  ;;  %v1779_v55 = vsel %vm9100_vm0, %v9220_v47, %v9219_v1  ;;  %v6562_v4 = vld [vmem:[%s9065_s6 + $0x118] sm:$0xff]   ;;  %v875_v57 = vpop.f32.mrb[17].mxu0  ;;  %5770 = vmatpush3.bf16.msra.mxu0 %v6561_v48 }
 0x124   : > { %9214 = vst [vmem:[#allocation10_spill] sm:$0xff] %v9213_v20  ;;  %v7355_v15 = vpack.c.bf16 %v2009_v36, %v2010_v42  ;;  %v7371_v36 = vmax.f32 %v995_v30, 0.0  ;;  %v962_v42 = vmul.f32 %v6095_v32, %v6963_v19  ;;  %v960_v1 = vmul.f32 %v6963_v19, %v875_v57  ;;  %v6096_v17 = vpop.f32.mrb[18].mxu0  ;;  %5771 = vmatprep.subr.bf16.mxu0 %v6562_v4 }
 0x125   : > { %vm7349_vm6 = vcmp.ne.s32.totalorder %v9215_v16, 0  ;;  %v9221_v2 = vmov %v9220_v47  ;;  %v9222_v47 = vrot.slane %v7040_v33, 7  ;;  %v7393_v30 = vpack.c.bf16 %v7120_v56, %v7095_v49  ;;  %v6582_v33 = vld [vmem:[%s9065_s6 + $0x198] sm:$0xff]   ;;  %v878_v20 = vpop.f32.mrb[19].mxu0 }
 0x126   : > { %9218 = vst [vmem:[#allocation11_spill] sm:$0xff] %v7355_v15  ;;  %6153 = vmatprep.mubr.msk.bf16.mxu0 %vm7340_vm5, %v7355_v15  ;;  %v9226_v57 = vrot.slane %v7155_v60, 1  ;;  %v9227_v15 = vand.u32 15, %v6927_v5  ;;  %v9230_v48 = vrot.slane %v7188_v23, 1  ;;  %5908 = vmatpush3.bf16.msra.mxu1 %v6582_v33  ;;  %vm7539_vm3 = vmpackc.low %vm9118_vm7, %vm7349_vm6  ;;  %v9261_v61 = vrot.slane %v7308_v59, 1 }
 0x127   : > { %v1780_v34 = vsel %vm9100_vm0, %v9222_v47, %v9221_v2  ;;  %9225 = vst [vmem:[#allocation12_spill] sm:$0xff] %v7393_v30  ;;  %v1000_v47 = vadd.f32 %v6972_v24, %v962_v42  ;;  %v998_v42 = vadd.f32 %v6972_v24, %v960_v1  ;;  %v6564_v1 = vld [vmem:[%s9065_s6 + $0x120] sm:$0xff]   ;;  %5909 = vmatprep.subr.bf16.mxu1 %v6584_v62  ;;  %vm9323_vm5 = vcmp.lt.s32.totalorder %v6889_v53, 7 }
 0x128   : > { %v2007_v38 = vsel %vm9101_vm1, %v1958_v22, %v9226_v57  ;;  %v7405_v16 = vpack.c.bf16 %v1779_v55, %v1780_v34  ;;  %vm7409_vm9 = vcmp.ne.s32.totalorder %v9227_v15, 15  ;;  %v6563_v57 = vld [vmem:[%s9065_s6 + $0xd8] sm:$0xff]   ;;  %v963_v55 = vmul.f32 %v6096_v17, %v6963_v19  ;;  %vm9326_vm4 = vmmov %vm9323_vm5 }
 0x129   : > { %v2008_v5 = vsel %vm9101_vm1, %v9230_v48, %v1958_v22  ;;  %v961_v34 = vmul.f32 %v6963_v19, %v878_v20  ;;  %v9231_v15 = vand.u32 15, %v6930_v6  ;;  %v7435_v43 = vmax.f32 %v1000_v47, 0.0  ;;  %5772 = vmatpush3.bf16.msra.mxu0 %v6563_v57 }
 0x12a   : > { %4863 = vmatmul.mubr.msk.bf16.gmra.mrb[12].mxu1 %vm7387_vm8, %v7405_v16  ;;  %v7440_v22 = vpack.c.bf16 %v2007_v38, %v2008_v5  ;;  %v9235_v20 = vrot.slane %v7308_v59, 1  ;;  %v9236_v6 = vrot.slane %v7214_v37, 1  ;;  %v9238_v48 = vrot.slane %v7155_v60, 1  ;;  %v6099_v57 = vpop.f32.mrb[20].mxu0  ;;  %5773 = vmatprep.subr.bf16.mxu0 %v6564_v1 }
 0x12b   : > { %vm7428_vm10 = vcmp.ne.s32.totalorder %v9231_v15, 15  ;;  %v7454_v15 = vmax.f32 %v998_v42, 0.0  ;;  %v1001_v41 = vadd.f32 %v6972_v24, %v963_v55  ;;  %2412 = vmatprep.mubr.bf16.mxu1 %v7393_v30  ;;  %v9239_v38 = vmov 0  ;;  %v6585_v42 = vld [vmem:[%s9065_s6 + $0x1a0] sm:$0xff]  }
 0x12c   : > { %9234 = vst [vmem:[#allocation13_spill] sm:$0xff] %v7440_v22  ;;  %v2005_v4 = vsel %vm9101_vm1, %v9236_v6, %v9235_v20  ;;  %v9237_v17 = vmov %v9236_v6  ;;  %v9240_v38 = vsel %vm7461_vm11, 4294967295, %v9239_v38  ;;  %v999_v5 = vadd.f32 %v6972_v24, %v961_v34  ;;  %v6565_v55 = vld [vmem:[%s9065_s6 + $0xe0] sm:$0xff]   ;;  %6154 = vmatmul.mubr.msk.bf16.gmra.mrb[40].mxu0 %vm7461_vm11, %v7440_v22  ;;  %5910 = vmatpush3.bf16.msra.mxu1 %v6585_v42  ;;  %v6567_v42 = vld [vmem:[%s9065_s6 + $0xe8] sm:$0xff]  }
 0x12d   : > { %v2006_v47 = vsel %vm9101_vm1, %v9238_v48, %v9237_v17  ;;  %9241 = vst [vmem:[#allocation14_spill] sm:$0xff] %v9240_v38  ;;  %v9246_v34 = vrot.slane %v7120_v56, 7  ;;  %v9249_v48 = vrot.slane %v7016_v31, 7  ;;  %v7503_v31 = vmax.f32 %v1001_v41, 0.0  ;;  %5774 = vmatpush3.bf16.msra.mxu0 %v6565_v55 }
 0x12e   : > { %v7466_v20 = vpack.c.bf16 %v2005_v4, %v2006_v47  ;;  %v9247_v4 = vrot.slane %v7095_v49, 7  ;;  %v966_v62 = vmul.f32 %v6099_v57, %v6963_v19  ;;  %v7518_v41 = vpack.c.bf16 %v7097_v21, %v7087_v50  ;;  %5775 = vmatprep.subr.bf16.mxu0 %v6566_v7 }
 0x12f   : > { %v9256_v1 = vrot.slane %v7371_v36, 1  ;;  %v9260_v38 = vrot.slane %v7371_v36, 1  ;;  %v9262_v22 = vand.u32 15, %v6936_v8  ;;  %v9267_v8 = vrot.slane %v7334_v3, 1 }
 0x130   : > { %9242 = vst [vmem:[#allocation15_spill] sm:$0xff] %v7466_v20  ;;  %v1777_v33 = vsel %vm9100_vm0, %v9247_v4, %v9246_v34  ;;  %v9248_v17 = vmov %v9247_v4  ;;  %v7505_v4 = vmax.f32 %v999_v5, 0.0  ;;  %9254 = vst [vmem:[#allocation18_spill] sm:$0xff] %v7518_v41  ;;  %v9255_v5 = vrot.slane %v7294_v54, 1  ;;  %v6586_v34 = vld [vmem:[%s9065_s6 + $0x1e8] sm:$0xff]   ;;  %6157 = vmatprep.mubr.msk.bf16.mxu0 %vm7476_vm14, %v7466_v20 }
 0x131   : > { %v1778_v47 = vsel %vm9100_vm0, %v9249_v48, %v9248_v17  ;;  %v891_v17 = vpop.f32.mrb[21].mxu0  ;;  %v1004_v57 = vadd.f32 %v6972_v24, %v966_v62  ;;  %v2004_v0 = vsel %vm9101_vm1, %v9261_v61, %v9260_v38  ;;  %vm7554_vm6 = vcmp.ne.s32.totalorder %v9262_v22, 15  ;;  %v6587_v62 = vld [vmem:[%s9065_s6 + $0x1a8] sm:$0xff]   ;;  %5911 = vmatprep.subr.bf16.mxu1 %v6586_v34  ;;  %5776 = vmatpush3.bf16.msra.mxu0 %v6567_v42 }
 0x132   : > { %v7514_v48 = vpack.c.bf16 %v1777_v33, %v1778_v47  ;;  %v2003_v58 = vsel %vm9101_vm1, %v9256_v1, %v9255_v5  ;;  %v1966_v49 = vrot.slane %v7505_v4, 1  ;;  %v9257_v5 = vmov 0  ;;  %v6100_v1 = vpop.f32.mrb[22].mxu0  ;;  %5912 = vmatpush3.bf16.msra.mxu1 %v6587_v62  ;;  %v6570_v62 = vld [vmem:[%s9065_s6 + $0x138] sm:$0xff]  }
 0x133   : > { %v9258_v5 = vsel %vm7539_vm3, 4294967295, %v9257_v5  ;;  %v964_v33 = vmul.f32 %v6963_v19, %v891_v17  ;;  %v967_v47 = vmul.f32 %v6100_v1, %v6963_v19  ;;  %v894_v20 = vpop.f32.mrb[23].mxu0  ;;  %v7564_v17 = vpack.c.bf16 %v2003_v58, %v2004_v0  ;;  %v6588_v0 = vld [vmem:[%s9065_s6 + $0x1f0] sm:$0xff]   ;;  %v6591_v58 = vld [vmem:[%s9065_s6 + $0x1b8] sm:$0xff]  }
 0x134   : > { %9253 = vst [vmem:[#allocation17_spill] sm:$0xff] %v7514_v48  ;;  %9259 = vst [vmem:[#allocation19_spill] sm:$0xff] %v9258_v5  ;;  %v965_v38 = vmul.f32 %v6963_v19, %v894_v20  ;;  %v9266_v61 = vrot.slane %v7454_v15, 1  ;;  %v9268_v55 = vmov %v9267_v8  ;;  %v9269_v1 = vrot.slane %v7294_v54, 1  ;;  %v6568_v20 = vld [vmem:[%s9065_s6 + $0x130] sm:$0xff]   ;;  %4867 = vmatmul.mubr.msk.bf16.gmra.mrb[16].mxu1 %vm7539_vm3, %v7514_v48  ;;  %5913 = vmatprep.subr.bf16.mxu1 %v6588_v0 }
 0x135   : > { %9265 = vst [vmem:[#allocation20_spill] sm:$0xff] %v7564_v17  ;;  %v9270_v30 = vand.u32 15, %v6939_v9  ;;  %v1005_v9 = vadd.f32 %v6972_v24, %v967_v47  ;;  %2420 = vmatprep.mubr.bf16.mxu1 %v7518_v41  ;;  %v9274_v7 = vmov 0  ;;  %vm9279_vm14 = vcmp.lt.s32.totalorder %v6889_v53, 1  ;;  %5777 = vmatprep.subr.bf16.mxu0 %v6568_v20 }
 0x136   : > { %v2001_v22 = vsel %vm9101_vm1, %v9267_v8, %v9266_v61  ;;  %v2002_v27 = vsel %vm9101_vm1, %v9269_v1, %v9268_v55  ;;  %v7591_v61 = vmax.f32 %v1004_v57, 0.0  ;;  %v1002_v8 = vadd.f32 %v6972_v24, %v964_v33  ;;  %vm7604_vm1 = vmpackc.low %vm7409_vm9, %vm9118_vm7 }
 0x137   : > { %vm7581_vm0 = vcmp.ne.s32.totalorder %v9270_v30, 15  ;;  %v7598_v30 = vpack.c.bf16 %v2001_v22, %v2002_v27  ;;  %v9275_v7 = vsel %vm7604_vm1, 4294967295, %v9274_v7  ;;  %v1003_v57 = vadd.f32 %v6972_v24, %v965_v38  ;;  %vm9282_vm11 = vmmov %vm9279_vm14  ;;  %6158 = vmatmul.mubr.msk.bf16.gmra.mrb[44].mxu0 %vm7604_vm1, %v7564_v17 }
 0x138   : > { %9276 = vst [vmem:[#allocation22_spill] sm:$0xff] %v9275_v7  ;;  %v9277_v33 = vrot.slane %v7097_v21, 7  ;;  %v9278_v55 = vrot.slane %v7087_v50, 7  ;;  %v9281_v47 = vrot.slane %v7120_v56, 7  ;;  %v7623_v22 = vpack.c.bf16 %v7245_v25, %v7188_v23  ;;  %vm7634_vm9 = vmpackc.low %vm7428_vm10, %vm9118_vm7 }
 0x139   : > { %9273 = vst [vmem:[#allocation21_spill] sm:$0xff] %v7598_v30  ;;  %v7627_v41 = vmax.f32 %v1002_v8, 0.0  ;;  %v7629_v5 = vmax.f32 %v1005_v9, 0.0  ;;  %v9284_v50 = vmov 0  ;;  %v9287_v56 = vand.u32 15, %v6942_v10  ;;  %v6569_v8 = vld [vmem:[%s9065_s6 + $0xf0] sm:$0xff]   ;;  %6161 = vmatprep.mubr.msk.bf16.mxu0 %vm7634_vm9, %v7598_v30 }
 0x13a   : > { %v1775_v27 = vsel %vm9279_vm14, %v9278_v55, %v9277_v33  ;;  %v9280_v34 = vmov %v9278_v55  ;;  %9283 = vst [vmem:[#allocation23_spill] sm:$0xff] %v7623_v22  ;;  %v9285_v50 = vsel %vm7634_vm9, 4294967295, %v9284_v50  ;;  %v7647_v9 = vmax.f32 %v1003_v57, 0.0  ;;  %v6103_v55 = vpop.f32.mrb[24].mxu0  ;;  %5778 = vmatpush3.bf16.msra.mxu0 %v6569_v8 }
 0x13b   : > { %v1776_v18 = vsel %vm9282_vm11, %v9281_v47, %v9280_v34  ;;  %9286 = vst [vmem:[#allocation24_spill] sm:$0xff] %v9285_v50  ;;  %vm7640_vm11 = vcmp.ne.s32.totalorder %v9287_v56, 0  ;;  %v9291_v34 = vrot.slane %v7435_v43, 1  ;;  %vm9292_vm10 = vcmp.lt.s32.totalorder %v6889_v53, 7  ;;  %5779 = vmatprep.subr.bf16.mxu0 %v6570_v62 }
 0x13c   : > { %v7649_v2 = vpack.c.bf16 %v1775_v27, %v1776_v18  ;;  %v9293_v47 = vrot.slane %v7454_v15, 1  ;;  %vm9294_vm14 = vmmov %vm9292_vm10  ;;  %v1971_v57 = vrot.slane %v7591_v61, 1  ;;  %v1969_v18 = vrot.slane %v7627_v41, 1  ;;  %v6589_v27 = vld [vmem:[%s9065_s6 + $0x1b0] sm:$0xff]  }
 0x13d   : > { %v1999_v10 = vsel %vm9292_vm10, %v1966_v49, %v9291_v34  ;;  %v907_v34 = vpop.f32.mrb[25].mxu0  ;;  %v1970_v20 = vrot.slane %v7647_v9, 1  ;;  %v970_v0 = vmul.f32 %v6103_v55, %v6963_v19  ;;  %vm7679_vm10 = vmpackc.low %vm9118_vm7, %vm7494_vm2  ;;  %v9295_v1 = vmov 0  ;;  %5914 = vmatpush3.bf16.msra.mxu1 %v6589_v27 }
 0x13e   : > { %9290 = vst [vmem:[#allocation25_spill] sm:$0xff] %v7649_v2  ;;  %v2000_v42 = vsel %vm9294_vm14, %v9293_v47, %v1966_v49  ;;  %v968_v47 = vmul.f32 %v6963_v19, %v907_v34  ;;  %v9296_v1 = vsel %vm7679_vm10, 4294967295, %v9295_v1  ;;  %v6104_v56 = vpop.f32.mrb[26].mxu0  ;;  %v9299_v55 = vrot.slane %v7503_v31, 1  ;;  %vm9302_vm2 = vmmov %vm9294_vm14  ;;  %4871 = vmatmul.mubr.msk.bf16.gmra.mrb[20].mxu1 %vm7679_vm10, %v7649_v2 }
 0x13f   : > { %9297 = vst [vmem:[#allocation26_spill] sm:$0xff] %v9296_v1  ;;  %v971_v38 = vmul.f32 %v6104_v56, %v6963_v19  ;;  %v7687_v49 = vpack.c.bf16 %v1999_v10, %v2000_v42  ;;  %v910_v50 = vpop.f32.mrb[27].mxu0  ;;  %v9301_v30 = vrot.slane %v7435_v43, 1  ;;  %v9303_v17 = vand.u32 15, %v6945_v11  ;;  %v6571_v10 = vld [vmem:[%s9065_s6 + $0xf8] sm:$0xff]   ;;  %2428 = vmatprep.mubr.bf16.mxu1 %v7623_v22 }
 0x140   : > { %v1997_v6 = vsel %vm9294_vm14, %v9299_v55, %v1969_v18  ;;  %v9300_v34 = vmov %v9299_v55  ;;  %v6590_v42 = vld [vmem:[%s9065_s6 + $0x1f8] sm:$0xff]   ;;  %v1008_v56 = vadd.f32 %v6972_v24, %v970_v0  ;;  %v1006_v55 = vadd.f32 %v6972_v24, %v968_v47  ;;  %5780 = vmatpush3.bf16.msra.mxu0 %v6571_v10 }
 0x141   : > { %9298 = vst [vmem:[#allocation27_spill] sm:$0xff] %v7687_v49  ;;  %v1998_v7 = vsel %vm9302_vm2, %v9301_v30, %v9300_v34  ;;  %vm7701_vm7 = vcmp.ne.s32.totalorder %v9303_v17, 15  ;;  %v969_v30 = vmul.f32 %v6963_v19, %v910_v50  ;;  %v9307_v17 = vand.u32 15, %v6948_v12  ;;  %v7725_v34 = vld [vmem:[%s9065_s6 + $0x140] sm:$0xff]   ;;  %5915 = vmatprep.subr.bf16.mxu1 %v6590_v42 }
 0x142   : > { %v7714_v11 = vpack.c.bf16 %v1997_v6, %v1998_v7  ;;  %v1009_v50 = vadd.f32 %v6972_v24, %v971_v38  ;;  %v9310_v7 = vrot.slane %v7245_v25, 7  ;;  %v9311_v12 = vrot.slane %v7188_v23, 7  ;;  %6177 = vmatprep.subr.bf16.mxu0 %v7725_v34  ;;  %5916 = vmatpush3.bf16.msra.mxu1 %v6591_v58 }
 0x143   : > { %vm7718_vm14 = vcmp.ne.s32.totalorder %v9307_v17, 15  ;;  %vm9312_vm2 = vcmp.lt.s32.totalorder %v6889_v53, 1  ;;  %v9314_v47 = vrot.slane %v7097_v21, 7  ;;  %v7745_v17 = vpack.c.bf16 %v7214_v37, %v7155_v60 }
 0x144   : > { %9306 = vst [vmem:[#allocation28_spill] sm:$0xff] %v7714_v11  ;;  %v1773_v0 = vsel %vm9312_vm2, %v9311_v12, %v9310_v7  ;;  %v9313_v62 = vmov %v9311_v12  ;;  %vm9315_vm9 = vmmov %vm9312_vm2  ;;  %v7747_v1 = vmax.f32 %v1008_v56, 0.0  ;;  %v7749_v38 = vmax.f32 %v1006_v55, 0.0 }
 0x145   : > { %v1774_v6 = vsel %vm9315_vm9, %v9314_v47, %v9313_v62  ;;  %vm9316_vm1 = vmmov 1   ;;  %v9317_v23 = vmov 0  ;;  %v1007_v21 = vadd.f32 %v6972_v24, %v969_v30  ;;  %v6107_v47 = vpop.f32.mrb[28].mxu0 }
 0x146   : > { %vm7755_vm2 = vmpackc.low %vm7554_vm6, %vm9316_vm1  ;;  %v7760_v7 = vpack.c.bf16 %v1773_v0, %v1774_v6  ;;  %v7762_v12 = vmax.f32 %v1009_v50, 0.0  ;;  %v9320_v56 = vmov 0  ;;  %v1995_v44 = vsel %vm9323_vm5, %v1970_v20, %v1971_v57 }
 0x147   : > { %v9318_v23 = vsel %vm7755_vm2, 4294967295, %v9317_v23  ;;  %vm7767_vm9 = vmpackc.low %vm7581_vm0, %vm9316_vm1  ;;  %v9325_v30 = vrot.slane %v7629_v5, 1  ;;  %v9327_v50 = vand.u32 15, %v6951_v13  ;;  %6162 = vmatmul.mubr.msk.bf16.gmra.mrb[48].mxu0 %vm7755_vm2, %v7687_v49  ;;  %v7798_v42 = vmax.f32 %v1007_v21, 0.0 }
 0x148   : > { %9319 = vst [vmem:[#allocation29_spill] sm:$0xff] %v9318_v23  ;;  %v9321_v56 = vsel %vm7767_vm9, 4294967295, %v9320_v56  ;;  %vm9324_vm6 = vmmov %vm9323_vm5  ;;  %v974_v6 = vmul.f32 %v6107_v47, %v6963_v19  ;;  %6165 = vmatprep.mubr.msk.bf16.mxu0 %vm7767_vm9, %v7714_v11  ;;  %v9332_v21 = vrot.slane %v7629_v5, 1  ;;  %v9333_v62 = vrot.slane %v7214_v37, 7 }
 0x149   : > { %9322 = vst [vmem:[#allocation30_spill] sm:$0xff] %v9321_v56  ;;  %v1996_v55 = vsel %vm9324_vm6, %v1969_v18, %v1970_v20  ;;  %v1994_v27 = vsel %vm9326_vm4, %v1971_v57, %v9325_v30  ;;  %vm7781_vm13 = vcmp.ne.s32.totalorder %v9327_v50, 0  ;;  %v1975_v20 = vrot.slane %v7747_v1, 1  ;;  %v923_v30 = vpop.f32.mrb[29].mxu0  ;;  %vm7808_vm0 = vmpackc.low %vm9316_vm1, %vm7640_vm11  ;;  %v6597_v18 = vld [vmem:[%s9065_s6 + $0x208] sm:$0xff]  }
 0x14a   : > { %v1973_v57 = vrot.slane %v7749_v38, 1  ;;  %v972_v50 = vmul.f32 %v6963_v19, %v923_v30  ;;  %v6108_v10 = vpop.f32.mrb[30].mxu0  ;;  %v7812_v13 = vpack.c.bf16 %v1995_v44, %v1996_v55  ;;  %v9334_v56 = vrot.slane %v7155_v60, 7  ;;  %4875 = vmatmul.mubr.msk.bf16.gmra.mrb[24].mxu1 %vm7808_vm0, %v7760_v7 }
 0x14b   : > { %vm9335_vm5 = vcmp.lt.s32.totalorder %v6889_v53, 1  ;;  %v1976_v30 = vrot.slane %v7762_v12, 1  ;;  %v1974_v11 = vrot.slane %v7798_v42, 1  ;;  %v1012_v23 = vadd.f32 %v6972_v24, %v974_v6  ;;  %v926_v55 = vpop.f32.mrb[31].mxu0  ;;  %2436 = vmatprep.mubr.bf16.mxu1 %v7745_v17 }
 0x14c   : > { %v1993_v47 = vsel %vm9326_vm4, %v9332_v21, %v1973_v57  ;;  %v1771_v33 = vsel %vm9335_vm5, %v9334_v56, %v9333_v62  ;;  %v975_v44 = vmul.f32 %v6108_v10, %v6963_v19  ;;  %v9336_v49 = vand.u32 15, %v6954_v14  ;;  %vm9341_vm6 = vmmov %vm9335_vm5 }
 0x14d   : > { %v1010_v22 = vadd.f32 %v6972_v24, %v972_v50  ;;  %v973_v56 = vmul.f32 %v6963_v19, %v926_v55  ;;  %v7836_v62 = vpack.c.bf16 %v1993_v47, %v1994_v27  ;;  %v9339_v2 = vrot.slane %v7155_v60, 7  ;;  %vm7868_vm5 = vmpackc.low %vm7701_vm7, %vm9316_vm1 }
 0x14e   : > { %vm7830_vm11 = vcmp.ne.s32.totalorder %v9336_v49, 15  ;;  %v9340_v6 = vrot.slane %v7245_v25, 7  ;;  %v9342_v14 = vand.u32 15, %v6985_v39  ;;  %v7850_v58 = vmax.f32 %v1012_v23, 0.0  ;;  %vm7884_vm7 = vmpackc.low %vm7718_vm14, %vm9316_vm1 }
 0x14f   : > { %v1013_v19 = vadd.f32 %v6972_v24, %v975_v44  ;;  %v7860_v25 = vpack.c.bf16 %v7371_v36, %v7308_v59  ;;  %v9345_v39 = vmov 0  ;;  %v1011_v23 = vadd.f32 %v6972_v24, %v973_v56  ;;  %6166 = vmatmul.mubr.msk.bf16.gmra.mrb[52].mxu0 %vm7868_vm5, %v7812_v13 }
 0x150   : > { %v1772_v10 = vsel %vm9341_vm6, %v9340_v6, %v9339_v2  ;;  %vm7846_vm4 = vcmp.ne.s32.totalorder %v9342_v14, 15  ;;  %v7862_v2 = vmax.f32 %v1010_v22, 0.0  ;;  %v9346_v39 = vsel %vm7868_vm5, 4294967295, %v9345_v39  ;;  %6169 = vmatprep.mubr.msk.bf16.mxu0 %vm7884_vm7, %v7836_v62  ;;  %vm7927_vm5 = vmpackc.low %vm9316_vm1, %vm7781_vm13 }
 0x151   : > { %v7856_v60 = vpack.c.bf16 %v1771_v33, %v1772_v10  ;;  %vm9347_vm6 = vcmp.lt.s32.totalorder %v6889_v53, 7  ;;  %v1739_v22 = vrot.slane %v7798_v42, 7  ;;  %v7879_v33 = vmax.f32 %v1013_v19, 0.0 }
 0x152   : > { %v1991_v27 = vsel %vm9347_vm6, %v1974_v11, %v1975_v20  ;;  %vm9348_vm9 = vmmov %vm9347_vm6  ;;  %v9349_v48 = vmov 0  ;;  %v9351_v44 = vand.u32 15, %v6988_v40  ;;  %v7898_v56 = vmax.f32 %v1011_v23, 0.0 }
 0x153   : > { %v1992_v50 = vsel %vm9348_vm9, %v1973_v57, %v1974_v11  ;;  %v9350_v48 = vsel %vm7884_vm7, 4294967295, %v9349_v48  ;;  %v1979_v11 = vrot.slane %v7850_v58, 1  ;;  %v1977_v57 = vrot.slane %v7862_v2, 1  ;;  %4879 = vmatmul.mubr.msk.bf16.gmra.mrb[28].mxu1 %vm7927_vm5, %v7856_v60 }
 0x154   : > { %v7888_v24 = vpack.c.bf16 %v1991_v27, %v1992_v50  ;;  %vm7892_vm6 = vcmp.ne.s32.totalorder %v9351_v44, 0  ;;  %v1990_v8 = vsel %vm9348_vm9, %v1975_v20, %v1976_v30  ;;  %v1742_v6 = vrot.slane %v7862_v2, 7  ;;  %2444 = vmatprep.mubr.bf16.mxu1 %v7860_v25 }
 0x155   : > { %v9354_v40 = vrot.slane %v7371_v36, 7  ;;  %v9355_v14 = vrot.slane %v7308_v59, 7  ;;  %vm9356_vm14 = vcmp.lt.s32.totalorder %v6889_v53, 1  ;;  %v9358_v27 = vrot.slane %v7214_v37, 7 }
 0x156   : > { %vm9359_vm9 = vmmov %vm9356_vm14  ;;  %v1743_v50 = vrot.slane %v7898_v56, 7  ;;  %v1978_v44 = vrot.slane %v7898_v56, 1  ;;  %v9366_v47 = vrot.slane %v7334_v3, 7  ;;  %v9367_v10 = vrot.slane %v7294_v54, 7 }
 0x157   : > { %v1769_v19 = vsel %vm9356_vm14, %v9355_v14, %v9354_v40  ;;  %v9357_v23 = vmov %v9355_v14  ;;  %vm9362_vm14 = vcmp.lt.s32.totalorder %v6889_v53, 7  ;;  %vm9368_vm13 = vcmp.lt.s32.totalorder %v6889_v53, 1  ;;  %v9462_v40 = vld [vmem:[#allocation9_spill] sm:$0xff] }
 0x158   : > { %v1770_v20 = vsel %vm9359_vm9, %v9358_v27, %v9357_v23  ;;  %v1989_v37 = vsel %vm9362_vm14, %v1976_v30, %v1977_v57  ;;  %v7939_v23 = vpack.c.bf16 %v7334_v3, %v7294_v54  ;;  %v9363_v27 = vand.u32 15, %v6993_v45  ;;  %vm9371_vm14 = vmmov %vm9368_vm13 }
 0x159   : > { %v7933_v59 = vpack.c.bf16 %v1769_v19, %v1770_v20  ;;  %v7935_v14 = vpack.c.bf16 %v1989_v37, %v1990_v8  ;;  %v1767_v30 = vsel %vm9368_vm13, %v9367_v10, %v9366_v47  ;;  %v9369_v8 = vmov %v9367_v10 }
 0x15a   : > { %vm7943_vm9 = vcmp.ne.s32.totalorder %v9363_v27, 15  ;;  %v9370_v19 = vrot.slane %v7371_v36, 7  ;;  %vm9372_vm7 = vcmp.lt.s32.totalorder %v6889_v53, 7  ;;  %v7969_v47 = vpack.c.bf16 %v7505_v4, %v7454_v15 }
 0x15b   : > { %v1987_v45 = vsel %vm9372_vm7, %v1978_v44, %v1979_v11  ;;  %vm9373_vm2 = vmmov %vm9372_vm7  ;;  %v9374_v36 = vrot.slane %v7505_v4, 7  ;;  %v9375_v10 = vrot.slane %v7454_v15, 7  ;;  %v9383_v15 = vrot.slane %v7435_v43, 7 }
 0x15c   : > { %v1768_v20 = vsel %vm9371_vm14, %v9370_v19, %v9369_v8  ;;  %v1988_v37 = vsel %vm9373_vm2, %v1977_v57, %v1978_v44  ;;  %vm9376_vm7 = vmmov %vm9368_vm13  ;;  %v9378_v44 = vrot.slane %v7334_v3, 7  ;;  %v7990_v19 = vpack.c.bf16 %v7503_v31, %v7435_v43 }
 0x15d   : > { %v7965_v27 = vpack.c.bf16 %v1767_v30, %v1768_v20  ;;  %v7974_v54 = vpack.c.bf16 %v1987_v45, %v1988_v37  ;;  %v1765_v8 = vsel %vm9376_vm7, %v9375_v10, %v9374_v36  ;;  %v9377_v57 = vmov %v9375_v10  ;;  %vm9379_vm2 = vmmov %vm9376_vm7 }
 0x15e   : > { %v1766_v30 = vsel %vm9379_vm2, %v9378_v44, %v9377_v57  ;;  %vm7996_vm13 = vmpackc.low %vm7830_vm11, %vm9316_vm1  ;;  %v9380_v20 = vmov 0  ;;  %v9382_v3 = vrot.slane %v7503_v31, 7  ;;  %v9385_v36 = vmov %v9383_v15 }
 0x15f   : > { %v9381_v20 = vsel %vm7996_vm13, 4294967295, %v9380_v20  ;;  %v8000_v45 = vpack.c.bf16 %v1765_v8, %v1766_v30  ;;  %vm9384_vm14 = vmmov %vm9379_vm2  ;;  %v9386_v10 = vrot.slane %v7505_v4, 7  ;;  %v8016_v57 = vpack.c.bf16 %v7647_v9, %v7627_v41  ;;  %6170 = vmatmul.mubr.msk.bf16.gmra.mrb[56].mxu0 %vm7996_vm13, %v7888_v24 }
 0x160   : > { %v1763_v37 = vsel %vm9384_vm14, %v9383_v15, %v9382_v3  ;;  %vm9387_vm7 = vmmov %vm9379_vm2  ;;  %v9388_v8 = vmov 0  ;;  %v9390_v43 = vrot.slane %v7647_v9, 7  ;;  %v9391_v4 = vrot.slane %v7627_v41, 7 }
 0x161   : > { %v1764_v21 = vsel %vm9387_vm7, %v9386_v10, %v9385_v36  ;;  %vm8021_vm11 = vmpackc.low %vm7846_vm4, %vm9316_vm1  ;;  %v9393_v15 = vrot.slane %v7503_v31, 7  ;;  %v8041_v36 = vpack.c.bf16 %v7629_v5, %v7591_v61  ;;  %v9395_v10 = vrot.slane %v7629_v5, 7 }
 0x162   : > { %v9389_v8 = vsel %vm8021_vm11, 4294967295, %v9388_v8  ;;  %v8025_v44 = vpack.c.bf16 %v1763_v37, %v1764_v21  ;;  %v1761_v30 = vsel %vm9379_vm2, %v9391_v4, %v9390_v43  ;;  %v9392_v3 = vmov %v9391_v4  ;;  %vm9394_vm14 = vmmov %vm9379_vm2  ;;  %6173 = vmatprep.mubr.msk.bf16.mxu0 %vm8021_vm11, %v7935_v14 }
 0x163   : > { %v1762_v49 = vsel %vm9394_vm14, %v9393_v15, %v9392_v3  ;;  %v9396_v21 = vrot.slane %v7591_v61, 7  ;;  %vm9397_vm4 = vmmov %vm9379_vm2  ;;  %v9399_v31 = vrot.slane %v7647_v9, 7  ;;  %v8059_v3 = vpack.c.bf16 %v7798_v42, %v7749_v38 }
 0x164   : > { %v8043_v37 = vpack.c.bf16 %v1761_v30, %v1762_v49  ;;  %vm9400_vm7 = vmmov %vm9379_vm2  ;;  %v9401_v15 = vrot.slane %v7749_v38, 7  ;;  %v9403_v49 = vmov %v9395_v10  ;;  %v8078_v42 = vpack.c.bf16 %v7762_v12, %v7747_v1  ;;  %v9471_v38 = vld [vmem:[#allocation15_spill] sm:$0xff] }
 0x165   : > { %v1759_v43 = vsel %vm9397_vm4, %v9396_v21, %v9395_v10  ;;  %v9398_v41 = vmov %v9396_v21  ;;  %vm9404_vm14 = vmmov %vm9379_vm2  ;;  %v1746_v21 = vrot.slane %v7032_v35, 7  ;;  %v1980_v55 = vrot.slane %v7879_v33, 1 }
 0x166   : > { %v1760_v4 = vsel %vm9400_vm7, %v9399_v31, %v9398_v41  ;;  %v1757_v61 = vsel %vm9379_vm2, %v9401_v15, %v1739_v22  ;;  %v9402_v9 = vmov %v9401_v15  ;;  %vm8087_vm4 = vmpackc.low %vm9316_vm1, %vm7892_vm6  ;;  %v9408_v41 = vrot.slane %v7747_v1, 7 }
 0x167   : > { %v8064_v30 = vpack.c.bf16 %v1759_v43, %v1760_v4  ;;  %v1758_v10 = vsel %vm9404_vm14, %v9403_v49, %v9402_v9  ;;  %v9407_v43 = vrot.slane %v7762_v12, 7  ;;  %vm9409_vm7 = vmmov %vm9379_vm2  ;;  %4883 = vmatmul.mubr.msk.bf16.gmra.mrb[32].mxu1 %vm8087_vm4, %v7933_v59  ;;  %v9423_v0 = vand.u32 15, %v6996_v46 }
 0x168   : > { %v8091_v5 = vpack.c.bf16 %v1757_v61, %v1758_v10  ;;  %v9410_v4 = vmov %v9408_v41  ;;  %v8108_v61 = vpack.c.bf16 %v7898_v56, %v7862_v2  ;;  %vm9411_vm6 = vmmov %vm9379_vm2  ;;  %v1982_v10 = vrot.slane %v7038_v28, 1  ;;  %2452 = vmatprep.mubr.bf16.mxu1 %v7939_v23 }
 0x169   : > { %v1755_v31 = vsel %vm9409_vm7, %v9408_v41, %v9407_v43  ;;  %v1756_v15 = vsel %vm9379_vm2, %v1739_v22, %v9410_v4  ;;  %v1753_v49 = vsel %vm9411_vm6, %v1742_v6, %v1743_v50  ;;  %vm9412_vm14 = vmmov %vm9379_vm2  ;;  %v8119_v22 = vpack.c.bf16 %v7879_v33, %v7850_v58 }
 0x16a   : > { %v8104_v9 = vpack.c.bf16 %v1755_v31, %v1756_v15  ;;  %v1754_v1 = vsel %vm9412_vm14, %v9407_v43, %v1742_v6  ;;  %v9413_v41 = vrot.slane %v7879_v33, 7  ;;  %v9414_v31 = vrot.slane %v7850_v58, 7  ;;  %vm9415_vm7 = vmmov %vm9379_vm2  ;;  %v9444_v58 = vld [vmem:[#allocation23_spill] sm:$0xff] }
 0x16b   : > { %v1981_v56 = vrot.slane %v7032_v35, 1  ;;  %v8131_v12 = vpack.c.bf16 %v1753_v49, %v1754_v1  ;;  %vm8141_vm6 = vmpackc.low %vm7943_vm9, %vm9316_vm1  ;;  %v9417_v15 = vmov 0  ;;  %v9421_v1 = vrot.slane %v7879_v33, 7 }
 0x16c   : > { %v1751_v2 = vsel %vm9415_vm7, %v9414_v31, %v9413_v41  ;;  %v9416_v6 = vmov %v9414_v31  ;;  %v9418_v15 = vsel %vm8141_vm6, 4294967295, %v9417_v15  ;;  %v9419_v41 = vrot.slane %v7038_v28, 7  ;;  %vm9420_vm14 = vmmov %vm9379_vm2  ;;  %6174 = vmatmul.mubr.msk.bf16.gmra.mrb[60].mxu0 %vm8141_vm6, %v7974_v54 }
 0x16d   : > { %v1752_v4 = vsel %vm9379_vm2, %v1743_v50, %v9416_v6  ;;  %vm9422_vm7 = vmmov %vm9379_vm2  ;;  %vm5570_vm9 = vcmp.ne.s32.totalorder %v9423_v0, 0  ;;  %v1226_v31 = vadd.s32 144, %v6889_v53  ;;  %vm9424_vm2 = vcmp.lt.s32.totalorder %v6889_v53, 7  ;;  %2967 = vmatprep.mubr.bf16.mxu0 %v7142_v63  ;;  %v9474_v63 = vld [vmem:[#allocation20_spill] sm:$0xff]  ;;  %v6602_v0 = vld [vmem:[%s9065_s6 + $0x230] sm:$0xff]  }
 0x16e   : > { %v8145_v43 = vpack.c.bf16 %v1751_v2, %v1752_v4  ;;  %v8151_v49 = vsel %vm9420_vm14, %v1746_v21, %v9419_v41  ;;  %v8157_v50 = vsel %vm9422_vm7, %v9421_v1, %v1746_v21  ;;  %v1985_v6 = vsel %vm9424_vm2, %v1980_v55, %v1981_v56  ;;  %vm9425_vm14 = vmmov %vm9424_vm2  ;;  %v6580_v1 = vld [vmem:[%s9065_s6 + $0x150] sm:$0xff]  }
 0x16f   : > { %v1986_v33 = vsel %vm9425_vm14, %v1979_v11, %v1980_v55  ;;  %vm9426_vm11 = vmmov %vm9424_vm2  ;;  %v9428_v46 = vrot.slane %v7028_v51, 1  ;;  %v1374_v51 = vand.u32 15, %v1226_v31  ;;  %v1228_v55 = vadd.s32 160, %v6889_v53 }
 0x170   : > { %v8172_v21 = vsel %vm9426_vm11, %v1981_v56, %v1982_v10  ;;  %vm9429_vm7 = vmmov %vm9424_vm2  ;;  %v8183_v41 = vpack.c.bf16 %v1985_v6, %v1986_v33  ;;  %v1230_v29 = vadd.s32 176, %v6889_v53  ;;  %v6592_v6 = vld [vmem:[%s9065_s6 + $0x160] sm:$0xff]   ;;  %v1232_v33 = vadd.s32 192, %v6889_v53 }
 0x171   : > { %9427 = vst [vmem:[#allocation31_spill] sm:$0xff] %v8172_v21  ;;  %v8178_v4 = vsel %vm9429_vm7, %v1982_v10, %v9428_v46  ;;  %vm8189_vm11 = vmpackc.low %vm9316_vm1, %vm5570_vm9  ;;  %vm5571_vm2 = vcmp.ne.s32.totalorder %v1374_v51, 0  ;;  %v6577_v10 = vld [vmem:[%s9065_s6 + $0x148] sm:$0xff]   ;;  %v1388_v56 = vand.u32 15, %v1228_v55  ;;  %v1236_v21 = vadd.s32 224, %v6889_v53  ;;  %v6603_v55 = vld [vmem:[%s9065_s6 + $0x238] sm:$0xff]  }
 0x172   : > { %4887 = vmatmul.mubr.msk.bf16.gmra.mrb[36].mxu1 %vm8189_vm11, %v7965_v27  ;;  %vm8207_vm9 = vmpackc.low %vm9316_vm1, %vm5571_vm2  ;;  %v1402_v31 = vand.u32 15, %v1230_v29  ;;  %v6593_v46 = vld [vmem:[%s9065_s6 + $0x168] sm:$0xff]   ;;  %v6594_v29 = vld [vmem:[%s9065_s6 + $0x170] sm:$0xff]  }
 0x173   : > { %2460 = vmatprep.mubr.bf16.mxu1 %v7969_v47  ;;  %v9437_v51 = vld [vmem:[#allocation17_spill] sm:$0xff] }
 0x174   : > { %5055 = vmatmul.mubr.msk.bf16.vlgmr.msra.gmra.mrb[64].mxu0 %vm7254_vm15, %v7262_v26  ;;  %vm5572_vm15 = vcmp.ne.s32.totalorder %v1388_v56, 0  ;;  %v6583_v26 = vld [vmem:[%s9065_s6 + $0x158] sm:$0xff]   ;;  %vm5573_vm7 = vcmp.ne.s32.totalorder %v1402_v31, 0  ;;  %v9477_v56 = vld [vmem:[#allocation21_spill] sm:$0xff] }
 0x175   : > { %6178 = vmatpush3.bf16.msra.mxu0 %v7725_v34  ;;  %2975 = vmatprep.mubr.bf16.mxu0 %v7267_v52  ;;  %v9434_v34 = vld [vmem:[#allocation12_spill] sm:$0xff]  ;;  %vm8227_vm14 = vmpackc.low %vm9316_vm1, %vm5572_vm15  ;;  %v6595_v31 = vld [vmem:[%s9065_s6 + $0x178] sm:$0xff]  }
 0x176   : > { %6179 = vmatprep.subr.bf16.mxu0 %v6577_v10  ;;  %vm8247_vm2 = vmpackc.low %vm9316_vm1, %vm5573_vm7 }
 0x179   : > { %6180 = vmatpush3.bf16.msra.mxu0 %v6577_v10  ;;  %v9439_v10 = vld [vmem:[#allocation18_spill] sm:$0xff] }
 0x17a   : > { %4891 = vmatmul.mubr.msk.bf16.gmra.mrb[40].mxu1 %vm8207_vm9, %v8000_v45  ;;  %6181 = vmatprep.subr.bf16.mxu0 %v6580_v1 }
 0x17b   : > { %2468 = vmatprep.mubr.bf16.mxu1 %v7990_v19 }
 0x17c   : > { %5059 = vmatmul.mubr.msk.bf16.gmra.mrb[68].mxu0 %vm7387_vm8, %v7405_v16 }
 0x17d   : > { %2983 = vmatprep.mubr.bf16.mxu0 %v9434_v34  ;;  %6182 = vmatpush3.bf16.msra.mxu0 %v6580_v1  ;;  %v1416_v1 = vand.u32 15, %v1232_v33 }
 0x17e   : > { %6183 = vmatprep.subr.bf16.mxu0 %v6583_v26 }
 0x17f   : > { %vm5574_vm15 = vcmp.ne.s32.totalorder %v1416_v1, 0  ;;  %v8274_v1 = vld [vmem:[%s9065_s6 + $0x200] sm:$0xff]  }
 0x180   : > { %vm8267_vm7 = vmpackc.low %vm9316_vm1, %vm5574_vm15 }
 0x181   : > { %6184 = vmatpush3.bf16.msra.mxu0 %v6583_v26  ;;  %v1234_v26 = vadd.s32 208, %v6889_v53 }
 0x182   : > { %4895 = vmatmul.mubr.msk.bf16.gmra.mrb[44].mxu1 %vm8227_vm14, %v8025_v44  ;;  %6185 = vmatprep.subr.bf16.mxu0 %v6592_v6 }
 0x183   : > { %2476 = vmatprep.mubr.bf16.mxu1 %v8016_v57 }
 0x184   : > { %5063 = vmatmul.mubr.msk.bf16.gmra.mrb[72].mxu0 %vm7539_vm3, %v9437_v51 }
 0x185   : > { %2991 = vmatprep.mubr.bf16.mxu0 %v9439_v10  ;;  %6186 = vmatpush3.bf16.msra.mxu0 %v6592_v6  ;;  %v9442_v6 = vld [vmem:[#allocation25_spill] sm:$0xff] }
 0x186   : > { %6187 = vmatprep.subr.bf16.mxu0 %v6593_v46 }
 0x189   : > { %6188 = vmatpush3.bf16.msra.mxu0 %v6593_v46  ;;  %v1430_v46 = vand.u32 15, %v1234_v26  ;;  %v1444_v26 = vand.u32 15, %v1236_v21 }
 0x18a   : > { %4899 = vmatmul.mubr.msk.bf16.gmra.mrb[48].mxu1 %vm8247_vm2, %v8043_v37  ;;  %6189 = vmatprep.subr.bf16.mxu0 %v6594_v29 }
 0x18b   : > { %2484 = vmatprep.mubr.bf16.mxu1 %v8041_v36  ;;  %vm5575_vm6 = vcmp.ne.s32.totalorder %v1430_v46, 0  ;;  %vm5576_vm13 = vcmp.ne.s32.totalorder %v1444_v26, 0 }
 0x18c   : > { %5067 = vmatmul.mubr.msk.bf16.gmra.mrb[76].mxu0 %vm7679_vm10, %v9442_v6  ;;  %vm8287_vm15 = vmpackc.low %vm9316_vm1, %vm5575_vm6 }
 0x18d   : > { %2999 = vmatprep.mubr.bf16.mxu0 %v9444_v58  ;;  %6190 = vmatpush3.bf16.msra.mxu0 %v6594_v29  ;;  %v9447_v29 = vmov 0  ;;  %vm8301_vm6 = vmpackc.low %vm9316_vm1, %vm5576_vm13 }
 0x18e   : > { %6191 = vmatprep.subr.bf16.mxu0 %v6595_v31  ;;  %v9448_v29 = vsel %vm8287_vm15, 4294967295, %v9447_v29 }
 0x191   : > { %6192 = vmatpush3.bf16.msra.mxu0 %v6595_v31  ;;  %v1238_v31 = vadd.s32 240, %v6889_v53 }
 0x192   : > { %4903 = vmatmul.mubr.msk.bf16.gmra.mrb[52].mxu1 %vm8267_vm7, %v8064_v30  ;;  %6225 = vmatprep.subr.bf16.mxu0 %v8274_v1 }
 0x193   : > { %2492 = vmatprep.mubr.bf16.mxu1 %v8059_v3  ;;  %v1458_v21 = vand.u32 15, %v1238_v31  ;;  %v9481_v31 = vld [vmem:[#allocation29_spill] sm:$0xff] }
 0x194   : > { %5071 = vmatmul.mubr.msk.bf16.gmra.mrb[80].mxu0 %vm7808_vm0, %v7760_v7 }
 0x195   : > { %3007 = vmatprep.mubr.bf16.mxu0 %v7745_v17  ;;  %vm5577_vm12 = vcmp.ne.s32.totalorder %v1458_v21, 0 }
 0x19a   : > { %4907 = vmatmul.mubr.msk.bf16.gmra.mrb[56].mxu1 %vm8287_vm15, %v8091_v5  ;;  %vm8314_vm15 = vmpackc.low %vm9316_vm1, %vm5577_vm12  ;;  %vm9453_vm12 = vnez %v9448_v29 }
 0x19b   : > { %2500 = vmatprep.mubr.bf16.mxu1 %v8078_v42 }
 0x19c   : > { %5075 = vmatmul.mubr.msk.bf16.gmra.mrb[84].mxu0 %vm7927_vm5, %v7856_v60 }
 0x19d   : > { %3015 = vmatprep.mubr.bf16.mxu0 %v7860_v25 }
 0x1a2   : > { %4911 = vmatmul.mubr.msk.bf16.gmra.mrb[60].mxu1 %vm8301_vm6, %v8104_v9 }
 0x1a3   : > { %2508 = vmatprep.mubr.bf16.mxu1 %v8108_v61 }
 0x1a4   : > { %5079 = vmatmul.mubr.msk.bf16.gmra.mrb[88].mxu0 %vm8087_vm4, %v7933_v59 }
 0x1a5   : > { %3023 = vmatprep.mubr.bf16.mxu0 %v7939_v23 }
 0x1aa   : > { %4915 = vmatmul.mubr.msk.bf16.gmra.mrb[64].mxu1 %vm8314_vm15, %v8131_v12 }
 0x1ab   : > { %3578 = vmatprep.mubr.bf16.mxu1 %v7267_v52  ;;  %v1240_v52 = vadd.s32 256, %v6889_v53 }
 0x1ac   : > { %5083 = vmatmul.mubr.msk.bf16.gmra.mrb[92].mxu0 %vm8189_vm11, %v7965_v27 }
 0x1ad   : > { %3031 = vmatprep.mubr.bf16.mxu0 %v7969_v47 }
 0x1b2   : > { %5255 = vmatmul.mubr.msk.bf16.vlgmr.msra.gmra.mrb[68].mxu1 %vm7387_vm8, %v7405_v16  ;;  %v1472_v16 = vand.u32 15, %v1240_v52 }
 0x1b3   : > { %3586 = vmatprep.mubr.bf16.mxu1 %v9434_v34  ;;  %v9475_v34 = vld [vmem:[#allocation22_spill] sm:$0xff] }
 0x1b4   : > { %5087 = vmatmul.mubr.msk.bf16.gmra.mrb[96].mxu0 %vm8207_vm9, %v8000_v45  ;;  %vm5593_vm8 = vcmp.ne.s32.totalorder %v1472_v16, 0  ;;  %v9483_v16 = vld [vmem:[#allocation28_spill] sm:$0xff] }
 0x1b5   : > { %3039 = vmatprep.mubr.bf16.mxu0 %v7990_v19 }
 0x1ba   : > { %5259 = vmatmul.mubr.msk.bf16.gmra.mrb[72].mxu1 %vm7539_vm3, %v9437_v51  ;;  %vm8387_vm3 = vmpackc.low %vm9316_vm1, %vm5593_vm8  ;;  %vm9488_vm8 = vnez %v9381_v20 }
 0x1bb   : > { %3594 = vmatprep.mubr.bf16.mxu1 %v9439_v10 }
 0x1bc   : > { %5091 = vmatmul.mubr.msk.bf16.gmra.mrb[100].mxu0 %vm8227_vm14, %v8025_v44 }
 0x1bd   : > { %3047 = vmatprep.mubr.bf16.mxu0 %v8016_v57 }
 0x1c2   : > { %5263 = vmatmul.mubr.msk.bf16.gmra.mrb[76].mxu1 %vm7679_vm10, %v9442_v6  ;;  %v9478_v6 = vld [vmem:[#allocation24_spill] sm:$0xff] }
 0x1c3   : > { %3602 = vmatprep.mubr.bf16.mxu1 %v9444_v58  ;;  %v9472_v58 = vld [vmem:[#allocation16_spill] sm:$0xff] }
 0x1c4   : > { %5095 = vmatmul.mubr.msk.bf16.gmra.mrb[104].mxu0 %vm8247_vm2, %v8043_v37 }
 0x1c5   : > { %3055 = vmatprep.mubr.bf16.mxu0 %v8041_v36 }
 0x1ca   : > { %5267 = vmatmul.mubr.msk.bf16.gmra.mrb[80].mxu1 %vm7808_vm0, %v7760_v7  ;;  %v9457_v7 = vld [vmem:[#allocation5_spill] sm:$0xff] }
 0x1cb   : > { %3610 = vmatprep.mubr.bf16.mxu1 %v7745_v17  ;;  %v9456_v17 = vld [vmem:[#allocation4_spill] sm:$0xff]  ;;  %vm9458_vm10 = vnez %v9457_v7 }
 0x1cc   : > { %5099 = vmatmul.mubr.msk.bf16.gmra.mrb[108].mxu0 %vm8267_vm7, %v8064_v30 }
 0x1cd   : > { %3063 = vmatprep.mubr.bf16.mxu0 %v8059_v3 }
 0x1d2   : > { %5271 = vmatmul.mubr.msk.bf16.gmra.mrb[84].mxu1 %vm7927_vm5, %v7856_v60  ;;  %v9459_v60 = vld [vmem:[#allocation7_spill] sm:$0xff] }
 0x1d3   : > { %3618 = vmatprep.mubr.bf16.mxu1 %v7860_v25  ;;  %v9460_v25 = vld [vmem:[#allocation6_spill] sm:$0xff] }
 0x1d4   : > { %5103 = vmatmul.mubr.msk.bf16.gmra.mrb[112].mxu0 %vm9453_vm12, %v8091_v5  ;;  %vm9461_vm0 = vnez %v9460_v25 }
 0x1d5   : > { %3071 = vmatprep.mubr.bf16.mxu0 %v8078_v42 }
 0x1da   : > { %5275 = vmatmul.mubr.msk.bf16.gmra.mrb[88].mxu1 %vm8087_vm4, %v7933_v59  ;;  %v9463_v59 = vld [vmem:[#allocation8_spill] sm:$0xff] }
 0x1db   : > { %3626 = vmatprep.mubr.bf16.mxu1 %v7939_v23  ;;  %vm9464_vm5 = vnez %v9463_v59  ;;  %v6598_v23 = vld [vmem:[%s9065_s6 + $0x210] sm:$0xff]  }
 0x1dc   : > { %5107 = vmatmul.mubr.msk.bf16.gmra.mrb[116].mxu0 %vm8301_vm6, %v8104_v9 }
 0x1dd   : > { %3079 = vmatprep.mubr.bf16.mxu0 %v8108_v61 }
 0x1e2   : > { %5279 = vmatmul.mubr.msk.bf16.gmra.mrb[92].mxu1 %vm8189_vm11, %v7965_v27  ;;  %v6599_v27 = vld [vmem:[%s9065_s6 + $0x218] sm:$0xff]   ;;  %vm9473_vm11 = vnez %v9472_v58 }
 0x1e3   : > { %3634 = vmatprep.mubr.bf16.mxu1 %v7969_v47  ;;  %v9465_v47 = vld [vmem:[#allocation11_spill] sm:$0xff] }
 0x1e4   : > { %5111 = vmatmul.mubr.msk.bf16.gmra.mrb[120].mxu0 %vm8314_vm15, %v8131_v12 }
 0x1e5   : > { %3087 = vmatprep.mubr.bf16.mxu0 %v8119_v22 }
 0x1ea   : > { %5283 = vmatmul.mubr.msk.bf16.gmra.mrb[96].mxu1 %vm8207_vm9, %v8000_v45  ;;  %v9468_v45 = vld [vmem:[#allocation13_spill] sm:$0xff]  ;;  %vm9476_vm9 = vnez %v9475_v34 }
 0x1eb   : > { %3642 = vmatprep.mubr.bf16.mxu1 %v7990_v19  ;;  %v9466_v19 = vld [vmem:[#allocation10_spill] sm:$0xff] }
 0x1ec   : > { %5115 = vmatmul.mubr.msk.bf16.gmra.mrb[124].mxu0 %vm8387_vm3, %v8145_v43  ;;  %vm9467_vm13 = vnez %v9466_v19 }
 0x1ed   : > { %6193 = vmatprep.mubr.msk.bf16.mxu0 %vm9458_vm10, %v9456_v17  ;;  %v9484_v17 = vld [vmem:[#allocation30_spill] sm:$0xff]  ;;  %vm9489_vm10 = vnez %v9389_v8 }
 0x1f2   : > { %5287 = vmatmul.mubr.msk.bf16.gmra.mrb[100].mxu1 %vm8227_vm14, %v8025_v44  ;;  %v6600_v44 = vld [vmem:[%s9065_s6 + $0x220] sm:$0xff]   ;;  %vm9479_vm14 = vnez %v9478_v6 }
 0x1f3   : > { %3650 = vmatprep.mubr.bf16.mxu1 %v8016_v57  ;;  %v9469_v57 = vld [vmem:[#allocation14_spill] sm:$0xff] }
 0x1f4   : > { %6194 = vmatmul.mubr.msk.bf16.vlgmr.msra.gmra.mrb[32].mxu0 %vm9461_vm0, %v9459_v60  ;;  %vm9470_vm4 = vnez %v9469_v57 }
 0x1f5   : > { %6226 = vmatpush3.bf16.msra.mxu0 %v8274_v1  ;;  %6197 = vmatprep.mubr.msk.bf16.mxu0 %vm9464_vm5, %v9462_v40  ;;  %v9480_v1 = vld [vmem:[#allocation27_spill] sm:$0xff] }
 0x1f6   : > { %6227 = vmatprep.subr.bf16.mxu0 %v6597_v18 }
 0x1f9   : > { %6228 = vmatpush3.bf16.msra.mxu0 %v6597_v18 }
 0x1fa   : > { %5291 = vmatmul.mubr.msk.bf16.gmra.mrb[104].mxu1 %vm8247_vm2, %v8043_v37  ;;  %6229 = vmatprep.subr.bf16.mxu0 %v6598_v23  ;;  %v5645_v37 = vpop.f32.mrb[4].mxu1  ;;  %vm9482_vm2 = vnez %v9481_v31  ;;  %v6608_v31 = vld [vmem:[%s9068_s9 + $0x20] sm:$0xff]  }
 0x1fb   : > { %3658 = vmatprep.mubr.bf16.mxu1 %v8041_v36  ;;  %v6601_v36 = vld [vmem:[%s9065_s6 + $0x228] sm:$0xff]   ;;  %v5646_v11 = vpop.f32.mrb[5].mxu1 }
 0x1fc   : > { %6198 = vmatmul.mubr.msk.bf16.gmra.mrb[36].mxu0 %vm9467_vm13, %v9465_v47  ;;  %v8444_v2 = vadd.f32 %v5646_v11, %v5645_v37 }
 0x1fd   : > { %6201 = vmatprep.mubr.msk.bf16.mxu0 %vm9470_vm4, %v9468_v45  ;;  %6230 = vmatpush3.bf16.msra.mxu0 %v6598_v23 }
 0x1fe   : > { %6231 = vmatprep.subr.bf16.mxu0 %v6599_v27 }
 0x201   : > { %6232 = vmatpush3.bf16.msra.mxu0 %v6599_v27  ;;  %v1242_v27 = vadd.s32 272, %v6889_v53 }
 0x202   : > { %5295 = vmatmul.mubr.msk.bf16.gmra.mrb[108].mxu1 %vm8267_vm7, %v8064_v30  ;;  %6233 = vmatprep.subr.bf16.mxu0 %v6600_v44  ;;  %v5648_v30 = vpop.f32.mrb[6].mxu1  ;;  %vm9485_vm7 = vnez %v9484_v17 }
 0x203   : > { %3666 = vmatprep.mubr.bf16.mxu1 %v8059_v3  ;;  %v5649_v3 = vpop.f32.mrb[7].mxu1 }
 0x204   : > { %6202 = vmatmul.mubr.msk.bf16.gmra.mrb[40].mxu0 %vm9473_vm11, %v9471_v38  ;;  %v8449_v51 = vadd.f32 %v5649_v3, %v5648_v30  ;;  %v5651_v10 = vpop.f32.mrb[8].mxu1  ;;  %v2163_v3 = vpack.c.bf16 %v7038_v28, %v7032_v35  ;;  %v6605_v35 = vld [vmem:[%s9068_s9 + $0x8] sm:$0xff]  }
 0x205   : > { %6205 = vmatprep.mubr.msk.bf16.mxu0 %vm9476_vm9, %v9474_v63  ;;  %6234 = vmatpush3.bf16.msra.mxu0 %v6600_v44  ;;  %v5652_v33 = vpop.f32.mrb[9].mxu1 }
 0x206   : > { %6235 = vmatprep.subr.bf16.mxu0 %v6601_v36  ;;  %v8464_v29 = vadd.f32 %v5652_v33, %v5651_v10 }
 0x209   : > { %6236 = vmatpush3.bf16.msra.mxu0 %v6601_v36 }
 0x20a   : > { %5299 = vmatmul.mubr.msk.bf16.gmra.mrb[112].mxu1 %vm9453_vm12, %v8091_v5  ;;  %6237 = vmatprep.subr.bf16.mxu0 %v6602_v0  ;;  %v5654_v5 = vpop.f32.mrb[10].mxu1  ;;  %vm9486_vm12 = vnez %v9346_v39 }
 0x20b   : > { %3674 = vmatprep.mubr.bf16.mxu1 %v8078_v42  ;;  %v5655_v42 = vpop.f32.mrb[11].mxu1 }
 0x20c   : > { %6206 = vmatmul.mubr.msk.bf16.gmra.mrb[44].mxu0 %vm9479_vm14, %v9477_v56  ;;  %v8466_v21 = vadd.f32 %v5655_v42, %v5654_v5  ;;  %v5657_v52 = vpop.f32.mrb[12].mxu1  ;;  %v9491_v5 = vpack.c.bf16 %v8151_v49, %v8157_v50 }
 0x20d   : > { %6209 = vmatprep.mubr.msk.bf16.mxu0 %vm9482_vm2, %v9480_v1  ;;  %6238 = vmatpush3.bf16.msra.mxu0 %v6602_v0  ;;  %v5658_v7 = vpop.f32.mrb[13].mxu1 }
 0x20e   : > { %6239 = vmatprep.subr.bf16.mxu0 %v6603_v55  ;;  %v8478_v18 = vadd.f32 %v5658_v7, %v5657_v52  ;;  %v5660_v23 = vpop.f32.mrb[14].mxu1 }
 0x20f   : > { %v5661_v46 = vpop.f32.mrb[15].mxu1 }
 0x210   : > { %v5663_v44 = vpop.f32.mrb[16].mxu1 }
 0x211   : > { %6240 = vmatpush3.bf16.msra.mxu0 %v6603_v55  ;;  %v5664_v36 = vpop.f32.mrb[17].mxu1 }
 0x212   : > { %5303 = vmatmul.mubr.msk.bf16.gmra.mrb[116].mxu1 %vm8301_vm6, %v8104_v9  ;;  %v6604_v9 = vld [vmem:[%s9068_s9] sm:$0xff]   ;;  %vm9487_vm6 = vnez %v9350_v48  ;;  %v8496_v37 = vadd.f32 %v5664_v36, %v5663_v44  ;;  %v5666_v11 = vpop.f32.mrb[18].mxu1 }
 0x213   : > { %3682 = vmatprep.mubr.bf16.mxu1 %v8108_v61  ;;  %v8483_v61 = vadd.f32 %v5661_v46, %v5660_v23  ;;  %6273 = vmatprep.subr.bf16.mxu1 %v6604_v9  ;;  %v5667_v26 = vpop.f32.mrb[19].mxu1 }
 0x214   : > { %6210 = vmatmul.mubr.msk.bf16.gmra.mrb[48].mxu0 %vm9485_vm7, %v9483_v16  ;;  %6274 = vmatpush3.bf16.msra.mxu1 %v6604_v9  ;;  %v8499_v30 = vadd.f32 %v5667_v26, %v5666_v11  ;;  %v5669_v55 = vpop.f32.mrb[20].mxu1 }
 0x215   : > { %6213 = vmatprep.mubr.msk.bf16.mxu0 %vm9486_vm12, %v7812_v13  ;;  %v5670_v10 = vpop.f32.mrb[21].mxu1  ;;  %6275 = vmatprep.subr.bf16.mxu1 %v6605_v35 }
 0x216   : > { %v8512_v33 = vadd.f32 %v5670_v10, %v5669_v55  ;;  %v5672_v28 = vpop.f32.mrb[22].mxu1 }
 0x218   : > { %6276 = vmatpush3.bf16.msra.mxu1 %v6605_v35 }
 0x21a   : > { %5307 = vmatmul.mubr.msk.bf16.gmra.mrb[120].mxu1 %vm8314_vm15, %v8131_v12  ;;  %v1486_v12 = vand.u32 15, %v1242_v27 }
 0x21b   : > { %3690 = vmatprep.mubr.bf16.mxu1 %v8119_v22  ;;  %v1241_v22 = vadd.s32 264, %v6889_v53 }
 0x21c   : > { %6214 = vmatmul.mubr.msk.bf16.gmra.mrb[52].mxu0 %vm9487_vm6, %v7836_v62  ;;  %vm5546_vm15 = vcmp.ne.s32.totalorder %v1486_v12, 0 }
 0x21d   : > { %6217 = vmatprep.mubr.msk.bf16.mxu0 %vm9488_vm8, %v7888_v24  ;;  %v1479_v0 = vand.u32 15, %v1241_v22  ;;  %vm9490_vm8 = vnez %v9418_v15  ;;  %vm5313_vm6 = vmpackc.low %vm9316_vm1, %vm5546_vm15 }
 0x222   : > { %5311 = vmatmul.mubr.msk.bf16.gmra.mrb[124].mxu1 %vm8387_vm3, %v8145_v43  ;;  %v5673_v43 = vpop.f32.mrb[23].mxu1  ;;  %vm5594_vm3 = vcmp.ne.s32.totalorder %v1479_v0, 15 }
 0x223   : > { %3698 = vmatprep.mubr.bf16.mxu1 %v2163_v3  ;;  %v8518_v32 = vadd.f32 %v5673_v43, %v5672_v28  ;;  %v5675_v52 = vpop.f32.mrb[24].mxu1 }
 0x224   : > { %6218 = vmatmul.mubr.msk.bf16.gmra.mrb[56].mxu0 %vm9489_vm10, %v7935_v14  ;;  %v5676_v7 = vpop.f32.mrb[25].mxu1 }
 0x225   : > { %6221 = vmatprep.mubr.msk.bf16.mxu0 %vm9490_vm8, %v7974_v54  ;;  %vm8524_vm8 = vmpackc.low %vm5594_vm3, %vm9316_vm1  ;;  %v8534_v23 = vadd.f32 %v5676_v7, %v5675_v52  ;;  %v5678_v49 = vpop.f32.mrb[26].mxu1 }
 0x226   : > { %v5679_v50 = vpop.f32.mrb[27].mxu1 }
 0x227   : > { %v8536_v9 = vadd.f32 %v5679_v50, %v5678_v49  ;;  %v5681_v46 = vpop.f32.mrb[28].mxu1 }
 0x228   : > { %v5682_v27 = vpop.f32.mrb[29].mxu1 }
 0x229   : > { %v8544_v44 = vadd.f32 %v5682_v27, %v5681_v46  ;;  %v5684_v25 = vpop.f32.mrb[30].mxu1 }
 0x22a   : > { %5315 = vmatmul.mubr.msk.bf16.gmra.mrb[128].mxu1 %vm5313_vm6, %v9491_v5  ;;  %v5685_v36 = vpop.f32.mrb[31].mxu1 }
 0x22b   : > { %v8549_v11 = vadd.f32 %v5685_v36, %v5684_v25 }
 0x22c   : > { %6222 = vmatmul.mubr.msk.bf16.gmra.mrb[60].mxu0 %vm8524_vm8, %v8183_v41 }
 0x22d   : > { %6241 = vmatprep.mubr.msk.bf16.mxu0 %vm9461_vm0, %v9459_v60  ;;  %v6606_v60 = vld [vmem:[%s9068_s9 + $0x10] sm:$0xff]   ;;  %vm9494_vm0 = vnez %v9350_v48 }
 0x22e   : > { %6277 = vmatprep.subr.bf16.mxu1 %v6606_v60 }
 0x22f   : > { %6278 = vmatpush3.bf16.msra.mxu1 %v6606_v60 }
 0x234   : > { %6242 = vmatmul.mubr.msk.bf16.vlgmr.msra.gmra.mrb[32].mxu0 %vm9464_vm5, %v9462_v40  ;;  %vm9495_vm5 = vnez %v9381_v20 }
 0x235   : > { %6245 = vmatprep.mubr.msk.bf16.mxu0 %vm9467_vm13, %v9465_v47  ;;  %vm9496_vm13 = vnez %v9418_v15 }
 0x23a   : > { %v5687_v26 = vpop.f32.mrb[32].mxu1 }
 0x23b   : > { %v5688_v40 = vpop.f32.mrb[33].mxu1 }
 0x23c   : > { %6246 = vmatmul.mubr.msk.bf16.gmra.mrb[36].mxu0 %vm9470_vm4, %v9468_v45  ;;  %v8557_v59 = vadd.f32 %v5688_v40, %v5687_v26  ;;  %v5690_v47 = vpop.f32.mrb[34].mxu1 }
 0x23d   : > { %6249 = vmatprep.mubr.msk.bf16.mxu0 %vm9473_vm11, %v9471_v38  ;;  %v5691_v19 = vpop.f32.mrb[35].mxu1  ;;  %v6607_v38 = vld [vmem:[%s9068_s9 + $0x18] sm:$0xff]  }
 0x23e   : > { %v8559_v12 = vadd.f32 %v5691_v19, %v5690_v47  ;;  %6279 = vmatprep.subr.bf16.mxu1 %v6607_v38 }
 0x23f   : > { %6280 = vmatpush3.bf16.msra.mxu1 %v6607_v38 }
 0x240   : > { %6281 = vmatprep.subr.bf16.mxu1 %v6608_v31 }
 0x243   : > { %6282 = vmatpush3.bf16.msra.mxu1 %v6608_v31 }
 0x244   : > { %6250 = vmatmul.mubr.msk.bf16.gmra.mrb[40].mxu0 %vm9476_vm9, %v9474_v63 }
 0x245   : > { %v5693_v22 = vpop.f32.mrb[36].mxu1  ;;  %6253 = vmatprep.mubr.msk.bf16.mxu0 %vm9479_vm14, %v9477_v56 }
 0x246   : > { %v5694_v3 = vpop.f32.mrb[37].mxu1 }
 0x247   : > { %v8567_v45 = vadd.f32 %v5694_v3, %v5693_v22  ;;  %v5696_v57 = vpop.f32.mrb[38].mxu1  ;;  %v5781_v0 = vpop.f32.mrb[64].mxu0 }
 0x248   : > { %v5697_v58 = vpop.f32.mrb[39].mxu1  ;;  %v5782_v10 = vpop.f32.mrb[65].mxu0 }
 0x249   : > { %v8572_v55 = vadd.f32 %v5697_v58, %v5696_v57  ;;  %v5783_v63 = vadd.f32 %v5782_v10, %v5781_v0  ;;  %v5784_v34 = vpop.f32.mrb[66].mxu0 }
 0x24a   : > { %v5785_v28 = vpop.f32.mrb[67].mxu0 }
 0x24b   : > { %v8575_v6 = vadd.f32 %v5783_v63, %v8444_v2  ;;  %v5786_v56 = vadd.f32 %v5785_v28, %v5784_v34 }
 0x24c   : > { %6254 = vmatmul.mubr.msk.bf16.gmra.mrb[44].mxu0 %vm9482_vm2, %v9480_v1 }
 0x24d   : > { %v5699_v35 = vpop.f32.mrb[40].mxu1  ;;  %v8581_v5 = vadd.f32 %v5786_v56, %v8449_v51  ;;  %6257 = vmatprep.mubr.msk.bf16.mxu0 %vm9485_vm7, %v9483_v16 }
 0x24e   : > { %v5700_v43 = vpop.f32.mrb[41].mxu1 }
 0x24f   : > { %v8586_v52 = vadd.f32 %v5700_v43, %v5699_v35  ;;  %v5702_v7 = vpop.f32.mrb[42].mxu1  ;;  %v5787_v2 = vpop.f32.mrb[68].mxu0 }
 0x250   : > { %v5703_v49 = vpop.f32.mrb[43].mxu1  ;;  %v5788_v1 = vpop.f32.mrb[69].mxu0 }
 0x251   : > { %v8588_v50 = vadd.f32 %v5703_v49, %v5702_v7  ;;  %v5789_v46 = vadd.f32 %v5788_v1, %v5787_v2  ;;  %v5790_v27 = vpop.f32.mrb[70].mxu0 }
 0x252   : > { %v5791_v51 = vpop.f32.mrb[71].mxu0 }
 0x253   : > { %v8594_v17 = vadd.f32 %v5789_v46, %v8464_v29  ;;  %v5792_v16 = vadd.f32 %v5791_v51, %v5790_v27 }
 0x254   : > { %6258 = vmatmul.mubr.msk.bf16.gmra.mrb[48].mxu0 %vm9486_vm12, %v7812_v13 }
 0x255   : > { %v5705_v25 = vpop.f32.mrb[44].mxu1  ;;  %v8600_v36 = vadd.f32 %v5792_v16, %v8466_v21  ;;  %6261 = vmatprep.mubr.msk.bf16.mxu0 %vm9494_vm0, %v7836_v62 }
 0x256   : > { %v5706_v60 = vpop.f32.mrb[45].mxu1 }
 0x257   : > { %v8605_v26 = vadd.f32 %v5706_v60, %v5705_v25  ;;  %v5708_v40 = vpop.f32.mrb[46].mxu1  ;;  %v5793_v29 = vpop.f32.mrb[72].mxu0 }
 0x258   : > { %v5709_v47 = vpop.f32.mrb[47].mxu1  ;;  %v5794_v22 = vpop.f32.mrb[73].mxu0 }
 0x259   : > { %v8607_v19 = vadd.f32 %v5709_v47, %v5708_v40  ;;  %v5795_v3 = vadd.f32 %v5794_v22, %v5793_v29  ;;  %v5796_v57 = vpop.f32.mrb[74].mxu0 }
 0x25a   : > { %v5797_v39 = vpop.f32.mrb[75].mxu0 }
 0x25b   : > { %v8610_v13 = vadd.f32 %v5795_v3, %v8478_v18  ;;  %v5798_v21 = vadd.f32 %v5797_v39, %v5796_v57  ;;  %v1243_v18 = vadd.s32 280, %v6889_v53 }
 0x25c   : > { %6262 = vmatmul.mubr.msk.bf16.gmra.mrb[52].mxu0 %vm9495_vm5, %v7888_v24  ;;  %v6609_v24 = vld [vmem:[%s9068_s9 + $0x28] sm:$0xff]  }
 0x25d   : > { %v5711_v38 = vpop.f32.mrb[48].mxu1  ;;  %v8616_v48 = vadd.f32 %v5798_v21, %v8483_v61  ;;  %6265 = vmatprep.mubr.msk.bf16.mxu0 %vm9489_vm10, %v7935_v14  ;;  %6283 = vmatprep.subr.bf16.mxu1 %v6609_v24  ;;  %v1493_v8 = vand.u32 15, %v1243_v18 }
 0x25e   : > { %v5712_v62 = vpop.f32.mrb[49].mxu1  ;;  %6284 = vmatpush3.bf16.msra.mxu1 %v6609_v24 }
 0x25f   : > { %v8621_v58 = vadd.f32 %v5712_v62, %v5711_v38  ;;  %v5714_v0 = vpop.f32.mrb[50].mxu1  ;;  %v5799_v63 = vpop.f32.mrb[76].mxu0  ;;  %vm5547_vm4 = vcmp.ne.s32.totalorder %v1493_v8, 15 }
 0x260   : > { %v5715_v10 = vpop.f32.mrb[51].mxu1  ;;  %v5800_v20 = vpop.f32.mrb[77].mxu0  ;;  %vm5377_vm11 = vmpackc.low %vm5547_vm4, %vm9316_vm1 }
 0x261   : > { %v8624_v34 = vadd.f32 %v5715_v10, %v5714_v0  ;;  %v5801_v61 = vadd.f32 %v5800_v20, %v5799_v63  ;;  %v5802_v28 = vpop.f32.mrb[78].mxu0 }
 0x262   : > { %v5803_v56 = vpop.f32.mrb[79].mxu0 }
 0x263   : > { %v8630_v14 = vadd.f32 %v5801_v61, %v8496_v37  ;;  %v5804_v35 = vadd.f32 %v5803_v56, %v5802_v28 }
 0x264   : > { %6266 = vmatmul.mubr.msk.bf16.gmra.mrb[56].mxu0 %vm9496_vm13, %v7974_v54 }
 0x265   : > { %v5717_v43 = vpop.f32.mrb[52].mxu1  ;;  %v8636_v7 = vadd.f32 %v5804_v35, %v8499_v30  ;;  %6269 = vmatprep.mubr.msk.bf16.mxu0 %vm8524_vm8, %v8183_v41  ;;  %v9497_v41 = vld [vmem:[#allocation31_spill] sm:$0xff] }
 0x266   : > { %v5718_v53 = vpop.f32.mrb[53].mxu1  ;;  %v9498_v16 = vpack.c.bf16 %v8178_v4, %v9497_v41 }
 0x267   : > { %v8641_v49 = vadd.f32 %v5718_v53, %v5717_v43  ;;  %v5720_v2 = vpop.f32.mrb[54].mxu1  ;;  %v5805_v37 = vpop.f32.mrb[80].mxu0 }
 0x268   : > { %v5721_v31 = vpop.f32.mrb[55].mxu1  ;;  %v5806_v46 = vpop.f32.mrb[81].mxu0 }
 0x269   : > { %v8643_v1 = vadd.f32 %v5721_v31, %v5720_v2  ;;  %v5807_v27 = vadd.f32 %v5806_v46, %v5805_v37  ;;  %v5808_v15 = vpop.f32.mrb[82].mxu0 }
 0x26a   : > { %v5809_v54 = vpop.f32.mrb[83].mxu0 }
 0x26b   : > { %v8647_v30 = vadd.f32 %v5807_v27, %v8512_v33  ;;  %v5810_v51 = vadd.f32 %v5809_v54, %v5808_v15  ;;  %v6610_v33 = vld [vmem:[%s9068_s9 + $0x30] sm:$0xff]   ;;  %v6611_v54 = vld [vmem:[%s9068_s9 + $0x38] sm:$0xff]  }
 0x26c   : > { %6270 = vmatmul.mubr.msk.bf16.gmra.mrb[60].mxu0 %vm5377_vm11, %v9498_v16  ;;  %6285 = vmatprep.subr.bf16.mxu1 %v6610_v33 }
 0x26d   : > { %v5723_v42 = vpop.f32.mrb[56].mxu1  ;;  %v8653_v60 = vadd.f32 %v5810_v51, %v8518_v32  ;;  %6286 = vmatpush3.bf16.msra.mxu1 %v6610_v33 }
 0x26e   : > { %v5724_v25 = vpop.f32.mrb[57].mxu1  ;;  %6287 = vmatprep.subr.bf16.mxu1 %v6611_v54 }
 0x26f   : > { %v8655_v40 = vadd.f32 %v5724_v25, %v5723_v42  ;;  %v5726_v47 = vpop.f32.mrb[58].mxu1  ;;  %v5811_v22 = vpop.f32.mrb[84].mxu0 }
 0x270   : > { %v5727_v29 = vpop.f32.mrb[59].mxu1  ;;  %v5812_v57 = vpop.f32.mrb[85].mxu0 }
 0x271   : > { %v8657_v3 = vadd.f32 %v5727_v29, %v5726_v47  ;;  %v5813_v39 = vadd.f32 %v5812_v57, %v5811_v22  ;;  %v5814_v21 = vpop.f32.mrb[86].mxu0  ;;  %6288 = vmatpush3.bf16.msra.mxu1 %v6611_v54 }
 0x272   : > { %v5815_v4 = vpop.f32.mrb[87].mxu0 }
 0x273   : > { %v8663_v32 = vadd.f32 %v5813_v39, %v8534_v23  ;;  %v5816_v38 = vadd.f32 %v5815_v4, %v5814_v21 }
 0x275   : > { %v5729_v62 = vpop.f32.mrb[60].mxu1  ;;  %v8666_v10 = vadd.f32 %v5816_v38, %v8536_v9 }
 0x276   : > { %v5730_v0 = vpop.f32.mrb[61].mxu1 }
 0x277   : > { %v8668_v18 = vadd.f32 %v5730_v0, %v5729_v62  ;;  %v5732_v63 = vpop.f32.mrb[62].mxu1  ;;  %v5817_v20 = vpop.f32.mrb[88].mxu0 }
 0x278   : > { %v5733_v24 = vpop.f32.mrb[63].mxu1  ;;  %v5818_v28 = vpop.f32.mrb[89].mxu0 }
 0x279   : > { %v8670_v61 = vadd.f32 %v5733_v24, %v5732_v63  ;;  %v5819_v56 = vadd.f32 %v5818_v28, %v5817_v20  ;;  %v5820_v8 = vpop.f32.mrb[90].mxu0 }
 0x27a   : > { %v5821_v35 = vpop.f32.mrb[91].mxu0 }
 0x27b   : > { %v8673_v23 = vadd.f32 %v5819_v56, %v8544_v44  ;;  %v5822_v43 = vadd.f32 %v5821_v35, %v5820_v8 }
 0x27d   : > { %v5735_v53 = vpop.f32.mrb[64].mxu1  ;;  %v8676_v9 = vadd.f32 %v5822_v43, %v8549_v11 }
 0x27e   : > { %v5736_v2 = vpop.f32.mrb[65].mxu1 }
 0x27f   : > { %v8678_v31 = vadd.f32 %v5736_v2, %v5735_v53  ;;  %v5738_v37 = vpop.f32.mrb[66].mxu1  ;;  %v5823_v27 = vpop.f32.mrb[92].mxu0 }
 0x280   : > { %v5739_v46 = vpop.f32.mrb[67].mxu1  ;;  %v5824_v51 = vpop.f32.mrb[93].mxu0 }
 0x281   : > { %v8680_v15 = vadd.f32 %v5739_v46, %v5738_v37  ;;  %v5825_v44 = vadd.f32 %v5824_v51, %v5823_v27  ;;  %v5826_v42 = vpop.f32.mrb[94].mxu0 }
 0x282   : > { %v5827_v41 = vpop.f32.mrb[95].mxu0 }
 0x283   : > { %v8686_v11 = vadd.f32 %v5825_v44, %v8557_v59  ;;  %v5828_v16 = vadd.f32 %v5827_v41, %v5826_v42 }
 0x285   : > { %v5917_v25 = vpop.f32.mrb[68].mxu1  ;;  %v8689_v29 = vadd.f32 %v5828_v16, %v8559_v12 }
 0x286   : > { %v5918_v47 = vpop.f32.mrb[69].mxu1 }
 0x287   : > { %v5919_v22 = vadd.f32 %v5918_v47, %v5917_v25  ;;  %v5920_v33 = vpop.f32.mrb[70].mxu1  ;;  %v5829_v39 = vpop.f32.mrb[96].mxu0 }
 0x288   : > { %v5921_v57 = vpop.f32.mrb[71].mxu1  ;;  %v5830_v38 = vpop.f32.mrb[97].mxu0 }
 0x289   : > { %v5922_v21 = vadd.f32 %v5921_v57, %v5920_v33  ;;  %v8692_v4 = vadd.f32 %v8575_v6, %v5919_v22  ;;  %v5831_v62 = vadd.f32 %v5830_v38, %v5829_v39  ;;  %v5832_v0 = vpop.f32.mrb[98].mxu0 }
 0x28a   : > { %v5833_v63 = vpop.f32.mrb[99].mxu0 }
 0x28b   : > { %v8695_v59 = vadd.f32 %v8581_v5, %v5922_v21  ;;  %v8698_v24 = vadd.f32 %v5831_v62, %v8567_v45  ;;  %v5834_v12 = vadd.f32 %v5833_v63, %v5832_v0 }
 0x28d   : > { %v5923_v20 = vpop.f32.mrb[72].mxu1  ;;  %v8701_v56 = vadd.f32 %v5834_v12, %v8572_v55 }
 0x28e   : > { %v5924_v28 = vpop.f32.mrb[73].mxu1 }
 0x28f   : > { %v5925_v8 = vadd.f32 %v5924_v28, %v5923_v20  ;;  %v5926_v35 = vpop.f32.mrb[74].mxu1  ;;  %v5835_v43 = vpop.f32.mrb[100].mxu0 }
 0x290   : > { %v5927_v6 = vpop.f32.mrb[75].mxu1  ;;  %v5836_v5 = vpop.f32.mrb[101].mxu0 }
 0x291   : > { %v5928_v53 = vadd.f32 %v5927_v6, %v5926_v35  ;;  %v8704_v2 = vadd.f32 %v8594_v17, %v5925_v8  ;;  %v5837_v37 = vadd.f32 %v5836_v5, %v5835_v43  ;;  %v5838_v46 = vpop.f32.mrb[102].mxu0 }
 0x292   : > { %v5839_v27 = vpop.f32.mrb[103].mxu0 }
 0x293   : > { %v8707_v45 = vadd.f32 %v8600_v36, %v5928_v53  ;;  %v8710_v54 = vadd.f32 %v5837_v37, %v8586_v52  ;;  %v5840_v55 = vadd.f32 %v5839_v27, %v5838_v46 }
 0x295   : > { %v5929_v51 = vpop.f32.mrb[76].mxu1  ;;  %v8713_v42 = vadd.f32 %v5840_v55, %v8588_v50 }
 0x296   : > { %v5930_v44 = vpop.f32.mrb[77].mxu1 }
 0x297   : > { %v5931_v41 = vadd.f32 %v5930_v44, %v5929_v51  ;;  %v5932_v16 = vpop.f32.mrb[78].mxu1  ;;  %v5841_v25 = vpop.f32.mrb[104].mxu0 }
 0x298   : > { %v5933_v17 = vpop.f32.mrb[79].mxu1  ;;  %v5842_v36 = vpop.f32.mrb[105].mxu0 }
 0x299   : > { %v5934_v47 = vadd.f32 %v5933_v17, %v5932_v16  ;;  %v8716_v22 = vadd.f32 %v8610_v13, %v5931_v41  ;;  %v5843_v33 = vadd.f32 %v5842_v36, %v5841_v25  ;;  %v5844_v57 = vpop.f32.mrb[106].mxu0 }
 0x29a   : > { %v5845_v39 = vpop.f32.mrb[107].mxu0 }
 0x29b   : > { %v8719_v52 = vadd.f32 %v8616_v48, %v5934_v47  ;;  %v8722_v21 = vadd.f32 %v5843_v33, %v8605_v26  ;;  %v5846_v50 = vadd.f32 %v5845_v39, %v5844_v57 }
 0x29d   : > { %v5935_v38 = vpop.f32.mrb[80].mxu1  ;;  %v8725_v0 = vadd.f32 %v5846_v50, %v8607_v19 }
 0x29e   : > { %v5936_v62 = vpop.f32.mrb[81].mxu1 }
 0x29f   : > { %v5937_v63 = vadd.f32 %v5936_v62, %v5935_v38  ;;  %v5938_v12 = vpop.f32.mrb[82].mxu1  ;;  %v5847_v20 = vpop.f32.mrb[108].mxu0 }
 0x2a0   : > { %v5939_v13 = vpop.f32.mrb[83].mxu1  ;;  %v5848_v48 = vpop.f32.mrb[109].mxu0 }
 0x2a1   : > { %v5940_v28 = vadd.f32 %v5939_v13, %v5938_v12  ;;  %v8728_v8 = vadd.f32 %v8630_v14, %v5937_v63  ;;  %v5849_v35 = vadd.f32 %v5848_v48, %v5847_v20  ;;  %v5850_v6 = vpop.f32.mrb[110].mxu0 }
 0x2a2   : > { %v5851_v43 = vpop.f32.mrb[111].mxu0 }
 0x2a3   : > { %v8731_v26 = vadd.f32 %v8636_v7, %v5940_v28  ;;  %v8734_v53 = vadd.f32 %v5849_v35, %v8621_v58  ;;  %v5852_v19 = vadd.f32 %v5851_v43, %v5850_v6 }
 0x2a5   : > { %v5941_v5 = vpop.f32.mrb[84].mxu1  ;;  %v8737_v46 = vadd.f32 %v5852_v19, %v8624_v34 }
 0x2a6   : > { %v5942_v37 = vpop.f32.mrb[85].mxu1 }
 0x2a7   : > { %v5943_v27 = vadd.f32 %v5942_v37, %v5941_v5  ;;  %v5944_v55 = vpop.f32.mrb[86].mxu1  ;;  %v5853_v51 = vpop.f32.mrb[112].mxu0 }
 0x2a8   : > { %v5945_v14 = vpop.f32.mrb[87].mxu1  ;;  %v5854_v7 = vpop.f32.mrb[113].mxu0 }
 0x2a9   : > { %v5946_v44 = vadd.f32 %v5945_v14, %v5944_v55  ;;  %v8740_v41 = vadd.f32 %v8647_v30, %v5943_v27  ;;  %v5855_v16 = vadd.f32 %v5854_v7, %v5853_v51  ;;  %v5856_v17 = vpop.f32.mrb[114].mxu0 }
 0x2aa   : > { %v5857_v25 = vpop.f32.mrb[115].mxu0 }
 0x2ab   : > { %v8743_v58 = vadd.f32 %v8653_v60, %v5946_v44  ;;  %v8746_v47 = vadd.f32 %v5855_v16, %v8641_v49  ;;  %v5858_v34 = vadd.f32 %v5857_v25, %v5856_v17 }
 0x2ad   : > { %v5947_v36 = vpop.f32.mrb[88].mxu1  ;;  %v8749_v57 = vadd.f32 %v5858_v34, %v8643_v1 }
 0x2ae   : > { %v5948_v33 = vpop.f32.mrb[89].mxu1 }
 0x2af   : > { %v5949_v39 = vadd.f32 %v5948_v33, %v5947_v36  ;;  %v5950_v50 = vpop.f32.mrb[90].mxu1  ;;  %v5859_v38 = vpop.f32.mrb[116].mxu0 }
 0x2b0   : > { %v5951_v30 = vpop.f32.mrb[91].mxu1  ;;  %v5860_v60 = vpop.f32.mrb[117].mxu0 }
 0x2b1   : > { %v5952_v62 = vadd.f32 %v5951_v30, %v5950_v50  ;;  %v8752_v63 = vadd.f32 %v8663_v32, %v5949_v39  ;;  %v5861_v12 = vadd.f32 %v5860_v60, %v5859_v38  ;;  %v5862_v13 = vpop.f32.mrb[118].mxu0 }
 0x2b2   : > { %v5863_v20 = vpop.f32.mrb[119].mxu0 }
 0x2b3   : > { %v8755_v49 = vadd.f32 %v8666_v10, %v5952_v62  ;;  %v8758_v28 = vadd.f32 %v5861_v12, %v8655_v40  ;;  %v5864_v1 = vadd.f32 %v5863_v20, %v5862_v13 }
 0x2b5   : > { %v5953_v48 = vpop.f32.mrb[92].mxu1  ;;  %v8761_v6 = vadd.f32 %v5864_v1, %v8657_v3 }
 0x2b6   : > { %v5954_v35 = vpop.f32.mrb[93].mxu1 }
 0x2b7   : > { %v5955_v43 = vadd.f32 %v5954_v35, %v5953_v48  ;;  %v5956_v19 = vpop.f32.mrb[94].mxu1  ;;  %v5865_v5 = vpop.f32.mrb[120].mxu0 }
 0x2b8   : > { %v5957_v32 = vpop.f32.mrb[95].mxu1  ;;  %v5866_v10 = vpop.f32.mrb[121].mxu0 }
 0x2b9   : > { %v5958_v37 = vadd.f32 %v5957_v32, %v5956_v19  ;;  %v8764_v27 = vadd.f32 %v8673_v23, %v5955_v43  ;;  %v5867_v55 = vadd.f32 %v5866_v10, %v5865_v5  ;;  %v5868_v14 = vpop.f32.mrb[122].mxu0 }
 0x2ba   : > { %v5869_v51 = vpop.f32.mrb[123].mxu0 }
 0x2bb   : > { %v8767_v40 = vadd.f32 %v8676_v9, %v5958_v37  ;;  %v8770_v44 = vadd.f32 %v5867_v55, %v8668_v18  ;;  %v5870_v3 = vadd.f32 %v5869_v51, %v5868_v14 }
 0x2bd   : > { %v5959_v7 = vpop.f32.mrb[96].mxu1  ;;  %v8773_v17 = vadd.f32 %v5870_v3, %v8670_v61 }
 0x2be   : > { %v5960_v16 = vpop.f32.mrb[97].mxu1 }
 0x2bf   : > { %v5961_v25 = vadd.f32 %v5960_v16, %v5959_v7  ;;  %v5962_v34 = vpop.f32.mrb[98].mxu1  ;;  %v5871_v36 = vpop.f32.mrb[124].mxu0 }
 0x2c0   : > { %v5963_v23 = vpop.f32.mrb[99].mxu1  ;;  %v5872_v9 = vpop.f32.mrb[125].mxu0 }
 0x2c1   : > { %v5964_v33 = vadd.f32 %v5963_v23, %v5962_v34  ;;  %v8776_v39 = vadd.f32 %v8686_v11, %v5961_v25  ;;  %v5873_v50 = vadd.f32 %v5872_v9, %v5871_v36  ;;  %v5874_v30 = vpop.f32.mrb[126].mxu0 }
 0x2c2   : > { %v5875_v38 = vpop.f32.mrb[127].mxu0 }
 0x2c3   : > { %v8779_v18 = vadd.f32 %v8689_v29, %v5964_v33  ;;  %v8782_v62 = vadd.f32 %v5873_v50, %v8678_v31  ;;  %v5876_v61 = vadd.f32 %v5875_v38, %v5874_v30 }
 0x2c5   : > { %v5965_v60 = vpop.f32.mrb[100].mxu1  ;;  %v6411_v13 = vadd.f32 %v5876_v61, %v8680_v15 }
 0x2c6   : > { %v5966_v12 = vpop.f32.mrb[101].mxu1 }
 0x2c7   : > { %v5967_v20 = vadd.f32 %v5966_v12, %v5965_v60  ;;  %v5968_v1 = vpop.f32.mrb[102].mxu1 }
 0x2c8   : > { %v5969_v48 = vpop.f32.mrb[103].mxu1 }
 0x2c9   : > { %v5970_v11 = vadd.f32 %v5969_v48, %v5968_v1  ;;  %v8786_v35 = vadd.f32 %v8698_v24, %v5967_v20 }
 0x2cb   : > { %v8789_v43 = vadd.f32 %v8701_v56, %v5970_v11 }
 0x2cd   : > { %v5971_v29 = vpop.f32.mrb[104].mxu1 }
 0x2ce   : > { %v5972_v19 = vpop.f32.mrb[105].mxu1 }
 0x2cf   : > { %v5973_v32 = vadd.f32 %v5972_v19, %v5971_v29  ;;  %v5974_v31 = vpop.f32.mrb[106].mxu1 }
 0x2d0   : > { %v5975_v5 = vpop.f32.mrb[107].mxu1 }
 0x2d1   : > { %v5976_v37 = vadd.f32 %v5975_v5, %v5974_v31  ;;  %v8792_v10 = vadd.f32 %v8710_v54, %v5973_v32 }
 0x2d3   : > { %v8795_v15 = vadd.f32 %v8713_v42, %v5976_v37 }
 0x2d5   : > { %v5977_v55 = vpop.f32.mrb[108].mxu1 }
 0x2d6   : > { %v5978_v14 = vpop.f32.mrb[109].mxu1 }
 0x2d7   : > { %v5979_v51 = vadd.f32 %v5978_v14, %v5977_v55  ;;  %v5980_v24 = vpop.f32.mrb[110].mxu1 }
 0x2d8   : > { %v5981_v3 = vpop.f32.mrb[111].mxu1 }
 0x2d9   : > { %v5982_v7 = vadd.f32 %v5981_v3, %v5980_v24  ;;  %v8798_v56 = vadd.f32 %v8722_v21, %v5979_v51 }
 0x2db   : > { %v8801_v16 = vadd.f32 %v8725_v0, %v5982_v7 }
 0x2dd   : > { %v5983_v25 = vpop.f32.mrb[112].mxu1 }
 0x2de   : > { %v5984_v34 = vpop.f32.mrb[113].mxu1 }
 0x2df   : > { %v5985_v23 = vadd.f32 %v5984_v34, %v5983_v25  ;;  %v5986_v54 = vpop.f32.mrb[114].mxu1 }
 0x2e0   : > { %v5987_v36 = vpop.f32.mrb[115].mxu1 }
 0x2e1   : > { %v5988_v33 = vadd.f32 %v5987_v36, %v5986_v54  ;;  %v8804_v42 = vadd.f32 %v8734_v53, %v5985_v23  ;;  %v8841_v36 = vld [vmem:[%s9067_s8] ss:$0 sm:$0xff] }
 0x2e3   : > { %v8807_v9 = vadd.f32 %v8737_v46, %v5988_v33 }
 0x2e5   : > { %v5989_v50 = vpop.f32.mrb[116].mxu1 }
 0x2e6   : > { %v5990_v30 = vpop.f32.mrb[117].mxu1 }
 0x2e7   : > { %v5991_v38 = vadd.f32 %v5990_v30, %v5989_v50  ;;  %v5992_v21 = vpop.f32.mrb[118].mxu1 }
 0x2e8   : > { %v5993_v61 = vpop.f32.mrb[119].mxu1 }
 0x2e9   : > { %v5994_v60 = vadd.f32 %v5993_v61, %v5992_v21  ;;  %v8810_v0 = vadd.f32 %v8746_v47, %v5991_v38 }
 0x2eb   : > { %v8813_v12 = vadd.f32 %v8749_v57, %v5994_v60 }
 0x2ed   : > { %v5995_v20 = vpop.f32.mrb[120].mxu1 }
 0x2ee   : > { %v5996_v1 = vpop.f32.mrb[121].mxu1 }
 0x2ef   : > { %v5997_v48 = vadd.f32 %v5996_v1, %v5995_v20  ;;  %v5998_v53 = vpop.f32.mrb[122].mxu1 }
 0x2f0   : > { %v5999_v11 = vpop.f32.mrb[123].mxu1 }
 0x2f1   : > { %v6000_v29 = vadd.f32 %v5999_v11, %v5998_v53  ;;  %v8816_v46 = vadd.f32 %v8758_v28, %v5997_v48 }
 0x2f3   : > { %v8819_v19 = vadd.f32 %v8761_v6, %v6000_v29 }
 0x2f5   : > { %v6001_v32 = vpop.f32.mrb[124].mxu1 }
 0x2f6   : > { %v6002_v31 = vpop.f32.mrb[125].mxu1 }
 0x2f7   : > { %v6003_v5 = vadd.f32 %v6002_v31, %v6001_v32  ;;  %v6004_v47 = vpop.f32.mrb[126].mxu1 }
 0x2f8   : > { %v6005_v37 = vpop.f32.mrb[127].mxu1 }
 0x2f9   : > { %v6006_v55 = vadd.f32 %v6005_v37, %v6004_v47  ;;  %v8822_v57 = vadd.f32 %v8770_v44, %v6003_v5  ;;  %v8835_v44 = vld [vmem:[%s9066_s7] ss:$0 sm:$0xff] }
 0x2fb   : > { %v8825_v14 = vadd.f32 %v8773_v17, %v6006_v55 }
 0x2fd   : > { %v6007_v51 = vpop.f32.mrb[128].mxu1 }
 0x2fe   : > { %v6008_v24 = vpop.f32.mrb[129].mxu1 }
 0x2ff   : > { %v6009_v3 = vadd.f32 %v6008_v24, %v6007_v51  ;;  %v6010_v28 = vpop.f32.mrb[130].mxu1 }
 0x300   : > { %v6011_v7 = vpop.f32.mrb[131].mxu1 }
 0x301   : > { %v6012_v25 = vadd.f32 %v6011_v7, %v6010_v28  ;;  %v8828_v6 = vadd.f32 %v8782_v62, %v6009_v3 }
 0x303   : > { %v8830_v34 = vadd.f32 %v6411_v13, %v6012_v25 }
 0x307   : > { %v6243_v23 = vpop.f32.mrb[32].mxu0 }
 0x308   : > { %v6323_v17 = vadd.f32 %v8704_v2, %v6243_v23  ;;  %v3741_v54 = vpop.f32.mrb[33].mxu0 }
 0x309   : > { %v6326_v33 = vadd.f32 %v8692_v4, %v3741_v54  ;;  %v6244_v62 = vpop.f32.mrb[34].mxu0 }
 0x30a   : > { %v3973_v13 = vmul.f32 %v6323_v17, %v8835_v44  ;;  %v6329_v50 = vadd.f32 %v8707_v45, %v6244_v62  ;;  %v3744_v30 = vpop.f32.mrb[35].mxu0 }
 0x30b   : > { %v3971_v38 = vmul.f32 %v6326_v33, %v8835_v44  ;;  %v6332_v21 = vadd.f32 %v8695_v59, %v3744_v30 }
 0x30c   : > { %v4012_v2 = vadd.f32 %v8841_v36, %v3973_v13  ;;  %v3974_v61 = vmul.f32 %v6329_v50, %v8835_v44 }
 0x30d   : > { %v4010_v60 = vadd.f32 %v8841_v36, %v3971_v38  ;;  %v3972_v20 = vmul.f32 %v6332_v21, %v8835_v44 }
 0x30e   : > { %v4013_v4 = vadd.f32 %v8841_v36, %v3974_v61  ;;  %v4044_v53 = vmax.f32 %v4012_v2, 0.0 }
 0x30f   : > { %v4011_v1 = vadd.f32 %v8841_v36, %v3972_v20  ;;  %v6247_v48 = vpop.f32.mrb[36].mxu0  ;;  %v4042_v32 = vmax.f32 %v4010_v60, 0.0 }
 0x310   : > { %v4045_v45 = vmax.f32 %v4013_v4, 0.0  ;;  %v6335_v11 = vadd.f32 %v8728_v8, %v6247_v48  ;;  %v3757_v29 = vpop.f32.mrb[37].mxu0 }
 0x311   : > { %v4043_v59 = vmax.f32 %v4011_v1, 0.0  ;;  %v6338_v31 = vadd.f32 %v8716_v22, %v3757_v29  ;;  %v6248_v5 = vpop.f32.mrb[38].mxu0 }
 0x312   : > { %v4075_v47 = vpack.c.bf16 %v4045_v45, %v4044_v53  ;;  %v3977_v37 = vmul.f32 %v6335_v11, %v8835_v44  ;;  %v6341_v55 = vadd.f32 %v8731_v26, %v6248_v5  ;;  %v3760_v51 = vpop.f32.mrb[39].mxu0 }
 0x313   : > { %v3975_v24 = vmul.f32 %v6338_v31, %v8835_v44  ;;  %v6344_v3 = vadd.f32 %v8719_v52, %v3760_v51  ;;  %v4074_v28 = vpack.c.bf16 %v4043_v59, %v4042_v32 }
 0x314   : > { %v4016_v7 = vadd.f32 %v8841_v36, %v3977_v37  ;;  %v3978_v8 = vmul.f32 %v6341_v55, %v8835_v44 }
 0x315   : > { %v4014_v25 = vadd.f32 %v8841_v36, %v3975_v24  ;;  %v3976_v22 = vmul.f32 %v6344_v3, %v8835_v44  ;;  %6289 = vmatprep.mubr.bf16.mxu1 %v4074_v28 }
 0x316   : > { %v4017_v23 = vadd.f32 %v8841_v36, %v3978_v8  ;;  %6290 = vmatmul.mubr.bf16.vlgmr.msra.gmra.mrb[132].mxu1 %v4075_v47  ;;  %v4048_v54 = vmax.f32 %v4016_v7, 0.0 }
 0x317   : > { %v4015_v26 = vadd.f32 %v8841_v36, %v3976_v22  ;;  %v6251_v17 = vpop.f32.mrb[40].mxu0  ;;  %v4046_v13 = vmax.f32 %v4014_v25, 0.0 }
 0x318   : > { %v4049_v33 = vmax.f32 %v4017_v23, 0.0  ;;  %v6347_v52 = vadd.f32 %v8752_v63, %v6251_v17  ;;  %v3773_v62 = vpop.f32.mrb[41].mxu0 }
 0x319   : > { %v4047_v50 = vmax.f32 %v4015_v26, 0.0  ;;  %v6350_v30 = vadd.f32 %v8740_v41, %v3773_v62  ;;  %v6252_v38 = vpop.f32.mrb[42].mxu0 }
 0x31a   : > { %v3981_v21 = vmul.f32 %v6347_v52, %v8835_v44  ;;  %v6353_v2 = vadd.f32 %v8755_v49, %v6252_v38  ;;  %v3776_v61 = vpop.f32.mrb[43].mxu0  ;;  %v4077_v60 = vpack.c.bf16 %v4049_v33, %v4048_v54 }
 0x31b   : > { %v3979_v20 = vmul.f32 %v6350_v30, %v8835_v44  ;;  %v6356_v4 = vadd.f32 %v8743_v58, %v3776_v61  ;;  %v4076_v1 = vpack.c.bf16 %v4047_v50, %v4046_v13 }
 0x31c   : > { %v4020_v48 = vadd.f32 %v8841_v36, %v3981_v21  ;;  %v3982_v63 = vmul.f32 %v6353_v2, %v8835_v44 }
 0x31d   : > { %v4018_v53 = vadd.f32 %v8841_v36, %v3979_v20  ;;  %v3980_v41 = vmul.f32 %v6356_v4, %v8835_v44  ;;  %6293 = vmatprep.mubr.bf16.mxu1 %v4076_v1 }
 0x31e   : > { %v4021_v45 = vadd.f32 %v8841_v36, %v3982_v63  ;;  %6294 = vmatmul.mubr.bf16.gmra.mrb[136].mxu1 %v4077_v60  ;;  %v4052_v29 = vmax.f32 %v4020_v48, 0.0 }
 0x31f   : > { %v4019_v49 = vadd.f32 %v8841_v36, %v3980_v41  ;;  %v6255_v11 = vpop.f32.mrb[44].mxu0  ;;  %v4050_v31 = vmax.f32 %v4018_v53, 0.0 }
 0x320   : > { %v4053_v32 = vmax.f32 %v4021_v45, 0.0  ;;  %v6359_v58 = vadd.f32 %v8776_v39, %v6255_v11  ;;  %v3789_v59 = vpop.f32.mrb[45].mxu0 }
 0x321   : > { %v4051_v5 = vmax.f32 %v4019_v49, 0.0  ;;  %v6362_v47 = vadd.f32 %v8764_v27, %v3789_v59  ;;  %v6256_v37 = vpop.f32.mrb[46].mxu0 }
 0x322   : > { %v3985_v55 = vmul.f32 %v6359_v58, %v8835_v44  ;;  %v6365_v51 = vadd.f32 %v8779_v18, %v6256_v37  ;;  %v3792_v24 = vpop.f32.mrb[47].mxu0  ;;  %v4079_v3 = vpack.c.bf16 %v4053_v32, %v4052_v29 }
 0x323   : > { %v3983_v28 = vmul.f32 %v6362_v47, %v8835_v44  ;;  %v6368_v7 = vadd.f32 %v8767_v40, %v3792_v24  ;;  %v4078_v8 = vpack.c.bf16 %v4051_v5, %v4050_v31 }
 0x324   : > { %v4024_v25 = vadd.f32 %v8841_v36, %v3985_v55  ;;  %v3986_v39 = vmul.f32 %v6365_v51, %v8835_v44 }
 0x325   : > { %v4022_v22 = vadd.f32 %v8841_v36, %v3983_v28  ;;  %v3984_v27 = vmul.f32 %v6368_v7, %v8835_v44  ;;  %6297 = vmatprep.mubr.bf16.mxu1 %v4078_v8 }
 0x326   : > { %v4025_v23 = vadd.f32 %v8841_v36, %v3986_v39  ;;  %6298 = vmatmul.mubr.bf16.gmra.mrb[140].mxu1 %v4079_v3  ;;  %v4056_v17 = vmax.f32 %v4024_v25, 0.0 }
 0x327   : > { %v4023_v18 = vadd.f32 %v8841_v36, %v3984_v27  ;;  %v6259_v26 = vpop.f32.mrb[48].mxu0  ;;  %v4054_v52 = vmax.f32 %v4022_v22, 0.0 }
 0x328   : > { %v4057_v54 = vmax.f32 %v4025_v23, 0.0  ;;  %v6371_v40 = vadd.f32 %v8792_v10, %v6259_v26  ;;  %v3805_v33 = vpop.f32.mrb[49].mxu0 }
 0x329   : > { %v4055_v62 = vmax.f32 %v4023_v18, 0.0  ;;  %v6374_v13 = vadd.f32 %v8786_v35, %v3805_v33  ;;  %v6260_v50 = vpop.f32.mrb[50].mxu0 }
 0x32a   : > { %v3989_v30 = vmul.f32 %v6371_v40, %v8835_v44  ;;  %v6377_v38 = vadd.f32 %v8795_v15, %v6260_v50  ;;  %v3808_v21 = vpop.f32.mrb[51].mxu0  ;;  %v4081_v2 = vpack.c.bf16 %v4057_v54, %v4056_v17 }
 0x32b   : > { %v3987_v61 = vmul.f32 %v6374_v13, %v8835_v44  ;;  %v6380_v60 = vadd.f32 %v8789_v43, %v3808_v21  ;;  %v4080_v20 = vpack.c.bf16 %v4055_v62, %v4054_v52 }
 0x32c   : > { %v4028_v4 = vadd.f32 %v8841_v36, %v3989_v30  ;;  %v3990_v10 = vmul.f32 %v6377_v38, %v8835_v44 }
 0x32d   : > { %v4026_v1 = vadd.f32 %v8841_v36, %v3987_v61  ;;  %v3988_v35 = vmul.f32 %v6380_v60, %v8835_v44  ;;  %6301 = vmatprep.mubr.bf16.mxu1 %v4080_v20 }
 0x32e   : > { %v4029_v48 = vadd.f32 %v8841_v36, %v3990_v10  ;;  %6302 = vmatmul.mubr.bf16.gmra.mrb[144].mxu1 %v4081_v2  ;;  %v4060_v53 = vmax.f32 %v4028_v4, 0.0 }
 0x32f   : > { %v4027_v15 = vadd.f32 %v8841_v36, %v3988_v35  ;;  %v6263_v63 = vpop.f32.mrb[52].mxu0  ;;  %v4058_v49 = vmax.f32 %v4026_v1, 0.0 }
 0x330   : > { %v4061_v41 = vmax.f32 %v4029_v48, 0.0  ;;  %v6383_v43 = vadd.f32 %v8804_v42, %v6263_v63  ;;  %v3821_v45 = vpop.f32.mrb[53].mxu0 }
 0x331   : > { %v4059_v11 = vmax.f32 %v4027_v15, 0.0  ;;  %v6386_v29 = vadd.f32 %v8798_v56, %v3821_v45  ;;  %v6264_v32 = vpop.f32.mrb[54].mxu0 }
 0x332   : > { %v3993_v58 = vmul.f32 %v6383_v43, %v8835_v44  ;;  %v6389_v59 = vadd.f32 %v8807_v9, %v6264_v32  ;;  %v3824_v31 = vpop.f32.mrb[55].mxu0  ;;  %v4083_v5 = vpack.c.bf16 %v4061_v41, %v4060_v53 }
 0x333   : > { %v3991_v47 = vmul.f32 %v6386_v29, %v8835_v44  ;;  %v6392_v37 = vadd.f32 %v8801_v16, %v3824_v31  ;;  %v4082_v55 = vpack.c.bf16 %v4059_v11, %v4058_v49  ;;  %v8946_v31 = vld [vmem:[%s9070_s11] ss:$0 sm:$0xff] }
 0x334   : > { %v4032_v51 = vadd.f32 %v8841_v36, %v3993_v58  ;;  %v3994_v42 = vmul.f32 %v6389_v59, %v8835_v44 }
 0x335   : > { %v4030_v24 = vadd.f32 %v8841_v36, %v3991_v47  ;;  %v3992_v56 = vmul.f32 %v6392_v37, %v8835_v44  ;;  %6305 = vmatprep.mubr.bf16.mxu1 %v4082_v55  ;;  %v6629_v55 = vld [vmem:[%s6767_s16] sm:$0xff]  }
 0x336   : > { %v4033_v3 = vadd.f32 %v8841_v36, %v3994_v42  ;;  %6306 = vmatmul.mubr.bf16.gmra.mrb[148].mxu1 %v4083_v5  ;;  %v4064_v7 = vmax.f32 %v4032_v51, 0.0  ;;  %v4393_v51 = vunpack.c.l.bf16 %v6629_v55 }
 0x337   : > { %v4031_v9 = vadd.f32 %v8841_v36, %v3992_v56  ;;  %v6267_v28 = vpop.f32.mrb[56].mxu0  ;;  %v4062_v39 = vmax.f32 %v4030_v24, 0.0 }
 0x338   : > { %v4065_v8 = vmax.f32 %v4033_v3, 0.0  ;;  %v6395_v16 = vadd.f32 %v8816_v46, %v6267_v28  ;;  %v3837_v25 = vpop.f32.mrb[57].mxu0 }
 0x339   : > { %v4063_v22 = vmax.f32 %v4031_v9, 0.0  ;;  %v6398_v27 = vadd.f32 %v8810_v0, %v3837_v25  ;;  %v6268_v23 = vpop.f32.mrb[58].mxu0 }
 0x33a   : > { %v3997_v18 = vmul.f32 %v6395_v16, %v8835_v44  ;;  %v6401_v26 = vadd.f32 %v8819_v19, %v6268_v23  ;;  %v3840_v17 = vpop.f32.mrb[59].mxu0  ;;  %v4085_v54 = vpack.c.bf16 %v4065_v8, %v4064_v7  ;;  %v4394_v7 = vunpack.c.h.bf16 %v6629_v55 }
 0x33b   : > { %v3995_v40 = vmul.f32 %v6398_v27, %v8835_v44  ;;  %v6404_v33 = vadd.f32 %v8813_v12, %v3840_v17  ;;  %v4084_v52 = vpack.c.bf16 %v4063_v22, %v4062_v39  ;;  %v6630_v17 = vld [vmem:[%s6767_s16 + $0x18] sm:$0xff]  }
 0x33c   : > { %v4036_v62 = vadd.f32 %v8841_v36, %v3997_v18  ;;  %v3998_v46 = vmul.f32 %v6401_v26, %v8835_v44 }
 0x33d   : > { %v4034_v13 = vadd.f32 %v8841_v36, %v3995_v40  ;;  %v3996_v0 = vmul.f32 %v6404_v33, %v8835_v44  ;;  %6309 = vmatprep.mubr.bf16.mxu1 %v4084_v52 }
 0x33e   : > { %v4037_v50 = vadd.f32 %v8841_v36, %v3998_v46  ;;  %6310 = vmatmul.mubr.bf16.gmra.mrb[152].mxu1 %v4085_v54  ;;  %v4068_v38 = vmax.f32 %v4036_v62, 0.0  ;;  %v4399_v54 = vunpack.c.l.bf16 %v6630_v17  ;;  %v6631_v46 = vld [vmem:[%s6767_s16 + $0x10] sm:$0xff]  }
 0x33f   : > { %v4035_v19 = vadd.f32 %v8841_v36, %v3996_v0  ;;  %v6271_v30 = vpop.f32.mrb[60].mxu0  ;;  %v4066_v61 = vmax.f32 %v4034_v13, 0.0  ;;  %v4397_v13 = vunpack.c.l.bf16 %v6631_v46 }
 0x340   : > { %v4069_v21 = vmax.f32 %v4037_v50, 0.0  ;;  %v6407_v12 = vadd.f32 %v8828_v6, %v6271_v30  ;;  %v3853_v2 = vpop.f32.mrb[61].mxu0 }
 0x341   : > { %v4067_v60 = vmax.f32 %v4035_v19, 0.0  ;;  %v6410_v20 = vadd.f32 %v8822_v57, %v3853_v2  ;;  %v6272_v4 = vpop.f32.mrb[62].mxu0 }
 0x342   : > { %v4001_v10 = vmul.f32 %v6407_v12, %v8835_v44  ;;  %v6413_v1 = vadd.f32 %v8830_v34, %v6272_v4  ;;  %v3856_v35 = vpop.f32.mrb[63].mxu0  ;;  %v4087_v48 = vpack.c.bf16 %v4069_v21, %v4068_v38  ;;  %v4400_v38 = vunpack.c.h.bf16 %v6630_v17  ;;  %v6635_v17 = vld [vmem:[%s6767_s16 + $0x30] sm:$0xff]  }
 0x343   : > { %v3999_v15 = vmul.f32 %v6410_v20, %v8835_v44  ;;  %v6416_v63 = vadd.f32 %v8825_v14, %v3856_v35  ;;  %v4086_v53 = vpack.c.bf16 %v4067_v60, %v4066_v61  ;;  %v4398_v60 = vunpack.c.h.bf16 %v6631_v46 }
 0x344   : > { %v4040_v41 = vadd.f32 %v8841_v36, %v4001_v10  ;;  %v4002_v6 = vmul.f32 %v6413_v1, %v8835_v44 }
 0x345   : > { %v4038_v43 = vadd.f32 %v8841_v36, %v3999_v15  ;;  %v4000_v57 = vmul.f32 %v6416_v63, %v8835_v44  ;;  %6313 = vmatprep.mubr.bf16.mxu1 %v4086_v53  ;;  %v8941_v44 = vld [vmem:[%s9069_s10] ss:$0 sm:$0xff] }
 0x346   : > { %v4041_v45 = vadd.f32 %v8841_v36, %v4002_v6  ;;  %6314 = vmatmul.mubr.bf16.gmra.mrb[156].mxu1 %v4087_v48  ;;  %v4072_v49 = vmax.f32 %v4040_v41, 0.0  ;;  %v6632_v6 = vld [vmem:[%s6767_s16 + $0x28] sm:$0xff]  }
 0x347   : > { %v4039_v34 = vadd.f32 %v8841_v36, %v4000_v57  ;;  %v4070_v14 = vmax.f32 %v4038_v43, 0.0  ;;  %v6628_v36 = vld [vmem:[%s6767_s16 + $0x8] sm:$0xff]   ;;  %v4403_v43 = vunpack.c.l.bf16 %v6632_v6 }
 0x348   : > { %v4073_v11 = vmax.f32 %v4041_v45, 0.0  ;;  %v4395_v5 = vunpack.c.l.bf16 %v6628_v36  ;;  %v4396_v56 = vunpack.c.h.bf16 %v6628_v36  ;;  %v4404_v36 = vunpack.c.h.bf16 %v6632_v6  ;;  %v6637_v6 = vld [vmem:[%s6767_s16 + $0x40] sm:$0xff]  }
 0x349   : > { %v4071_v29 = vmax.f32 %v4039_v34, 0.0 }
 0x34a   : > { %v4089_v32 = vpack.c.bf16 %v4073_v11, %v4072_v49  ;;  %v6633_v11 = vld [vmem:[%s6767_s16 + $0x20] sm:$0xff]  }
 0x34b   : > { %v4088_v58 = vpack.c.bf16 %v4071_v29, %v4070_v14  ;;  %v4401_v14 = vunpack.c.l.bf16 %v6633_v11 }
 0x34d   : > { %6317 = vmatprep.mubr.bf16.mxu1 %v4088_v58 }
 0x34e   : > { %6318 = vmatmul.mubr.bf16.gmra.mrb[160].mxu1 %v4089_v32 }
 0x3e9   : > { %v6291_v59 = vpop.f32.mrb[132].mxu1 }
 0x3ea   : > { %v4324_v47 = vmul.f32 %v6291_v59, %v8941_v44  ;;  %v4188_v37 = vpop.f32.mrb[133].mxu1 }
 0x3eb   : > { %v4322_v42 = vmul.f32 %v8941_v44, %v4188_v37  ;;  %v6292_v24 = vpop.f32.mrb[134].mxu1 }
 0x3ec   : > { %v4363_v3 = vadd.f32 %v8946_v31, %v4324_v47  ;;  %v4325_v9 = vmul.f32 %v6292_v24, %v8941_v44  ;;  %v4191_v28 = vpop.f32.mrb[135].mxu1 }
 0x3ed   : > { %v4361_v8 = vadd.f32 %v8946_v31, %v4322_v42  ;;  %v4323_v16 = vmul.f32 %v8941_v44, %v4191_v28 }
 0x3ee   : > { %v4427_v25 = vadd.f32 %v4395_v5, %v4363_v3  ;;  %v4364_v39 = vadd.f32 %v8946_v31, %v4325_v9 }
 0x3ef   : > { %v4425_v22 = vadd.f32 %v4393_v51, %v4361_v8  ;;  %v4362_v27 = vadd.f32 %v8946_v31, %v4323_v16  ;;  %v4402_v51 = vunpack.c.h.bf16 %v6633_v11 }
 0x3f0   : > { %v4428_v23 = vadd.f32 %v4396_v56, %v4364_v39  ;;  %v4459_v40 = vmax.f32 %v4427_v25, 0.0  ;;  %v6634_v39 = vld [vmem:[%s6767_s16 + $0x38] sm:$0xff]  }
 0x3f1   : > { %v4426_v18 = vadd.f32 %v4394_v7, %v4362_v27  ;;  %v6295_v26 = vpop.f32.mrb[136].mxu1  ;;  %v4457_v0 = vmax.f32 %v4425_v22, 0.0  ;;  %v4407_v22 = vunpack.c.l.bf16 %v6634_v39  ;;  %v4408_v46 = vunpack.c.h.bf16 %v6634_v39  ;;  %v6639_v39 = vld [vmem:[%s6767_s16 + $0x50] sm:$0xff]  }
 0x3f2   : > { %v4460_v33 = vmax.f32 %v4428_v23, 0.0  ;;  %v4328_v52 = vmul.f32 %v6295_v26, %v8941_v44  ;;  %v4204_v62 = vpop.f32.mrb[137].mxu1 }
 0x3f3   : > { %v4458_v50 = vmax.f32 %v4426_v18, 0.0  ;;  %v4326_v19 = vmul.f32 %v8941_v44, %v4204_v62  ;;  %v6296_v30 = vpop.f32.mrb[138].mxu1 }
 0x3f4   : > { %v5471_v21 = vpack.c.bf16 %v4460_v33, %v4459_v40  ;;  %v4367_v12 = vadd.f32 %v8946_v31, %v4328_v52  ;;  %v4329_v2 = vmul.f32 %v6296_v30, %v8941_v44  ;;  %v4207_v61 = vpop.f32.mrb[139].mxu1  ;;  %v4406_v30 = vunpack.c.h.bf16 %v6635_v17 }
 0x3f5   : > { %v5466_v20 = vpack.c.bf16 %v4458_v50, %v4457_v0  ;;  %v4365_v4 = vadd.f32 %v8946_v31, %v4326_v19  ;;  %v4327_v10 = vmul.f32 %v8941_v44, %v4207_v61 }
 0x3f6   : > { %5548 = vst [vmem:[%s8965_s30 + $0x8] sm:$0xff] %v5471_v21   ;;  %v4431_v1 = vadd.f32 %v4399_v54, %v4367_v12  ;;  %v4368_v35 = vadd.f32 %v8946_v31, %v4329_v2  ;;  %v4405_v54 = vunpack.c.l.bf16 %v6635_v17 }
 0x3f7   : > { %5467 = vst [vmem:[%s8965_s30] sm:$0xff] %v5466_v20   ;;  %v4429_v48 = vadd.f32 %v4397_v13, %v4365_v4  ;;  %v4366_v15 = vadd.f32 %v8946_v31, %v4327_v10 }
 0x3f8   : > { %v4432_v63 = vadd.f32 %v4400_v38, %v4368_v35  ;;  %v4463_v57 = vmax.f32 %v4431_v1, 0.0  ;;  %v6636_v35 = vld [vmem:[%s6767_s16 + $0x48] sm:$0xff]  }
 0x3f9   : > { %v4430_v53 = vadd.f32 %v4398_v60, %v4366_v15  ;;  %v6299_v41 = vpop.f32.mrb[140].mxu1  ;;  %v4461_v29 = vmax.f32 %v4429_v48, 0.0  ;;  %v4411_v48 = vunpack.c.l.bf16 %v6636_v35  ;;  %v4412_v11 = vunpack.c.h.bf16 %v6636_v35  ;;  %v6641_v35 = vld [vmem:[%s6767_s16 + $0x60] sm:$0xff]  }
 0x3fa   : > { %v4464_v45 = vmax.f32 %v4432_v63, 0.0  ;;  %v4332_v34 = vmul.f32 %v6299_v41, %v8941_v44  ;;  %v4220_v49 = vpop.f32.mrb[141].mxu1 }
 0x3fb   : > { %v4462_v32 = vmax.f32 %v4430_v53, 0.0  ;;  %v4330_v58 = vmul.f32 %v8941_v44, %v4220_v49  ;;  %v6300_v59 = vpop.f32.mrb[142].mxu1 }
 0x3fc   : > { %v5481_v5 = vpack.c.bf16 %v4464_v45, %v4463_v57  ;;  %v4371_v47 = vadd.f32 %v8946_v31, %v4332_v34  ;;  %v4333_v37 = vmul.f32 %v6300_v59, %v8941_v44  ;;  %v4223_v55 = vpop.f32.mrb[143].mxu1  ;;  %v4410_v59 = vunpack.c.h.bf16 %v6637_v6 }
 0x3fd   : > { %v5476_v42 = vpack.c.bf16 %v4462_v32, %v4461_v29  ;;  %v4369_v24 = vadd.f32 %v8946_v31, %v4330_v58  ;;  %v4331_v56 = vmul.f32 %v8941_v44, %v4223_v55 }
 0x3fe   : > { %5550 = vst [vmem:[%s8965_s30 + $0x18] sm:$0xff] %v5481_v5   ;;  %v4435_v3 = vadd.f32 %v4403_v43, %v4371_v47  ;;  %v4372_v9 = vadd.f32 %v8946_v31, %v4333_v37  ;;  %v4409_v43 = vunpack.c.l.bf16 %v6637_v6 }
 0x3ff   : > { %5549 = vst [vmem:[%s8965_s30 + $0x10] sm:$0xff] %v5476_v42   ;;  %v4433_v28 = vadd.f32 %v4401_v14, %v4369_v24  ;;  %v4370_v7 = vadd.f32 %v8946_v31, %v4331_v56 }
 0x400   : > { %v4436_v8 = vadd.f32 %v4404_v36, %v4372_v9  ;;  %v4467_v27 = vmax.f32 %v4435_v3, 0.0  ;;  %v6638_v9 = vld [vmem:[%s6767_s16 + $0x58] sm:$0xff]  }
 0x401   : > { %v4434_v16 = vadd.f32 %v4402_v51, %v4370_v7  ;;  %v6303_v25 = vpop.f32.mrb[144].mxu1  ;;  %v4465_v40 = vmax.f32 %v4433_v28, 0.0  ;;  %v4415_v28 = vunpack.c.l.bf16 %v6638_v9  ;;  %v4416_v17 = vunpack.c.h.bf16 %v6638_v9  ;;  %v6643_v9 = vld [vmem:[%s6767_s16 + $0x70] sm:$0xff]  }
 0x402   : > { %v4468_v23 = vmax.f32 %v4436_v8, 0.0  ;;  %v4336_v18 = vmul.f32 %v6303_v25, %v8941_v44  ;;  %v4236_v26 = vpop.f32.mrb[145].mxu1 }
 0x403   : > { %v4466_v33 = vmax.f32 %v4434_v16, 0.0  ;;  %v4334_v52 = vmul.f32 %v8941_v44, %v4236_v26  ;;  %v6304_v62 = vpop.f32.mrb[146].mxu1 }
 0x404   : > { %v5491_v13 = vpack.c.bf16 %v4468_v23, %v4467_v27  ;;  %v4375_v0 = vadd.f32 %v8946_v31, %v4336_v18  ;;  %v4337_v50 = vmul.f32 %v6304_v62, %v8941_v44  ;;  %v4239_v19 = vpop.f32.mrb[147].mxu1  ;;  %v4414_v62 = vunpack.c.h.bf16 %v6639_v39 }
 0x405   : > { %v5486_v38 = vpack.c.bf16 %v4466_v33, %v4465_v40  ;;  %v4373_v21 = vadd.f32 %v8946_v31, %v4334_v52  ;;  %v4335_v12 = vmul.f32 %v8941_v44, %v4239_v19 }
 0x406   : > { %5552 = vst [vmem:[%s8965_s30 + $0x28] sm:$0xff] %v5491_v13   ;;  %v4439_v2 = vadd.f32 %v4407_v22, %v4375_v0  ;;  %v4376_v61 = vadd.f32 %v8946_v31, %v4337_v50  ;;  %v4413_v22 = vunpack.c.l.bf16 %v6639_v39 }
 0x407   : > { %5551 = vst [vmem:[%s8965_s30 + $0x20] sm:$0xff] %v5486_v38   ;;  %v4437_v60 = vadd.f32 %v4405_v54, %v4373_v21  ;;  %v4374_v20 = vadd.f32 %v8946_v31, %v4335_v12 }
 0x408   : > { %v4440_v4 = vadd.f32 %v4408_v46, %v4376_v61  ;;  %v4471_v15 = vmax.f32 %v4439_v2, 0.0  ;;  %v6640_v61 = vld [vmem:[%s6767_s16 + $0x68] sm:$0xff]  }
 0x409   : > { %v4438_v10 = vadd.f32 %v4406_v30, %v4374_v20  ;;  %v6307_v1 = vpop.f32.mrb[148].mxu1  ;;  %v4469_v57 = vmax.f32 %v4437_v60, 0.0  ;;  %v4419_v60 = vunpack.c.l.bf16 %v6640_v61  ;;  %v4420_v6 = vunpack.c.h.bf16 %v6640_v61 }
 0x40a   : > { %v4472_v63 = vmax.f32 %v4440_v4, 0.0  ;;  %v4340_v53 = vmul.f32 %v6307_v1, %v8941_v44  ;;  %v4252_v41 = vpop.f32.mrb[149].mxu1 }
 0x40b   : > { %v4470_v45 = vmax.f32 %v4438_v10, 0.0  ;;  %v4338_v34 = vmul.f32 %v8941_v44, %v4252_v41  ;;  %v6308_v49 = vpop.f32.mrb[150].mxu1 }
 0x40c   : > { %v5501_v14 = vpack.c.bf16 %v4472_v63, %v4471_v15  ;;  %v4379_v29 = vadd.f32 %v8946_v31, %v4340_v53  ;;  %v4341_v32 = vmul.f32 %v6308_v49, %v8941_v44  ;;  %v4255_v58 = vpop.f32.mrb[151].mxu1  ;;  %v4418_v49 = vunpack.c.h.bf16 %v6641_v35 }
 0x40d   : > { %v5496_v36 = vpack.c.bf16 %v4470_v45, %v4469_v57  ;;  %v4377_v5 = vadd.f32 %v8946_v31, %v4338_v34  ;;  %v4339_v47 = vmul.f32 %v8941_v44, %v4255_v58 }
 0x40e   : > { %5554 = vst [vmem:[%s8965_s30 + $0x38] sm:$0xff] %v5501_v14   ;;  %v4443_v37 = vadd.f32 %v4411_v48, %v4379_v29  ;;  %v4380_v55 = vadd.f32 %v8946_v31, %v4341_v32  ;;  %v4417_v48 = vunpack.c.l.bf16 %v6641_v35 }
 0x40f   : > { %5553 = vst [vmem:[%s8965_s30 + $0x30] sm:$0xff] %v5496_v36   ;;  %v4441_v51 = vadd.f32 %v4409_v43, %v4377_v5  ;;  %v4378_v42 = vadd.f32 %v8946_v31, %v4339_v47 }
 0x410   : > { %v4444_v24 = vadd.f32 %v4412_v11, %v4380_v55  ;;  %v4475_v7 = vmax.f32 %v4443_v37, 0.0  ;;  %v6642_v55 = vld [vmem:[%s6767_s16 + $0x78] sm:$0xff]  }
 0x411   : > { %v4442_v56 = vadd.f32 %v4410_v59, %v4378_v42  ;;  %v6311_v3 = vpop.f32.mrb[152].mxu1  ;;  %v4473_v27 = vmax.f32 %v4441_v51, 0.0  ;;  %v4423_v51 = vunpack.c.l.bf16 %v6642_v55  ;;  %v4424_v39 = vunpack.c.h.bf16 %v6642_v55 }
 0x412   : > { %v4476_v8 = vmax.f32 %v4444_v24, 0.0  ;;  %v4344_v16 = vmul.f32 %v6311_v3, %v8941_v44  ;;  %v4268_v25 = vpop.f32.mrb[153].mxu1 }
 0x413   : > { %v4474_v23 = vmax.f32 %v4442_v56, 0.0  ;;  %v4342_v18 = vmul.f32 %v8941_v44, %v4268_v25  ;;  %v6312_v26 = vpop.f32.mrb[154].mxu1 }
 0x414   : > { %v5511_v54 = vpack.c.bf16 %v4476_v8, %v4475_v7  ;;  %v4383_v40 = vadd.f32 %v8946_v31, %v4344_v16  ;;  %v4345_v33 = vmul.f32 %v6312_v26, %v8941_v44  ;;  %v4271_v52 = vpop.f32.mrb[155].mxu1  ;;  %v4422_v26 = vunpack.c.h.bf16 %v6643_v9 }
 0x415   : > { %v5506_v46 = vpack.c.bf16 %v4474_v23, %v4473_v27  ;;  %v4381_v13 = vadd.f32 %v8946_v31, %v4342_v18  ;;  %v4343_v0 = vmul.f32 %v8941_v44, %v4271_v52 }
 0x416   : > { %5556 = vst [vmem:[%s8965_s30 + $0x48] sm:$0xff] %v5511_v54   ;;  %v4447_v50 = vadd.f32 %v4415_v28, %v4383_v40  ;;  %v4384_v19 = vadd.f32 %v8946_v31, %v4345_v33  ;;  %v4421_v28 = vunpack.c.l.bf16 %v6643_v9 }
 0x417   : > { %5555 = vst [vmem:[%s8965_s30 + $0x40] sm:$0xff] %v5506_v46   ;;  %v4445_v30 = vadd.f32 %v4413_v22, %v4381_v13  ;;  %v4382_v38 = vadd.f32 %v8946_v31, %v4343_v0 }
 0x418   : > { %v4448_v21 = vadd.f32 %v4416_v17, %v4384_v19  ;;  %v4479_v20 = vmax.f32 %v4447_v50, 0.0 }
 0x419   : > { %v4446_v12 = vadd.f32 %v4414_v62, %v4382_v38  ;;  %v6315_v2 = vpop.f32.mrb[156].mxu1  ;;  %v4477_v15 = vmax.f32 %v4445_v30, 0.0 }
 0x41a   : > { %v4480_v4 = vmax.f32 %v4448_v21, 0.0  ;;  %v4348_v10 = vmul.f32 %v6315_v2, %v8941_v44  ;;  %v4284_v1 = vpop.f32.mrb[157].mxu1 }
 0x41b   : > { %v4478_v63 = vmax.f32 %v4446_v12, 0.0  ;;  %v4346_v53 = vmul.f32 %v8941_v44, %v4284_v1  ;;  %v6316_v41 = vpop.f32.mrb[158].mxu1 }
 0x41c   : > { %v5521_v43 = vpack.c.bf16 %v4480_v4, %v4479_v20  ;;  %v4387_v57 = vadd.f32 %v8946_v31, %v4348_v10  ;;  %v4349_v45 = vmul.f32 %v6316_v41, %v8941_v44  ;;  %v4287_v34 = vpop.f32.mrb[159].mxu1 }
 0x41d   : > { %v5516_v11 = vpack.c.bf16 %v4478_v63, %v4477_v15  ;;  %v4385_v14 = vadd.f32 %v8946_v31, %v4346_v53  ;;  %v4347_v29 = vmul.f32 %v8941_v44, %v4287_v34 }
 0x41e   : > { %5558 = vst [vmem:[%s8965_s30 + $0x58] sm:$0xff] %v5521_v43   ;;  %v4451_v32 = vadd.f32 %v4419_v60, %v4387_v57  ;;  %v4388_v58 = vadd.f32 %v8946_v31, %v4349_v45 }
 0x41f   : > { %5557 = vst [vmem:[%s8965_s30 + $0x50] sm:$0xff] %v5516_v11   ;;  %v4449_v59 = vadd.f32 %v4417_v48, %v4385_v14  ;;  %v4386_v36 = vadd.f32 %v8946_v31, %v4347_v29 }
 0x420   : > { %v4452_v5 = vadd.f32 %v4420_v6, %v4388_v58  ;;  %v4483_v42 = vmax.f32 %v4451_v32, 0.0 }
 0x421   : > { %v4450_v47 = vadd.f32 %v4418_v49, %v4386_v36  ;;  %v6319_v37 = vpop.f32.mrb[160].mxu1  ;;  %v4481_v7 = vmax.f32 %v4449_v59, 0.0 }
 0x422   : > { %v4484_v24 = vmax.f32 %v4452_v5, 0.0  ;;  %v4352_v56 = vmul.f32 %v6319_v37, %v8941_v44  ;;  %v4300_v3 = vpop.f32.mrb[161].mxu1 }
 0x423   : > { %v4482_v8 = vmax.f32 %v4450_v47, 0.0  ;;  %v4350_v16 = vmul.f32 %v8941_v44, %v4300_v3  ;;  %v6320_v25 = vpop.f32.mrb[162].mxu1 }
 0x424   : > { %v5531_v22 = vpack.c.bf16 %v4484_v24, %v4483_v42  ;;  %v4391_v27 = vadd.f32 %v8946_v31, %v4352_v56  ;;  %v4353_v23 = vmul.f32 %v6320_v25, %v8941_v44  ;;  %v4303_v18 = vpop.f32.mrb[163].mxu1 }
 0x425   : > { %v5526_v17 = vpack.c.bf16 %v4482_v8, %v4481_v7  ;;  %v4389_v54 = vadd.f32 %v8946_v31, %v4350_v16  ;;  %v4351_v40 = vmul.f32 %v8941_v44, %v4303_v18 }
 0x426   : > { %5560 = vst [vmem:[%s8965_s30 + $0x68] sm:$0xff] %v5531_v22   ;;  %v4455_v33 = vadd.f32 %v4423_v51, %v4391_v27  ;;  %v4392_v52 = vadd.f32 %v8946_v31, %v4353_v23 }
 0x427   : > { %5559 = vst [vmem:[%s8965_s30 + $0x60] sm:$0xff] %v5526_v17   ;;  %v4453_v62 = vadd.f32 %v4421_v28, %v4389_v54  ;;  %v4390_v46 = vadd.f32 %v8946_v31, %v4351_v40 }
 0x428   : > { %v4456_v13 = vadd.f32 %v4424_v39, %v4392_v52  ;;  %v4487_v50 = vmax.f32 %v4455_v33, 0.0 }
 0x429   : > { %v4454_v0 = vadd.f32 %v4422_v26, %v4390_v46  ;;  %v4485_v30 = vmax.f32 %v4453_v62, 0.0 }
 0x42a   : > { %v4488_v19 = vmax.f32 %v4456_v13, 0.0 }
 0x42b   : > { %v4486_v38 = vmax.f32 %v4454_v0, 0.0 }
 0x42c   : > { %v5541_v21 = vpack.c.bf16 %v4488_v19, %v4487_v50 }
 0x42d   : > { %v5536_v12 = vpack.c.bf16 %v4486_v38, %v4485_v30 }
 0x42e   : > { %5562 = vst [vmem:[%s8965_s30 + $0x78] sm:$0xff] %v5541_v21  }
 0x42f   : > { %5561 = vst [vmem:[%s8965_s30 + $0x70] sm:$0xff] %v5536_v12  }
 0x430 PF: > { %s22_s23 = sadd.s32 1, %s6666_s23   ;;  %s9499_s21 = smov %s6662_s22 }
 0x431   : > { %p19_p5 = scmp.ge.s32.totalorder %s22_s23, 4   ;;  %s9500_s22 = smov %s9502_s24 }
 0x433   :  { %21 = sbr.rel (!%p19_p5) target bundleno = 2 (0x2), region = 106 }

</bundles_post_ra>
